<compile_context>
chip_gen: v6e
topology: v6e:2x2x1
jax: 0.10.0
libtpu: 0.0.40
codegen_flags: <defaults>
</compile_context>

<pallas_src>
import functools

import jax
import jax.numpy as jnp
from jax.experimental import pallas as pl
from jax.experimental.pallas import tpu as pltpu

_VMEM_LIMIT = 32 * 1024 * 1024  # explicit scoped-VMEM limit (safe on v5e/v6e/v7x)
_MAX_SINGLE_K = 2048            # K <= this -> single reduction step, no scratch


def _round_up(x, m):
    return (x + m - 1) // m * m


# --------------------------- fused GEMM kernels (conv hot path) ---------------------------
# y = maybe_relu( A @ B + bias (+ residual) )

def _gemm_kernel_1k(a_ref, b_ref, bias_ref, *rest, relu, has_res):
    # Single K step: no accumulator scratch, write straight to the output tile.
    if has_res:
        res_ref, o_ref = rest
    else:
        (o_ref,) = rest
    y = jnp.dot(a_ref[...], b_ref[...], preferred_element_type=jnp.float32)
    y = y + bias_ref[...].astype(jnp.float32)
    if has_res:
        y = y + res_ref[...].astype(jnp.float32)
    if relu:
        y = jnp.maximum(y, 0.0)
    o_ref[...] = y.astype(o_ref.dtype)


def _gemm_kernel_mk(a_ref, b_ref, bias_ref, *rest, relu, has_res):
    # Multi K step fallback (not hit at the shapes in this script).
    if has_res:
        res_ref, o_ref, acc_ref = rest
    else:
        o_ref, acc_ref = rest
    k = pl.program_id(2)

    @pl.when(k == 0)
    def _():
        acc_ref[...] = jnp.zeros_like(acc_ref)

    acc_ref[...] += jnp.dot(a_ref[...], b_ref[...],
                            preferred_element_type=jnp.float32)

    @pl.when(k == pl.num_programs(2) - 1)
    def _():
        y = acc_ref[...] + bias_ref[...].astype(jnp.float32)
        if has_res:
            y = y + res_ref[...].astype(jnp.float32)
        if relu:
            y = jnp.maximum(y, 0.0)
        o_ref[...] = y.astype(o_ref.dtype)


def _pick_tiles(M, N):
    tm = min(_round_up(M, 8), 256)
    if N <= 256:
        tn = N                      # full width (64 / 128 / 256)
    elif N % 256 == 0:
        tn = 256                    # e.g. N=512 -> 2 lane-dense j-blocks
    elif N % 128 == 0:
        tn = 128
    else:
        tn = N
    return tm, tn


def fused_gemm(a, b, bias, residual=None, relu=True, out_dtype=jnp.bfloat16):
    """A:(M,K), B:(K,N) -> maybe_relu(A@B + bias (+residual)); bf16 MXU, f32 acc."""
    M, K = a.shape
    K2, N = b.shape
    assert K == K2
    a = a.astype(jnp.bfloat16)
    b = b.astype(jnp.bfloat16)
    bias2d = bias.reshape(1, N).astype(jnp.float32)

    tm, tn = _pick_tiles(M, N)
    gm, gn = pl.cdiv(M, tm), pl.cdiv(N, tn)

    has_res = residual is not None
    inputs = [a, b, bias2d]
    flops = 2 * M * N * K
    bytes_accessed = (M * K + K * N + M * N) * 2 + N * 4
    if has_res:
        bytes_accessed += M * N * 2

    if K <= _MAX_SINGLE_K:
        # Single reduction step: full-K blocks, 2-D grid, no scratch.
        in_specs = [
            pl.BlockSpec((tm, K), lambda i, j: (i, 0)),
            pl.BlockSpec((K, tn), lambda i, j: (0, j)),
            pl.BlockSpec((1, tn), lambda i, j: (0, j)),
        ]
        if has_res:
            inputs.append(residual.astype(jnp.bfloat16))
            in_specs.append(pl.BlockSpec((tm, tn), lambda i, j: (i, j)))
        kernel = functools.partial(_gemm_kernel_1k, relu=relu, has_res=has_res)
        grid = (gm, gn)
        out_spec = pl.BlockSpec((tm, tn), lambda i, j: (i, j))
        scratch = []
        dims = ("parallel", "parallel")
    else:
        tk = 512
        Kp = _round_up(K, tk)
        a = jnp.pad(a, ((0, 0), (0, Kp - K)))
        b = jnp.pad(b, ((0, Kp - K), (0, 0)))
        inputs[0], inputs[1] = a, b
        in_specs = [
            pl.BlockSpec((tm, tk), lambda i, j, k: (i, k)),
            pl.BlockSpec((tk, tn), lambda i, j, k: (k, j)),
            pl.BlockSpec((1, tn), lambda i, j, k: (0, j)),
        ]
        if has_res:
            inputs.append(residual.astype(jnp.bfloat16))
            in_specs.append(pl.BlockSpec((tm, tn), lambda i, j, k: (i, j)))
        kernel = functools.partial(_gemm_kernel_mk, relu=relu, has_res=has_res)
        grid = (gm, gn, Kp // tk)
        out_spec = pl.BlockSpec((tm, tn), lambda i, j, k: (i, j))
        scratch = [pltpu.VMEM((tm, tn), jnp.float32)]
        dims = ("parallel", "parallel", "arbitrary")

    return pl.pallas_call(
        kernel,
        out_shape=jax.ShapeDtypeStruct((M, N), out_dtype),
        grid_spec=pltpu.PrefetchScalarGridSpec(
            num_scalar_prefetch=0,
            grid=grid,
            in_specs=in_specs,
            out_specs=out_spec,
            scratch_shapes=scratch),
        compiler_params=pltpu.CompilerParams(
            dimension_semantics=dims,
            vmem_limit_bytes=_VMEM_LIMIT),
        cost_estimate=pl.CostEstimate(
            flops=flops, transcendentals=0, bytes_accessed=bytes_accessed),
    )(*inputs)


# --------------------------- fused maxpool 3x3 / stride 2 / pad 1 ---------------------------
def _maxpool_kernel(ee_ref, eo_ref, oe_ref, oo_ref, o_ref):
    ee = ee_ref[...]   # (1, Ho+1, Wo+1, C)
    eo = eo_ref[...]   # (1, Ho+1, Wo,   C)
    oe = oe_ref[...]   # (1, Ho,   Wo+1, C)
    oo = oo_ref[...]   # (1, Ho,   Wo,   C)
    Ho, Wo = oo.shape[1], oo.shape[2]
    m = oo
    m = jnp.maximum(m, ee[:, :Ho, :Wo, :])
    m = jnp.maximum(m, ee[:, :Ho, 1:, :])
    m = jnp.maximum(m, ee[:, 1:, :Wo, :])
    m = jnp.maximum(m, ee[:, 1:, 1:, :])
    m = jnp.maximum(m, eo[:, :Ho, :, :])
    m = jnp.maximum(m, eo[:, 1:, :, :])
    m = jnp.maximum(m, oe[:, :, :Wo, :])
    m = jnp.maximum(m, oe[:, :, 1:, :])
    o_ref[...] = m.astype(o_ref.dtype)


def maxpool_3x3_s2_p1(x):
    """x: NHWC.  One Pallas kernel over parity-decomposed planes of the padded input."""
    N, H, W, C = x.shape
    Ho = (H + 2 - 3) // 2 + 1
    Wo = (W + 2 - 3) // 2 + 1
    xp = jnp.pad(x, ((0, 0), (1, 1), (1, 1), (0, 0)), constant_values=-jnp.inf)
    # Window rows {2h, 2h+1, 2h+2} / cols {2w, 2w+1, 2w+2} -> even/odd parity planes,
    # turning the strided window max into 9 unit-stride shifted maxes in-kernel.
    ee = xp[:, 0::2, 0::2, :][:, :Ho + 1, :Wo + 1, :]
    eo = xp[:, 0::2, 1::2, :][:, :Ho + 1, :Wo, :]
    oe = xp[:, 1::2, 0::2, :][:, :Ho, :Wo + 1, :]
    oo = xp[:, 1::2, 1::2, :][:, :Ho, :Wo, :]
    return pl.pallas_call(
        _maxpool_kernel,
        out_shape=jax.ShapeDtypeStruct((N, Ho, Wo, C), x.dtype),
        grid_spec=pltpu.PrefetchScalarGridSpec(
            num_scalar_prefetch=0,
            grid=(N,),
            in_specs=[pl.BlockSpec((1, Ho + 1, Wo + 1, C), lambda n: (n, 0, 0, 0)),
                      pl.BlockSpec((1, Ho + 1, Wo, C), lambda n: (n, 0, 0, 0)),
                      pl.BlockSpec((1, Ho, Wo + 1, C), lambda n: (n, 0, 0, 0)),
                      pl.BlockSpec((1, Ho, Wo, C), lambda n: (n, 0, 0, 0))],
            out_specs=pl.BlockSpec((1, Ho, Wo, C), lambda n: (n, 0, 0, 0))),
        compiler_params=pltpu.CompilerParams(
            dimension_semantics=("parallel",),
            vmem_limit_bytes=_VMEM_LIMIT),
    )(ee, eo, oe, oo)


# --------------------------- conv wrapper (im2col glue + fused GEMM) ---------------------------
def _conv_bn(x, w, bias, stride=1, pad=0, relu=True, residual=None):
    """x: NHWC bf16; w: (kh,kw,Cin,Cout) bf16 with BN already folded; bias: (Cout,) f32."""
    N, H, W, Cin = x.shape
    kh, kw, _, Cout = w.shape
    Ho = (H + 2 * pad - kh) // stride + 1
    Wo = (W + 2 * pad - kw) // stride + 1
    if kh == 1 and kw == 1:
        # 1x1 conv: no im2col, just a (strided) reshape.
        xs = x if stride == 1 else x[:, ::stride, ::stride, :]
        A = xs.reshape(N * Ho * Wo, Cin)
    else:
        # TODO(synk): fold this im2col into the GEMM (tap grid axis / in-kernel halo
        # slices); kept as bf16 XLA slicing glue here for lowering robustness.
        xp = jnp.pad(x, ((0, 0), (pad, pad), (pad, pad), (0, 0)))
        patches = [xp[:, i:i + (Ho - 1) * stride + 1:stride,
                        j:j + (Wo - 1) * stride + 1:stride, :]
                   for i in range(kh) for j in range(kw)]
        A = jnp.stack(patches, axis=3).reshape(N * Ho * Wo, kh * kw * Cin)
    B = w.reshape(kh * kw * Cin, Cout)
    res2d = None if residual is None else residual.reshape(N * Ho * Wo, Cout)
    out = fused_gemm(A, B, bias, residual=res2d, relu=relu)
    return out.reshape(N, Ho, Wo, Cout)


def bottleneck(x, fb):
    s = fb["stride"]
    if "cd" in fb:
        wd, bd = fb["cd"]
        identity = _conv_bn(x, wd, bd, stride=s, pad=0, relu=False)
    else:
        identity = x
    w1, b1 = fb["c1"]
    out = _conv_bn(x, w1, b1, stride=1, pad=0, relu=True)
    w2, b2 = fb["c2"]
    out = _conv_bn(out, w2, b2, stride=s, pad=1, relu=True)
    w3, b3 = fb["c3"]
    # Residual add + final ReLU fused into the third conv's GEMM epilogue.
    out = _conv_bn(out, w3, b3, stride=1, pad=0, relu=True, residual=identity)
    return out


# --------------------------- BN folding (eval-mode) ---------------------------
def _fold_bn(w, bn, eps=1e-5):
    scale = bn["gamma"] / jnp.sqrt(bn["var"] + eps)
    bias = bn["beta"] - bn["mean"] * scale
    return (w * scale).astype(jnp.bfloat16), bias.astype(jnp.float32)


def fold_params(params):
    fp = {"conv1": _fold_bn(params["conv1"], params["bn1"]), "layers": []}
    for blocks in params["layers"]:
        fblocks = []
        for blk in blocks:
            fb = {"stride": blk["stride"],
                  "c1": _fold_bn(blk["w1"], blk["bn1"]),
                  "c2": _fold_bn(blk["w2"], blk["bn2"]),
                  "c3": _fold_bn(blk["w3"], blk["bn3"])}
            if "wd" in blk:
                fb["cd"] = _fold_bn(blk["wd"], blk["bnd"])
            fblocks.append(fb)
        fp["layers"].append(fblocks)
    return fp


# --------------------------- parameter init (deterministic, synthetic) ---------------------------
# TODO(synk): torchvision pretrained resnet50 weights are not loadable here; use
# deterministic synthetic weights with the exact same shapes / structure.
def _init_conv(key, kh, kw, cin, cout):
    return 0.05 * jax.random.normal(key, (kh, kw, cin, cout), jnp.float32)


def _init_bn(key, c):
    k1, k2, k3, k4 = jax.random.split(key, 4)
    return {"gamma": 1.0 + 0.1 * jax.random.normal(k1, (c,), jnp.float32),
            "beta": 0.1 * jax.random.normal(k2, (c,), jnp.float32),
            "mean": 0.1 * jax.random.normal(k3, (c,), jnp.float32),
            "var": 0.5 + jax.random.uniform(k4, (c,), jnp.float32)}


def init_params(key, specify_num=3):
    counter = [0]

    def nk():
        counter[0] += 1
        return jax.random.fold_in(key, counter[0])

    params = {"conv1": _init_conv(nk(), 7, 7, 3, 64), "bn1": _init_bn(nk(), 64)}
    layers_cfg = {1: (64, 3, 1), 2: (128, 4, 2), 3: (256, 6, 2), 4: (512, 3, 2)}
    inplanes = 64
    params["layers"] = []
    for li in range(1, specify_num):
        planes, nblocks, stride = layers_cfg[li]
        blocks = []
        for b in range(nblocks):
            s = stride if b == 0 else 1
            blk = {"stride": s,
                   "w1": _init_conv(nk(), 1, 1, inplanes, planes),
                   "bn1": _init_bn(nk(), planes),
                   "w2": _init_conv(nk(), 3, 3, planes, planes),
                   "bn2": _init_bn(nk(), planes),
                   "w3": _init_conv(nk(), 1, 1, planes, planes * 4),
                   "bn3": _init_bn(nk(), planes * 4)}
            if b == 0:
                blk["wd"] = _init_conv(nk(), 1, 1, inplanes, planes * 4)
                blk["bnd"] = _init_bn(nk(), planes * 4)
            inplanes = planes * 4
            blocks.append(blk)
        params["layers"].append(blocks)
    return params


# --------------------------- forward (specify_num=3: stem + layer1 + layer2) ---------------------------
def opt_resnet_forward(folded, x_nchw):
    x = jnp.transpose(x_nchw, (0, 2, 3, 1)).astype(jnp.bfloat16)   # NCHW -> NHWC
    w1, b1 = folded["conv1"]
    x = _conv_bn(x, w1, b1, stride=2, pad=3, relu=True)            # conv1 7x7/2 + BN + ReLU (fused)
    x = maxpool_3x3_s2_p1(x)                                       # maxpool 3x3/2 (single kernel)
    for blocks in folded["layers"]:                                # layer1, layer2
        for fb in blocks:
            x = bottleneck(x, fb)
    return jnp.transpose(x, (0, 3, 1, 2)).astype(jnp.float32)      # NHWC -> NCHW


if __name__ == "__main__":
    key = jax.random.PRNGKey(0)
    params = init_params(jax.random.fold_in(key, 1), specify_num=3)
    folded = fold_params(params)
    x = jax.random.normal(jax.random.fold_in(key, 2), (2, 3, 32, 32), jnp.float32)

    fwd = jax.jit(functools.partial(opt_resnet_forward, folded))
    out = jax.block_until_ready(fwd(x))
    assert out.shape == (2, 512, 4, 4), out.shape
    assert bool(jnp.all(jnp.isfinite(out)))
    print("KERNEL_OK")
</pallas_src>

<mosaic_0001>
module attributes {stable_mosaic.version = 11 : i64} {
  func.func @_gemm_kernel_1k(%arg0: i32, %arg1: i32, %arg2: memref<256x147xbf16, #tpu.memory_space<vmem>>, %arg3: memref<147x64xbf16, #tpu.memory_space<vmem>>, %arg4: memref<1x64xf32, #tpu.memory_space<vmem>>, %arg5: memref<256x64xbf16, #tpu.memory_space<vmem>>) attributes {dimension_semantics = [#tpu.dimension_semantics<parallel>, #tpu.dimension_semantics<parallel>], iteration_bounds = array<i64: 2, 1>, scalar_prefetch = 0 : i64, scratch_operands = 0 : i64, tpu.core_type = #tpu.core_type<tc>, window_params = [{transform_indices = @transform_0, window_bounds = array<i64: 256, 147>}, {transform_indices = @transform_1, window_bounds = array<i64: 147, 64>}, {transform_indices = @transform_2, window_bounds = array<i64: 1, 64>}, {transform_indices = @transform_3, window_bounds = array<i64: 256, 64>}]} {
    %c0 = arith.constant 0 : index
    %c0_0 = arith.constant 0 : index
    %0 = vector.load %arg2[%c0, %c0_0] : memref<256x147xbf16, #tpu.memory_space<vmem>>, vector<256x147xbf16>
    %c0_1 = arith.constant 0 : index
    %c0_2 = arith.constant 0 : index
    %1 = vector.load %arg3[%c0_1, %c0_2] : memref<147x64xbf16, #tpu.memory_space<vmem>>, vector<147x64xbf16>
    %cst = arith.constant dense<0.000000e+00> : vector<256x64xf32>
    %2 = tpu.matmul %0, %1, %cst {dimension_numbers = #tpu.dot_dimension_numbers<[1], [0], [0], [1], [0, 0, 1, 1], [], []>} : vector<256x147xbf16>, vector<147x64xbf16>, vector<256x64xf32> -> vector<256x64xf32>
    %c0_3 = arith.constant 0 : index
    %c0_4 = arith.constant 0 : index
    %3 = vector.load %arg4[%c0_3, %c0_4] : memref<1x64xf32, #tpu.memory_space<vmem>>, vector<1x64xf32>
    %4 = vector.broadcast %3 : vector<1x64xf32> to vector<256x64xf32>
    %5 = arith.addf %2, %4 : vector<256x64xf32>
    %cst_5 = arith.constant 0.000000e+00 : f32
    %6 = vector.broadcast %cst_5 : f32 to vector<256x64xf32>
    %7 = arith.maximumf %5, %6 : vector<256x64xf32>
    %8 = arith.truncf %7 : vector<256x64xf32> to vector<256x64xbf16>
    %c0_6 = arith.constant 0 : index
    %c0_7 = arith.constant 0 : index
    %9 = vector.load %arg5[%c0_6, %c0_7] : memref<256x64xbf16, #tpu.memory_space<vmem>>, vector<256x64xbf16>
    tpu.vector_store %arg5[%c0_6, %c0_7], %8 {strides = array<i32>} : memref<256x64xbf16, #tpu.memory_space<vmem>>, vector<256x64xbf16>,
    return
  }
  func.func @transform_0(%arg0: i32, %arg1: i32) -> (i32, i32) {
    %c0_i32 = arith.constant 0 : i32
    %c0_i32_0 = arith.constant 0 : i32
    return %arg0, %c0_i32 : i32, i32
  }
  func.func @transform_1(%arg0: i32, %arg1: i32) -> (i32, i32) {
    %c0_i32 = arith.constant 0 : i32
    %c0_i32_0 = arith.constant 0 : i32
    return %c0_i32, %arg1 : i32, i32
  }
  func.func @transform_2(%arg0: i32, %arg1: i32) -> (i32, i32) {
    %c0_i32 = arith.constant 0 : i32
    %c0_i32_0 = arith.constant 0 : i32
    return %c0_i32, %arg1 : i32, i32
  }
  func.func @transform_3(%arg0: i32, %arg1: i32) -> (i32, i32) {
    %c0_i32 = arith.constant 0 : i32
    return %arg0, %arg1 : i32, i32
  }
}

module attributes {stable_mosaic.version = 11 : i64} {
  func.func @_maxpool_kernel(%arg0: i32, %arg1: memref<1x9x9x64xbf16, #tpu.memory_space<vmem>>, %arg2: memref<1x9x8x64xbf16, #tpu.memory_space<vmem>>, %arg3: memref<1x8x9x64xbf16, #tpu.memory_space<vmem>>, %arg4: memref<1x8x8x64xbf16, #tpu.memory_space<vmem>>, %arg5: memref<1x8x8x64xbf16, #tpu.memory_space<vmem>>) attributes {dimension_semantics = [#tpu.dimension_semantics<parallel>], iteration_bounds = array<i64: 2>, scalar_prefetch = 0 : i64, scratch_operands = 0 : i64, tpu.core_type = #tpu.core_type<tc>, window_params = [{transform_indices = @transform_0, window_bounds = array<i64: 1, 9, 9, 64>}, {transform_indices = @transform_1, window_bounds = array<i64: 1, 9, 8, 64>}, {transform_indices = @transform_2, window_bounds = array<i64: 1, 8, 9, 64>}, {transform_indices = @transform_3, window_bounds = array<i64: 1, 8, 8, 64>}, {transform_indices = @transform_4, window_bounds = array<i64: 1, 8, 8, 64>}]} {
    %c0 = arith.constant 0 : index
    %c0_0 = arith.constant 0 : index
    %c0_1 = arith.constant 0 : index
    %c0_2 = arith.constant 0 : index
    %0 = vector.load %arg1[%c0, %c0_0, %c0_1, %c0_2] : memref<1x9x9x64xbf16, #tpu.memory_space<vmem>>, vector<1x9x9x64xbf16>
    %c0_3 = arith.constant 0 : index
    %c0_4 = arith.constant 0 : index
    %c0_5 = arith.constant 0 : index
    %c0_6 = arith.constant 0 : index
    %1 = vector.load %arg2[%c0_3, %c0_4, %c0_5, %c0_6] : memref<1x9x8x64xbf16, #tpu.memory_space<vmem>>, vector<1x9x8x64xbf16>
    %c0_7 = arith.constant 0 : index
    %c0_8 = arith.constant 0 : index
    %c0_9 = arith.constant 0 : index
    %c0_10 = arith.constant 0 : index
    %2 = vector.load %arg3[%c0_7, %c0_8, %c0_9, %c0_10] : memref<1x8x9x64xbf16, #tpu.memory_space<vmem>>, vector<1x8x9x64xbf16>
    %c0_11 = arith.constant 0 : index
    %c0_12 = arith.constant 0 : index
    %c0_13 = arith.constant 0 : index
    %c0_14 = arith.constant 0 : index
    %3 = vector.load %arg4[%c0_11, %c0_12, %c0_13, %c0_14] : memref<1x8x8x64xbf16, #tpu.memory_space<vmem>>, vector<1x8x8x64xbf16>
    %4 = vector.extract_strided_slice %0 {offsets = [0, 0, 0, 0], sizes = [1, 8, 8, 64], strides = [1, 1, 1, 1]} : vector<1x9x9x64xbf16> to vector<1x8x8x64xbf16>
    %5 = arith.maximumf %3, %4 : vector<1x8x8x64xbf16>
    %6 = vector.extract_strided_slice %0 {offsets = [0, 0, 1, 0], sizes = [1, 8, 8, 64], strides = [1, 1, 1, 1]} : vector<1x9x9x64xbf16> to vector<1x8x8x64xbf16>
    %7 = arith.maximumf %5, %6 : vector<1x8x8x64xbf16>
    %8 = vector.extract_strided_slice %0 {offsets = [0, 1, 0, 0], sizes = [1, 8, 8, 64], strides = [1, 1, 1, 1]} : vector<1x9x9x64xbf16> to vector<1x8x8x64xbf16>
    %9 = arith.maximumf %7, %8 : vector<1x8x8x64xbf16>
    %10 = vector.extract_strided_slice %0 {offsets = [0, 1, 1, 0], sizes = [1, 8, 8, 64], strides = [1, 1, 1, 1]} : vector<1x9x9x64xbf16> to vector<1x8x8x64xbf16>
    %11 = arith.maximumf %9, %10 : vector<1x8x8x64xbf16>
    %12 = vector.extract_strided_slice %1 {offsets = [0, 0, 0, 0], sizes = [1, 8, 8, 64], strides = [1, 1, 1, 1]} : vector<1x9x8x64xbf16> to vector<1x8x8x64xbf16>
    %13 = arith.maximumf %11, %12 : vector<1x8x8x64xbf16>
    %14 = vector.extract_strided_slice %1 {offsets = [0, 1, 0, 0], sizes = [1, 8, 8, 64], strides = [1, 1, 1, 1]} : vector<1x9x8x64xbf16> to vector<1x8x8x64xbf16>
    %15 = arith.maximumf %13, %14 : vector<1x8x8x64xbf16>
    %16 = vector.extract_strided_slice %2 {offsets = [0, 0, 0, 0], sizes = [1, 8, 8, 64], strides = [1, 1, 1, 1]} : vector<1x8x9x64xbf16> to vector<1x8x8x64xbf16>
    %17 = arith.maximumf %15, %16 : vector<1x8x8x64xbf16>
    %18 = vector.extract_strided_slice %2 {offsets = [0, 0, 1, 0], sizes = [1, 8, 8, 64], strides = [1, 1, 1, 1]} : vector<1x8x9x64xbf16> to vector<1x8x8x64xbf16>
    %19 = arith.maximumf %17, %18 : vector<1x8x8x64xbf16>
    %c0_15 = arith.constant 0 : index
    %c0_16 = arith.constant 0 : index
    %c0_17 = arith.constant 0 : index
    %c0_18 = arith.constant 0 : index
    %20 = vector.load %arg5[%c0_15, %c0_16, %c0_17, %c0_18] : memref<1x8x8x64xbf16, #tpu.memory_space<vmem>>, vector<1x8x8x64xbf16>
    tpu.vector_store %arg5[%c0_15, %c0_16, %c0_17, %c0_18], %19 {strides = array<i32>} : memref<1x8x8x64xbf16, #tpu.memory_space<vmem>>, vector<1x8x8x64xbf16>,
    return
  }
  func.func @transform_0(%arg0: i32) -> (i32, i32, i32, i32) {
    %c0_i32 = arith.constant 0 : i32
    %c0_i32_0 = arith.constant 0 : i32
    %c0_i32_1 = arith.constant 0 : i32
    %c0_i32_2 = arith.constant 0 : i32
    return %arg0, %c0_i32, %c0_i32_0, %c0_i32_1 : i32, i32, i32, i32
  }
  func.func @transform_1(%arg0: i32) -> (i32, i32, i32, i32) {
    %c0_i32 = arith.constant 0 : i32
    %c0_i32_0 = arith.constant 0 : i32
    %c0_i32_1 = arith.constant 0 : i32
    %c0_i32_2 = arith.constant 0 : i32
    return %arg0, %c0_i32, %c0_i32_0, %c0_i32_1 : i32, i32, i32, i32
  }
  func.func @transform_2(%arg0: i32) -> (i32, i32, i32, i32) {
    %c0_i32 = arith.constant 0 : i32
    %c0_i32_0 = arith.constant 0 : i32
    %c0_i32_1 = arith.constant 0 : i32
    %c0_i32_2 = arith.constant 0 : i32
    return %arg0, %c0_i32, %c0_i32_0, %c0_i32_1 : i32, i32, i32, i32
  }
  func.func @transform_3(%arg0: i32) -> (i32, i32, i32, i32) {
    %c0_i32 = arith.constant 0 : i32
    %c0_i32_0 = arith.constant 0 : i32
    %c0_i32_1 = arith.constant 0 : i32
    %c0_i32_2 = arith.constant 0 : i32
    return %arg0, %c0_i32, %c0_i32_0, %c0_i32_1 : i32, i32, i32, i32
  }
  func.func @transform_4(%arg0: i32) -> (i32, i32, i32, i32) {
    %c0_i32 = arith.constant 0 : i32
    %c0_i32_0 = arith.constant 0 : i32
    %c0_i32_1 = arith.constant 0 : i32
    %c0_i32_2 = arith.constant 0 : i32
    return %arg0, %c0_i32, %c0_i32_0, %c0_i32_1 : i32, i32, i32, i32
  }
}

module attributes {stable_mosaic.version = 11 : i64} {
  func.func @_gemm_kernel_1k(%arg0: i32, %arg1: i32, %arg2: memref<128x64xbf16, #tpu.memory_space<vmem>>, %arg3: memref<64x64xbf16, #tpu.memory_space<vmem>>, %arg4: memref<1x64xf32, #tpu.memory_space<vmem>>, %arg5: memref<128x64xbf16, #tpu.memory_space<vmem>>) attributes {dimension_semantics = [#tpu.dimension_semantics<parallel>, #tpu.dimension_semantics<parallel>], iteration_bounds = array<i64: 1, 1>, scalar_prefetch = 0 : i64, scratch_operands = 0 : i64, tpu.core_type = #tpu.core_type<tc>, window_params = [{transform_indices = @transform_0, window_bounds = array<i64: 128, 64>}, {transform_indices = @transform_1, window_bounds = array<i64: 64, 64>}, {transform_indices = @transform_2, window_bounds = array<i64: 1, 64>}, {transform_indices = @transform_3, window_bounds = array<i64: 128, 64>}]} {
    %c0 = arith.constant 0 : index
    %c0_0 = arith.constant 0 : index
    %0 = vector.load %arg2[%c0, %c0_0] : memref<128x64xbf16, #tpu.memory_space<vmem>>, vector<128x64xbf16>
    %c0_1 = arith.constant 0 : index
    %c0_2 = arith.constant 0 : index
    %1 = vector.load %arg3[%c0_1, %c0_2] : memref<64x64xbf16, #tpu.memory_space<vmem>>, vector<64x64xbf16>
    %cst = arith.constant dense<0.000000e+00> : vector<128x64xf32>
    %2 = tpu.matmul %0, %1, %cst {dimension_numbers = #tpu.dot_dimension_numbers<[1], [0], [0], [1], [0, 0, 1, 1], [], []>} : vector<128x64xbf16>, vector<64x64xbf16>, vector<128x64xf32> -> vector<128x64xf32>
    %c0_3 = arith.constant 0 : index
    %c0_4 = arith.constant 0 : index
    %3 = vector.load %arg4[%c0_3, %c0_4] : memref<1x64xf32, #tpu.memory_space<vmem>>, vector<1x64xf32>
    %4 = vector.broadcast %3 : vector<1x64xf32> to vector<128x64xf32>
    %5 = arith.addf %2, %4 : vector<128x64xf32>
    %cst_5 = arith.constant 0.000000e+00 : f32
    %6 = vector.broadcast %cst_5 : f32 to vector<128x64xf32>
    %7 = arith.maximumf %5, %6 : vector<128x64xf32>
    %8 = arith.truncf %7 : vector<128x64xf32> to vector<128x64xbf16>
    %c0_6 = arith.constant 0 : index
    %c0_7 = arith.constant 0 : index
    %9 = vector.load %arg5[%c0_6, %c0_7] : memref<128x64xbf16, #tpu.memory_space<vmem>>, vector<128x64xbf16>
    tpu.vector_store %arg5[%c0_6, %c0_7], %8 {strides = array<i32>} : memref<128x64xbf16, #tpu.memory_space<vmem>>, vector<128x64xbf16>,
    return
  }
  func.func @transform_0(%arg0: i32, %arg1: i32) -> (i32, i32) {
    %c0_i32 = arith.constant 0 : i32
    %c0_i32_0 = arith.constant 0 : i32
    return %arg0, %c0_i32 : i32, i32
  }
  func.func @transform_1(%arg0: i32, %arg1: i32) -> (i32, i32) {
    %c0_i32 = arith.constant 0 : i32
    %c0_i32_0 = arith.constant 0 : i32
    return %c0_i32, %arg1 : i32, i32
  }
  func.func @transform_2(%arg0: i32, %arg1: i32) -> (i32, i32) {
    %c0_i32 = arith.constant 0 : i32
    %c0_i32_0 = arith.constant 0 : i32
    return %c0_i32, %arg1 : i32, i32
  }
  func.func @transform_3(%arg0: i32, %arg1: i32) -> (i32, i32) {
    %c0_i32 = arith.constant 0 : i32
    return %arg0, %arg1 : i32, i32
  }
}

module attributes {stable_mosaic.version = 11 : i64} {
  func.func @_gemm_kernel_1k(%arg0: i32, %arg1: i32, %arg2: memref<128x576xbf16, #tpu.memory_space<vmem>>, %arg3: memref<576x64xbf16, #tpu.memory_space<vmem>>, %arg4: memref<1x64xf32, #tpu.memory_space<vmem>>, %arg5: memref<128x64xbf16, #tpu.memory_space<vmem>>) attributes {dimension_semantics = [#tpu.dimension_semantics<parallel>, #tpu.dimension_semantics<parallel>], iteration_bounds = array<i64: 1, 1>, scalar_prefetch = 0 : i64, scratch_operands = 0 : i64, tpu.core_type = #tpu.core_type<tc>, window_params = [{transform_indices = @transform_0, window_bounds = array<i64: 128, 576>}, {transform_indices = @transform_1, window_bounds = array<i64: 576, 64>}, {transform_indices = @transform_2, window_bounds = array<i64: 1, 64>}, {transform_indices = @transform_3, window_bounds = array<i64: 128, 64>}]} {
    %c0 = arith.constant 0 : index
    %c0_0 = arith.constant 0 : index
    %0 = vector.load %arg2[%c0, %c0_0] : memref<128x576xbf16, #tpu.memory_space<vmem>>, vector<128x576xbf16>
    %c0_1 = arith.constant 0 : index
    %c0_2 = arith.constant 0 : index
    %1 = vector.load %arg3[%c0_1, %c0_2] : memref<576x64xbf16, #tpu.memory_space<vmem>>, vector<576x64xbf16>
    %cst = arith.constant dense<0.000000e+00> : vector<128x64xf32>
    %2 = tpu.matmul %0, %1, %cst {dimension_numbers = #tpu.dot_dimension_numbers<[1], [0], [0], [1], [0, 0, 1, 1], [], []>} : vector<128x576xbf16>, vector<576x64xbf16>, vector<128x64xf32> -> vector<128x64xf32>
    %c0_3 = arith.constant 0 : index
    %c0_4 = arith.constant 0 : index
    %3 = vector.load %arg4[%c0_3, %c0_4] : memref<1x64xf32, #tpu.memory_space<vmem>>, vector<1x64xf32>
    %4 = vector.broadcast %3 : vector<1x64xf32> to vector<128x64xf32>
    %5 = arith.addf %2, %4 : vector<128x64xf32>
    %cst_5 = arith.constant 0.000000e+00 : f32
    %6 = vector.broadcast %cst_5 : f32 to vector<128x64xf32>
    %7 = arith.maximumf %5, %6 : vector<128x64xf32>
    %8 = arith.truncf %7 : vector<128x64xf32> to vector<128x64xbf16>
    %c0_6 = arith.constant 0 : index
    %c0_7 = arith.constant 0 : index
    %9 = vector.load %arg5[%c0_6, %c0_7] : memref<128x64xbf16, #tpu.memory_space<vmem>>, vector<128x64xbf16>
    tpu.vector_store %arg5[%c0_6, %c0_7], %8 {strides = array<i32>} : memref<128x64xbf16, #tpu.memory_space<vmem>>, vector<128x64xbf16>,
    return
  }
  func.func @transform_0(%arg0: i32, %arg1: i32) -> (i32, i32) {
    %c0_i32 = arith.constant 0 : i32
    %c0_i32_0 = arith.constant 0 : i32
    return %arg0, %c0_i32 : i32, i32
  }
  func.func @transform_1(%arg0: i32, %arg1: i32) -> (i32, i32) {
    %c0_i32 = arith.constant 0 : i32
    %c0_i32_0 = arith.constant 0 : i32
    return %c0_i32, %arg1 : i32, i32
  }
  func.func @transform_2(%arg0: i32, %arg1: i32) -> (i32, i32) {
    %c0_i32 = arith.constant 0 : i32
    %c0_i32_0 = arith.constant 0 : i32
    return %c0_i32, %arg1 : i32, i32
  }
  func.func @transform_3(%arg0: i32, %arg1: i32) -> (i32, i32) {
    %c0_i32 = arith.constant 0 : i32
    return %arg0, %arg1 : i32, i32
  }
}

module attributes {stable_mosaic.version = 11 : i64} {
  func.func @_gemm_kernel_1k(%arg0: i32, %arg1: i32, %arg2: memref<128x64xbf16, #tpu.memory_space<vmem>>, %arg3: memref<64x256xbf16, #tpu.memory_space<vmem>>, %arg4: memref<1x256xf32, #tpu.memory_space<vmem>>, %arg5: memref<128x256xbf16, #tpu.memory_space<vmem>>) attributes {dimension_semantics = [#tpu.dimension_semantics<parallel>, #tpu.dimension_semantics<parallel>], iteration_bounds = array<i64: 1, 1>, scalar_prefetch = 0 : i64, scratch_operands = 0 : i64, tpu.core_type = #tpu.core_type<tc>, window_params = [{transform_indices = @transform_0, window_bounds = array<i64: 128, 64>}, {transform_indices = @transform_1, window_bounds = array<i64: 64, 256>}, {transform_indices = @transform_2, window_bounds = array<i64: 1, 256>}, {transform_indices = @transform_3, window_bounds = array<i64: 128, 256>}]} {
    %c0 = arith.constant 0 : index
    %c0_0 = arith.constant 0 : index
    %0 = vector.load %arg2[%c0, %c0_0] : memref<128x64xbf16, #tpu.memory_space<vmem>>, vector<128x64xbf16>
    %c0_1 = arith.constant 0 : index
    %c0_2 = arith.constant 0 : index
    %1 = vector.load %arg3[%c0_1, %c0_2] : memref<64x256xbf16, #tpu.memory_space<vmem>>, vector<64x256xbf16>
    %cst = arith.constant dense<0.000000e+00> : vector<128x256xf32>
    %2 = tpu.matmul %0, %1, %cst {dimension_numbers = #tpu.dot_dimension_numbers<[1], [0], [0], [1], [0, 0, 1, 1], [], []>} : vector<128x64xbf16>, vector<64x256xbf16>, vector<128x256xf32> -> vector<128x256xf32>
    %c0_3 = arith.constant 0 : index
    %c0_4 = arith.constant 0 : index
    %3 = vector.load %arg4[%c0_3, %c0_4] : memref<1x256xf32, #tpu.memory_space<vmem>>, vector<1x256xf32>
    %4 = vector.broadcast %3 : vector<1x256xf32> to vector<128x256xf32>
    %5 = arith.addf %2, %4 : vector<128x256xf32>
    %6 = arith.truncf %5 : vector<128x256xf32> to vector<128x256xbf16>
    %c0_5 = arith.constant 0 : index
    %c0_6 = arith.constant 0 : index
    %7 = vector.load %arg5[%c0_5, %c0_6] : memref<128x256xbf16, #tpu.memory_space<vmem>>, vector<128x256xbf16>
    tpu.vector_store %arg5[%c0_5, %c0_6], %6 {strides = array<i32>} : memref<128x256xbf16, #tpu.memory_space<vmem>>, vector<128x256xbf16>,
    return
  }
  func.func @transform_0(%arg0: i32, %arg1: i32) -> (i32, i32) {
    %c0_i32 = arith.constant 0 : i32
    %c0_i32_0 = arith.constant 0 : i32
    return %arg0, %c0_i32 : i32, i32
  }
  func.func @transform_1(%arg0: i32, %arg1: i32) -> (i32, i32) {
    %c0_i32 = arith.constant 0 : i32
    %c0_i32_0 = arith.constant 0 : i32
    return %c0_i32, %arg1 : i32, i32
  }
  func.func @transform_2(%arg0: i32, %arg1: i32) -> (i32, i32) {
    %c0_i32 = arith.constant 0 : i32
    %c0_i32_0 = arith.constant 0 : i32
    return %c0_i32, %arg1 : i32, i32
  }
  func.func @transform_3(%arg0: i32, %arg1: i32) -> (i32, i32) {
    %c0_i32 = arith.constant 0 : i32
    return %arg0, %arg1 : i32, i32
  }
}

module attributes {stable_mosaic.version = 11 : i64} {
  func.func @_gemm_kernel_1k(%arg0: i32, %arg1: i32, %arg2: memref<128x64xbf16, #tpu.memory_space<vmem>>, %arg3: memref<64x256xbf16, #tpu.memory_space<vmem>>, %arg4: memref<1x256xf32, #tpu.memory_space<vmem>>, %arg5: memref<128x256xbf16, #tpu.memory_space<vmem>>, %arg6: memref<128x256xbf16, #tpu.memory_space<vmem>>) attributes {dimension_semantics = [#tpu.dimension_semantics<parallel>, #tpu.dimension_semantics<parallel>], iteration_bounds = array<i64: 1, 1>, scalar_prefetch = 0 : i64, scratch_operands = 0 : i64, tpu.core_type = #tpu.core_type<tc>, window_params = [{transform_indices = @transform_0, window_bounds = array<i64: 128, 64>}, {transform_indices = @transform_1, window_bounds = array<i64: 64, 256>}, {transform_indices = @transform_2, window_bounds = array<i64: 1, 256>}, {transform_indices = @transform_3, window_bounds = array<i64: 128, 256>}, {transform_indices = @transform_4, window_bounds = array<i64: 128, 256>}]} {
    %c0 = arith.constant 0 : index
    %c0_0 = arith.constant 0 : index
    %0 = vector.load %arg2[%c0, %c0_0] : memref<128x64xbf16, #tpu.memory_space<vmem>>, vector<128x64xbf16>
    %c0_1 = arith.constant 0 : index
    %c0_2 = arith.constant 0 : index
    %1 = vector.load %arg3[%c0_1, %c0_2] : memref<64x256xbf16, #tpu.memory_space<vmem>>, vector<64x256xbf16>
    %cst = arith.constant dense<0.000000e+00> : vector<128x256xf32>
    %2 = tpu.matmul %0, %1, %cst {dimension_numbers = #tpu.dot_dimension_numbers<[1], [0], [0], [1], [0, 0, 1, 1], [], []>} : vector<128x64xbf16>, vector<64x256xbf16>, vector<128x256xf32> -> vector<128x256xf32>
    %c0_3 = arith.constant 0 : index
    %c0_4 = arith.constant 0 : index
    %3 = vector.load %arg4[%c0_3, %c0_4] : memref<1x256xf32, #tpu.memory_space<vmem>>, vector<1x256xf32>
    %4 = vector.broadcast %3 : vector<1x256xf32> to vector<128x256xf32>
    %5 = arith.addf %2, %4 : vector<128x256xf32>
    %c0_5 = arith.constant 0 : index
    %c0_6 = arith.constant 0 : index
    %6 = vector.load %arg5[%c0_5, %c0_6] : memref<128x256xbf16, #tpu.memory_space<vmem>>, vector<128x256xbf16>
    %7 = arith.extf %6 : vector<128x256xbf16> to vector<128x256xf32>
    %8 = arith.addf %5, %7 : vector<128x256xf32>
    %cst_7 = arith.constant 0.000000e+00 : f32
    %9 = vector.broadcast %cst_7 : f32 to vector<128x256xf32>
    %10 = arith.maximumf %8, %9 : vector<128x256xf32>
    %11 = arith.truncf %10 : vector<128x256xf32> to vector<128x256xbf16>
    %c0_8 = arith.constant 0 : index
    %c0_9 = arith.constant 0 : index
    %12 = vector.load %arg6[%c0_8, %c0_9] : memref<128x256xbf16, #tpu.memory_space<vmem>>, vector<128x256xbf16>
    tpu.vector_store %arg6[%c0_8, %c0_9], %11 {strides = array<i32>} : memref<128x256xbf16, #tpu.memory_space<vmem>>, vector<128x256xbf16>,
    return
  }
  func.func @transform_0(%arg0: i32, %arg1: i32) -> (i32, i32) {
    %c0_i32 = arith.constant 0 : i32
    %c0_i32_0 = arith.constant 0 : i32
    return %arg0, %c0_i32 : i32, i32
  }
  func.func @transform_1(%arg0: i32, %arg1: i32) -> (i32, i32) {
    %c0_i32 = arith.constant 0 : i32
    %c0_i32_0 = arith.constant 0 : i32
    return %c0_i32, %arg1 : i32, i32
  }
  func.func @transform_2(%arg0: i32, %arg1: i32) -> (i32, i32) {
    %c0_i32 = arith.constant 0 : i32
    %c0_i32_0 = arith.constant 0 : i32
    return %c0_i32, %arg1 : i32, i32
  }
  func.func @transform_3(%arg0: i32, %arg1: i32) -> (i32, i32) {
    %c0_i32 = arith.constant 0 : i32
    return %arg0, %arg1 : i32, i32
  }
  func.func @transform_4(%arg0: i32, %arg1: i32) -> (i32, i32) {
    %c0_i32 = arith.constant 0 : i32
    return %arg0, %arg1 : i32, i32
  }
}

module attributes {stable_mosaic.version = 11 : i64} {
  func.func @_gemm_kernel_1k(%arg0: i32, %arg1: i32, %arg2: memref<128x256xbf16, #tpu.memory_space<vmem>>, %arg3: memref<256x64xbf16, #tpu.memory_space<vmem>>, %arg4: memref<1x64xf32, #tpu.memory_space<vmem>>, %arg5: memref<128x64xbf16, #tpu.memory_space<vmem>>) attributes {dimension_semantics = [#tpu.dimension_semantics<parallel>, #tpu.dimension_semantics<parallel>], iteration_bounds = array<i64: 1, 1>, scalar_prefetch = 0 : i64, scratch_operands = 0 : i64, tpu.core_type = #tpu.core_type<tc>, window_params = [{transform_indices = @transform_0, window_bounds = array<i64: 128, 256>}, {transform_indices = @transform_1, window_bounds = array<i64: 256, 64>}, {transform_indices = @transform_2, window_bounds = array<i64: 1, 64>}, {transform_indices = @transform_3, window_bounds = array<i64: 128, 64>}]} {
    %c0 = arith.constant 0 : index
    %c0_0 = arith.constant 0 : index
    %0 = vector.load %arg2[%c0, %c0_0] : memref<128x256xbf16, #tpu.memory_space<vmem>>, vector<128x256xbf16>
    %c0_1 = arith.constant 0 : index
    %c0_2 = arith.constant 0 : index
    %1 = vector.load %arg3[%c0_1, %c0_2] : memref<256x64xbf16, #tpu.memory_space<vmem>>, vector<256x64xbf16>
    %cst = arith.constant dense<0.000000e+00> : vector<128x64xf32>
    %2 = tpu.matmul %0, %1, %cst {dimension_numbers = #tpu.dot_dimension_numbers<[1], [0], [0], [1], [0, 0, 1, 1], [], []>} : vector<128x256xbf16>, vector<256x64xbf16>, vector<128x64xf32> -> vector<128x64xf32>
    %c0_3 = arith.constant 0 : index
    %c0_4 = arith.constant 0 : index
    %3 = vector.load %arg4[%c0_3, %c0_4] : memref<1x64xf32, #tpu.memory_space<vmem>>, vector<1x64xf32>
    %4 = vector.broadcast %3 : vector<1x64xf32> to vector<128x64xf32>
    %5 = arith.addf %2, %4 : vector<128x64xf32>
    %cst_5 = arith.constant 0.000000e+00 : f32
    %6 = vector.broadcast %cst_5 : f32 to vector<128x64xf32>
    %7 = arith.maximumf %5, %6 : vector<128x64xf32>
    %8 = arith.truncf %7 : vector<128x64xf32> to vector<128x64xbf16>
    %c0_6 = arith.constant 0 : index
    %c0_7 = arith.constant 0 : index
    %9 = vector.load %arg5[%c0_6, %c0_7] : memref<128x64xbf16, #tpu.memory_space<vmem>>, vector<128x64xbf16>
    tpu.vector_store %arg5[%c0_6, %c0_7], %8 {strides = array<i32>} : memref<128x64xbf16, #tpu.memory_space<vmem>>, vector<128x64xbf16>,
    return
  }
  func.func @transform_0(%arg0: i32, %arg1: i32) -> (i32, i32) {
    %c0_i32 = arith.constant 0 : i32
    %c0_i32_0 = arith.constant 0 : i32
    return %arg0, %c0_i32 : i32, i32
  }
  func.func @transform_1(%arg0: i32, %arg1: i32) -> (i32, i32) {
    %c0_i32 = arith.constant 0 : i32
    %c0_i32_0 = arith.constant 0 : i32
    return %c0_i32, %arg1 : i32, i32
  }
  func.func @transform_2(%arg0: i32, %arg1: i32) -> (i32, i32) {
    %c0_i32 = arith.constant 0 : i32
    %c0_i32_0 = arith.constant 0 : i32
    return %c0_i32, %arg1 : i32, i32
  }
  func.func @transform_3(%arg0: i32, %arg1: i32) -> (i32, i32) {
    %c0_i32 = arith.constant 0 : i32
    return %arg0, %arg1 : i32, i32
  }
}

module attributes {stable_mosaic.version = 11 : i64} {
  func.func @_gemm_kernel_1k(%arg0: i32, %arg1: i32, %arg2: memref<128x256xbf16, #tpu.memory_space<vmem>>, %arg3: memref<256x128xbf16, #tpu.memory_space<vmem>>, %arg4: memref<1x128xf32, #tpu.memory_space<vmem>>, %arg5: memref<128x128xbf16, #tpu.memory_space<vmem>>) attributes {dimension_semantics = [#tpu.dimension_semantics<parallel>, #tpu.dimension_semantics<parallel>], iteration_bounds = array<i64: 1, 1>, scalar_prefetch = 0 : i64, scratch_operands = 0 : i64, tpu.core_type = #tpu.core_type<tc>, window_params = [{transform_indices = @transform_0, window_bounds = array<i64: 128, 256>}, {transform_indices = @transform_1, window_bounds = array<i64: 256, 128>}, {transform_indices = @transform_2, window_bounds = array<i64: 1, 128>}, {transform_indices = @transform_3, window_bounds = array<i64: 128, 128>}]} {
    %c0 = arith.constant 0 : index
    %c0_0 = arith.constant 0 : index
    %0 = vector.load %arg2[%c0, %c0_0] : memref<128x256xbf16, #tpu.memory_space<vmem>>, vector<128x256xbf16>
    %c0_1 = arith.constant 0 : index
    %c0_2 = arith.constant 0 : index
    %1 = vector.load %arg3[%c0_1, %c0_2] : memref<256x128xbf16, #tpu.memory_space<vmem>>, vector<256x128xbf16>
    %cst = arith.constant dense<0.000000e+00> : vector<128x128xf32>
    %2 = tpu.matmul %0, %1, %cst {dimension_numbers = #tpu.dot_dimension_numbers<[1], [0], [0], [1], [0, 0, 1, 1], [], []>} : vector<128x256xbf16>, vector<256x128xbf16>, vector<128x128xf32> -> vector<128x128xf32>
    %c0_3 = arith.constant 0 : index
    %c0_4 = arith.constant 0 : index
    %3 = vector.load %arg4[%c0_3, %c0_4] : memref<1x128xf32, #tpu.memory_space<vmem>>, vector<1x128xf32>
    %4 = vector.broadcast %3 : vector<1x128xf32> to vector<128x128xf32>
    %5 = arith.addf %2, %4 : vector<128x128xf32>
    %cst_5 = arith.constant 0.000000e+00 : f32
    %6 = vector.broadcast %cst_5 : f32 to vector<128x128xf32>
    %7 = arith.maximumf %5, %6 : vector<128x128xf32>
    %8 = arith.truncf %7 : vector<128x128xf32> to vector<128x128xbf16>
    %c0_6 = arith.constant 0 : index
    %c0_7 = arith.constant 0 : index
    %9 = vector.load %arg5[%c0_6, %c0_7] : memref<128x128xbf16, #tpu.memory_space<vmem>>, vector<128x128xbf16>
    tpu.vector_store %arg5[%c0_6, %c0_7], %8 {strides = array<i32>} : memref<128x128xbf16, #tpu.memory_space<vmem>>, vector<128x128xbf16>,
    return
  }
  func.func @transform_0(%arg0: i32, %arg1: i32) -> (i32, i32) {
    %c0_i32 = arith.constant 0 : i32
    %c0_i32_0 = arith.constant 0 : i32
    return %arg0, %c0_i32 : i32, i32
  }
  func.func @transform_1(%arg0: i32, %arg1: i32) -> (i32, i32) {
    %c0_i32 = arith.constant 0 : i32
    %c0_i32_0 = arith.constant 0 : i32
    return %c0_i32, %arg1 : i32, i32
  }
  func.func @transform_2(%arg0: i32, %arg1: i32) -> (i32, i32) {
    %c0_i32 = arith.constant 0 : i32
    %c0_i32_0 = arith.constant 0 : i32
    return %c0_i32, %arg1 : i32, i32
  }
  func.func @transform_3(%arg0: i32, %arg1: i32) -> (i32, i32) {
    %c0_i32 = arith.constant 0 : i32
    return %arg0, %arg1 : i32, i32
  }
}

module attributes {stable_mosaic.version = 11 : i64} {
  func.func @_gemm_kernel_1k(%arg0: i32, %arg1: i32, %arg2: memref<32x1152xbf16, #tpu.memory_space<vmem>>, %arg3: memref<1152x128xbf16, #tpu.memory_space<vmem>>, %arg4: memref<1x128xf32, #tpu.memory_space<vmem>>, %arg5: memref<32x128xbf16, #tpu.memory_space<vmem>>) attributes {dimension_semantics = [#tpu.dimension_semantics<parallel>, #tpu.dimension_semantics<parallel>], iteration_bounds = array<i64: 1, 1>, scalar_prefetch = 0 : i64, scratch_operands = 0 : i64, tpu.core_type = #tpu.core_type<tc>, window_params = [{transform_indices = @transform_0, window_bounds = array<i64: 32, 1152>}, {transform_indices = @transform_1, window_bounds = array<i64: 1152, 128>}, {transform_indices = @transform_2, window_bounds = array<i64: 1, 128>}, {transform_indices = @transform_3, window_bounds = array<i64: 32, 128>}]} {
    %c0 = arith.constant 0 : index
    %c0_0 = arith.constant 0 : index
    %0 = vector.load %arg2[%c0, %c0_0] : memref<32x1152xbf16, #tpu.memory_space<vmem>>, vector<32x1152xbf16>
    %c0_1 = arith.constant 0 : index
    %c0_2 = arith.constant 0 : index
    %1 = vector.load %arg3[%c0_1, %c0_2] : memref<1152x128xbf16, #tpu.memory_space<vmem>>, vector<1152x128xbf16>
    %cst = arith.constant dense<0.000000e+00> : vector<32x128xf32>
    %2 = tpu.matmul %0, %1, %cst {dimension_numbers = #tpu.dot_dimension_numbers<[1], [0], [0], [1], [0, 0, 1, 1], [], []>} : vector<32x1152xbf16>, vector<1152x128xbf16>, vector<32x128xf32> -> vector<32x128xf32>
    %c0_3 = arith.constant 0 : index
    %c0_4 = arith.constant 0 : index
    %3 = vector.load %arg4[%c0_3, %c0_4] : memref<1x128xf32, #tpu.memory_space<vmem>>, vector<1x128xf32>
    %4 = vector.broadcast %3 : vector<1x128xf32> to vector<32x128xf32>
    %5 = arith.addf %2, %4 : vector<32x128xf32>
    %cst_5 = arith.constant 0.000000e+00 : f32
    %6 = vector.broadcast %cst_5 : f32 to vector<32x128xf32>
    %7 = arith.maximumf %5, %6 : vector<32x128xf32>
    %8 = arith.truncf %7 : vector<32x128xf32> to vector<32x128xbf16>
    %c0_6 = arith.constant 0 : index
    %c0_7 = arith.constant 0 : index
    %9 = vector.load %arg5[%c0_6, %c0_7] : memref<32x128xbf16, #tpu.memory_space<vmem>>, vector<32x128xbf16>
    tpu.vector_store %arg5[%c0_6, %c0_7], %8 {strides = array<i32>} : memref<32x128xbf16, #tpu.memory_space<vmem>>, vector<32x128xbf16>,
    return
  }
  func.func @transform_0(%arg0: i32, %arg1: i32) -> (i32, i32) {
    %c0_i32 = arith.constant 0 : i32
    %c0_i32_0 = arith.constant 0 : i32
    return %arg0, %c0_i32 : i32, i32
  }
  func.func @transform_1(%arg0: i32, %arg1: i32) -> (i32, i32) {
    %c0_i32 = arith.constant 0 : i32
    %c0_i32_0 = arith.constant 0 : i32
    return %c0_i32, %arg1 : i32, i32
  }
  func.func @transform_2(%arg0: i32, %arg1: i32) -> (i32, i32) {
    %c0_i32 = arith.constant 0 : i32
    %c0_i32_0 = arith.constant 0 : i32
    return %c0_i32, %arg1 : i32, i32
  }
  func.func @transform_3(%arg0: i32, %arg1: i32) -> (i32, i32) {
    %c0_i32 = arith.constant 0 : i32
    return %arg0, %arg1 : i32, i32
  }
}

module attributes {stable_mosaic.version = 11 : i64} {
  func.func @_gemm_kernel_1k(%arg0: i32, %arg1: i32, %arg2: memref<32x128xbf16, #tpu.memory_space<vmem>>, %arg3: memref<128x256xbf16, #tpu.memory_space<vmem>>, %arg4: memref<1x256xf32, #tpu.memory_space<vmem>>, %arg5: memref<32x256xbf16, #tpu.memory_space<vmem>>, %arg6: memref<32x256xbf16, #tpu.memory_space<vmem>>) attributes {dimension_semantics = [#tpu.dimension_semantics<parallel>, #tpu.dimension_semantics<parallel>], iteration_bounds = array<i64: 1, 2>, scalar_prefetch = 0 : i64, scratch_operands = 0 : i64, tpu.core_type = #tpu.core_type<tc>, window_params = [{transform_indices = @transform_0, window_bounds = array<i64: 32, 128>}, {transform_indices = @transform_1, window_bounds = array<i64: 128, 256>}, {transform_indices = @transform_2, window_bounds = array<i64: 1, 256>}, {transform_indices = @transform_3, window_bounds = array<i64: 32, 256>}, {transform_indices = @transform_4, window_bounds = array<i64: 32, 256>}]} {
    %c0 = arith.constant 0 : index
    %c0_0 = arith.constant 0 : index
    %0 = vector.load %arg2[%c0, %c0_0] : memref<32x128xbf16, #tpu.memory_space<vmem>>, vector<32x128xbf16>
    %c0_1 = arith.constant 0 : index
    %c0_2 = arith.constant 0 : index
    %1 = vector.load %arg3[%c0_1, %c0_2] : memref<128x256xbf16, #tpu.memory_space<vmem>>, vector<128x256xbf16>
    %cst = arith.constant dense<0.000000e+00> : vector<32x256xf32>
    %2 = tpu.matmul %0, %1, %cst {dimension_numbers = #tpu.dot_dimension_numbers<[1], [0], [0], [1], [0, 0, 1, 1], [], []>} : vector<32x128xbf16>, vector<128x256xbf16>, vector<32x256xf32> -> vector<32x256xf32>
    %c0_3 = arith.constant 0 : index
    %c0_4 = arith.constant 0 : index
    %3 = vector.load %arg4[%c0_3, %c0_4] : memref<1x256xf32, #tpu.memory_space<vmem>>, vector<1x256xf32>
    %4 = vector.broadcast %3 : vector<1x256xf32> to vector<32x256xf32>
    %5 = arith.addf %2, %4 : vector<32x256xf32>
    %c0_5 = arith.constant 0 : index
    %c0_6 = arith.constant 0 : index
    %6 = vector.load %arg5[%c0_5, %c0_6] : memref<32x256xbf16, #tpu.memory_space<vmem>>, vector<32x256xbf16>
    %7 = arith.extf %6 : vector<32x256xbf16> to vector<32x256xf32>
    %8 = arith.addf %5, %7 : vector<32x256xf32>
    %cst_7 = arith.constant 0.000000e+00 : f32
    %9 = vector.broadcast %cst_7 : f32 to vector<32x256xf32>
    %10 = arith.maximumf %8, %9 : vector<32x256xf32>
    %11 = arith.truncf %10 : vector<32x256xf32> to vector<32x256xbf16>
    %c0_8 = arith.constant 0 : index
    %c0_9 = arith.constant 0 : index
    %12 = vector.load %arg6[%c0_8, %c0_9] : memref<32x256xbf16, #tpu.memory_space<vmem>>, vector<32x256xbf16>
    tpu.vector_store %arg6[%c0_8, %c0_9], %11 {strides = array<i32>} : memref<32x256xbf16, #tpu.memory_space<vmem>>, vector<32x256xbf16>,
    return
  }
  func.func @transform_0(%arg0: i32, %arg1: i32) -> (i32, i32) {
    %c0_i32 = arith.constant 0 : i32
    %c0_i32_0 = arith.constant 0 : i32
    return %arg0, %c0_i32 : i32, i32
  }
  func.func @transform_1(%arg0: i32, %arg1: i32) -> (i32, i32) {
    %c0_i32 = arith.constant 0 : i32
    %c0_i32_0 = arith.constant 0 : i32
    return %c0_i32, %arg1 : i32, i32
  }
  func.func @transform_2(%arg0: i32, %arg1: i32) -> (i32, i32) {
    %c0_i32 = arith.constant 0 : i32
    %c0_i32_0 = arith.constant 0 : i32
    return %c0_i32, %arg1 : i32, i32
  }
  func.func @transform_3(%arg0: i32, %arg1: i32) -> (i32, i32) {
    %c0_i32 = arith.constant 0 : i32
    return %arg0, %arg1 : i32, i32
  }
  func.func @transform_4(%arg0: i32, %arg1: i32) -> (i32, i32) {
    %c0_i32 = arith.constant 0 : i32
    return %arg0, %arg1 : i32, i32
  }
}

module attributes {stable_mosaic.version = 11 : i64} {
  func.func @_gemm_kernel_1k(%arg0: i32, %arg1: i32, %arg2: memref<32x256xbf16, #tpu.memory_space<vmem>>, %arg3: memref<256x256xbf16, #tpu.memory_space<vmem>>, %arg4: memref<1x256xf32, #tpu.memory_space<vmem>>, %arg5: memref<32x256xbf16, #tpu.memory_space<vmem>>) attributes {dimension_semantics = [#tpu.dimension_semantics<parallel>, #tpu.dimension_semantics<parallel>], iteration_bounds = array<i64: 1, 2>, scalar_prefetch = 0 : i64, scratch_operands = 0 : i64, tpu.core_type = #tpu.core_type<tc>, window_params = [{transform_indices = @transform_0, window_bounds = array<i64: 32, 256>}, {transform_indices = @transform_1, window_bounds = array<i64: 256, 256>}, {transform_indices = @transform_2, window_bounds = array<i64: 1, 256>}, {transform_indices = @transform_3, window_bounds = array<i64: 32, 256>}]} {
    %c0 = arith.constant 0 : index
    %c0_0 = arith.constant 0 : index
    %0 = vector.load %arg2[%c0, %c0_0] : memref<32x256xbf16, #tpu.memory_space<vmem>>, vector<32x256xbf16>
    %c0_1 = arith.constant 0 : index
    %c0_2 = arith.constant 0 : index
    %1 = vector.load %arg3[%c0_1, %c0_2] : memref<256x256xbf16, #tpu.memory_space<vmem>>, vector<256x256xbf16>
    %cst = arith.constant dense<0.000000e+00> : vector<32x256xf32>
    %2 = tpu.matmul %0, %1, %cst {dimension_numbers = #tpu.dot_dimension_numbers<[1], [0], [0], [1], [0, 0, 1, 1], [], []>} : vector<32x256xbf16>, vector<256x256xbf16>, vector<32x256xf32> -> vector<32x256xf32>
    %c0_3 = arith.constant 0 : index
    %c0_4 = arith.constant 0 : index
    %3 = vector.load %arg4[%c0_3, %c0_4] : memref<1x256xf32, #tpu.memory_space<vmem>>, vector<1x256xf32>
    %4 = vector.broadcast %3 : vector<1x256xf32> to vector<32x256xf32>
    %5 = arith.addf %2, %4 : vector<32x256xf32>
    %6 = arith.truncf %5 : vector<32x256xf32> to vector<32x256xbf16>
    %c0_5 = arith.constant 0 : index
    %c0_6 = arith.constant 0 : index
    %7 = vector.load %arg5[%c0_5, %c0_6] : memref<32x256xbf16, #tpu.memory_space<vmem>>, vector<32x256xbf16>
    tpu.vector_store %arg5[%c0_5, %c0_6], %6 {strides = array<i32>} : memref<32x256xbf16, #tpu.memory_space<vmem>>, vector<32x256xbf16>,
    return
  }
  func.func @transform_0(%arg0: i32, %arg1: i32) -> (i32, i32) {
    %c0_i32 = arith.constant 0 : i32
    %c0_i32_0 = arith.constant 0 : i32
    return %arg0, %c0_i32 : i32, i32
  }
  func.func @transform_1(%arg0: i32, %arg1: i32) -> (i32, i32) {
    %c0_i32 = arith.constant 0 : i32
    %c0_i32_0 = arith.constant 0 : i32
    return %c0_i32, %arg1 : i32, i32
  }
  func.func @transform_2(%arg0: i32, %arg1: i32) -> (i32, i32) {
    %c0_i32 = arith.constant 0 : i32
    %c0_i32_0 = arith.constant 0 : i32
    return %c0_i32, %arg1 : i32, i32
  }
  func.func @transform_3(%arg0: i32, %arg1: i32) -> (i32, i32) {
    %c0_i32 = arith.constant 0 : i32
    return %arg0, %arg1 : i32, i32
  }
}

module attributes {stable_mosaic.version = 11 : i64} {
  func.func @_gemm_kernel_1k(%arg0: i32, %arg1: i32, %arg2: memref<32x512xbf16, #tpu.memory_space<vmem>>, %arg3: memref<512x128xbf16, #tpu.memory_space<vmem>>, %arg4: memref<1x128xf32, #tpu.memory_space<vmem>>, %arg5: memref<32x128xbf16, #tpu.memory_space<vmem>>) attributes {dimension_semantics = [#tpu.dimension_semantics<parallel>, #tpu.dimension_semantics<parallel>], iteration_bounds = array<i64: 1, 1>, scalar_prefetch = 0 : i64, scratch_operands = 0 : i64, tpu.core_type = #tpu.core_type<tc>, window_params = [{transform_indices = @transform_0, window_bounds = array<i64: 32, 512>}, {transform_indices = @transform_1, window_bounds = array<i64: 512, 128>}, {transform_indices = @transform_2, window_bounds = array<i64: 1, 128>}, {transform_indices = @transform_3, window_bounds = array<i64: 32, 128>}]} {
    %c0 = arith.constant 0 : index
    %c0_0 = arith.constant 0 : index
    %0 = vector.load %arg2[%c0, %c0_0] : memref<32x512xbf16, #tpu.memory_space<vmem>>, vector<32x512xbf16>
    %c0_1 = arith.constant 0 : index
    %c0_2 = arith.constant 0 : index
    %1 = vector.load %arg3[%c0_1, %c0_2] : memref<512x128xbf16, #tpu.memory_space<vmem>>, vector<512x128xbf16>
    %cst = arith.constant dense<0.000000e+00> : vector<32x128xf32>
    %2 = tpu.matmul %0, %1, %cst {dimension_numbers = #tpu.dot_dimension_numbers<[1], [0], [0], [1], [0, 0, 1, 1], [], []>} : vector<32x512xbf16>, vector<512x128xbf16>, vector<32x128xf32> -> vector<32x128xf32>
    %c0_3 = arith.constant 0 : index
    %c0_4 = arith.constant 0 : index
    %3 = vector.load %arg4[%c0_3, %c0_4] : memref<1x128xf32, #tpu.memory_space<vmem>>, vector<1x128xf32>
    %4 = vector.broadcast %3 : vector<1x128xf32> to vector<32x128xf32>
    %5 = arith.addf %2, %4 : vector<32x128xf32>
    %cst_5 = arith.constant 0.000000e+00 : f32
    %6 = vector.broadcast %cst_5 : f32 to vector<32x128xf32>
    %7 = arith.maximumf %5, %6 : vector<32x128xf32>
    %8 = arith.truncf %7 : vector<32x128xf32> to vector<32x128xbf16>
    %c0_6 = arith.constant 0 : index
    %c0_7 = arith.constant 0 : index
    %9 = vector.load %arg5[%c0_6, %c0_7] : memref<32x128xbf16, #tpu.memory_space<vmem>>, vector<32x128xbf16>
    tpu.vector_store %arg5[%c0_6, %c0_7], %8 {strides = array<i32>} : memref<32x128xbf16, #tpu.memory_space<vmem>>, vector<32x128xbf16>,
    return
  }
  func.func @transform_0(%arg0: i32, %arg1: i32) -> (i32, i32) {
    %c0_i32 = arith.constant 0 : i32
    %c0_i32_0 = arith.constant 0 : i32
    return %arg0, %c0_i32 : i32, i32
  }
  func.func @transform_1(%arg0: i32, %arg1: i32) -> (i32, i32) {
    %c0_i32 = arith.constant 0 : i32
    %c0_i32_0 = arith.constant 0 : i32
    return %c0_i32, %arg1 : i32, i32
  }
  func.func @transform_2(%arg0: i32, %arg1: i32) -> (i32, i32) {
    %c0_i32 = arith.constant 0 : i32
    %c0_i32_0 = arith.constant 0 : i32
    return %c0_i32, %arg1 : i32, i32
  }
  func.func @transform_3(%arg0: i32, %arg1: i32) -> (i32, i32) {
    %c0_i32 = arith.constant 0 : i32
    return %arg0, %arg1 : i32, i32
  }
}

</mosaic_0001>

<bundles_post_ra>
// kernel: opt_resnet_forward.25
= control target key start
LH: loop header
LB: loop body
LE: loop exit
PB: predicated region body
PF: predicated region fallthrough
CT: control target
= control target key end

     0   :  { %s1288_s12 = smov 0   ;;  %s1290_s13 = smov 0   ;;  %s1508_s0 = inlined_call_operand.vmem [shape: bf16[512,147], index: 0, kind: input, shape index: {}]   ;;  %s1509_s1 = inlined_call_operand.vmem [shape: bf16[147,64], index: 1, kind: input, shape index: {}]   ;;  %s1510_s2 = inlined_call_operand.vmem [shape: f32[1,64], index: 2, kind: input, shape index: {}]   ;;  %s1511_s3 = inlined_call_operand.vmem [shape: bf16[512,64], index: 3, kind: output, shape index: {}]  }
   0x1   :  { %s1292_s14 = smov 0  }
   0x2 LB: > { %s25_s15 = sadd.s32 1, %s1260_s13  ;;  %p1006_p0 = scmp.ge.s32.totalorder %s1264_s14, 1  ;;  %s1264_s14 = sphi %s1292_s14, %s13_s14   ;;  %s1260_s13 = sphi %s1290_s13, %s1513_s13   ;;  %s1256_s12 = sphi %s1288_s12, %s1512_s12  }
   0x3   : > { %p27_p1 = scmp.ge.s32.totalorder %s25_s15, 2  ;;  %p170_p2 = scmp.lt.s32.totalorder %s1264_s14, 3 }
   0x5   : > { %s1515_s15 = smov (%p27_p1, %s25_s15), 0  ;;  %p171_p3 = pnand %p1006_p0, %p170_p2 }
   0x6   : > { %s1007_s22 = sshll.u32 (!%p171_p3), %s1256_s12, 5 }
   0x7   : > { %174 = sbr.rel (%p171_p3) target bundleno = 313 (0x139), region = 32  ;;  %p206_p4 = scmp.lt.s32.totalorder (!%p171_p3), %s1007_s22, 63 }
   0xc   : > { %v1184_v0 = vld [vmem:[%s1509_s1 + $0x38] sm:$0xff]   ;;  %v1266_v1 = vmov 0   ;;  %v1185_v2 = vld [vmem:[%s1509_s1 + $0x30] sm:$0xff]   ;;  %v1186_v3 = vld [vmem:[%s1509_s1 + $0x28] sm:$0xff]   ;;  %s1517_s22 = smov (!%p206_p4, %s1007_s22), 63  ;;  %vm488_vm0 = vcmask 154624  }
   0xd   : > { %544 = vmatprep.subr.bf16.mxu0 %v1266_v1  ;;  %1138 = vmatprep.subr.bf16.mxu1 %v1266_v1  ;;  %v1187_v4 = vld [vmem:[%s1509_s1 + $0x20] sm:$0xff]   ;;  %s1105_s25 = sshll.u32 %s1517_s22, 3  ;;  %v1188_v5 = vld [vmem:[%s1509_s1 + $0x18] sm:$0xff]   ;;  %v1189_v8 = vld [vmem:[%s1509_s1 + $0x10] sm:$0xff]   ;;  %vm537_vm1 = vcmask 1040384   ;;  %vm538_vm2 = vcmask 1041408  }
   0xe   : > { %545 = vmatpush1.bf16.msra.mxu0 %v1184_v0  ;;  %1148 = vmatpush1.bf16.msra.mxu1 %v1184_v0  ;;  %s1324_s28 = scalar_lea.vmem %s1508_s0, %s1105_s25  ;;  %v1190_v9 = vld [vmem:[%s1509_s1 + $0x8] sm:$0xff]   ;;  %v1267_v10 = vmov 65535   ;;  %v1191_v12 = vld [vmem:[%s1509_s1] sm:$0xff]   ;;  %s1011_s19 = sshll.u32 %s1517_s22, 2  ;;  %vm865_vm3 = vcmask 519168  }
   0xf   : > { %546 = vmatprep.subr.bf16.mxu0 %v1266_v1  ;;  %1139 = vmatprep.subr.bf16.mxu1 %v1266_v1  ;;  %v1196_v6 = vld [vmem:[%s1324_s28 + $0x4] ss:$8 sps:$4 sm:$0xff]   ;;  %v539_v11 = vsel %vm537_vm1, 4294967295, %v1267_v10  ;;  %v1192_v13 = vld [vmem:[%s1509_s1 + $0x48] ss:$0 sps:$4 sm:$0x33]   ;;  %s1403_s23 = scalar_lea.vmem %s1511_s3, %s1011_s19 }
  0x10   : > { %v1199_v7 = vld [vmem:[%s1324_s28 + $0x84] ss:$8 sps:$4 sm:$0xff]   ;;  %1055 = vmatprep.mubr.msk.bf16.mxu0 %vm488_vm0, %v1196_v6  ;;  %v540_v14 = vsel %vm538_vm2, %v539_v11, 0  ;;  %v1194_v17 = vld [vmem:[%s1324_s28] ss:$8 sps:$4 sm:$0xff]  }
  0x11   : > { %1063 = vmatprep.mubr.msk.bf16.mxu1 %vm488_vm0, %v1199_v7  ;;  %v542_v15 = vand.u32 %v1192_v13, %v540_v14  ;;  %v1193_v16 = vld [vmem:[%s1509_s1 + $0x40] sm:$0xff]   ;;  %v1200_v19 = vld [vmem:[%s1324_s28 + $0x14] ss:$8 sps:$4 sm:$0xff]   ;;  %v1204_v21 = vld [vmem:[%s1324_s28 + $0x10] ss:$8 sps:$4 sm:$0xff]  }
  0x12   : > { %547 = vmatpush1.bf16.msra.mxu0 %v1185_v2  ;;  %1149 = vmatpush1.bf16.msra.mxu1 %v1185_v2  ;;  %v1197_v18 = vld [vmem:[%s1324_s28 + $0x80] ss:$8 sps:$4 sm:$0xff]   ;;  %v1202_v20 = vld [vmem:[%s1324_s28 + $0x94] ss:$8 sps:$4 sm:$0xff]   ;;  %v1205_v22 = vld [vmem:[%s1324_s28 + $0x90] ss:$8 sps:$4 sm:$0xff]  }
  0x13   : > { %548 = vmatprep.subr.bf16.mxu0 %v1266_v1  ;;  %1140 = vmatprep.subr.bf16.mxu1 %v1266_v1  ;;  %v1206_v23 = vld [vmem:[%s1324_s28 + $0x24] ss:$8 sps:$4 sm:$0xff]   ;;  %v1210_v25 = vld [vmem:[%s1324_s28 + $0x20] ss:$8 sps:$4 sm:$0xff]   ;;  %v1212_v27 = vld [vmem:[%s1324_s28 + $0x34] ss:$8 sps:$4 sm:$0xff]  }
  0x14   : > { %v1208_v24 = vld [vmem:[%s1324_s28 + $0xa4] ss:$8 sps:$4 sm:$0xff]   ;;  %v1211_v26 = vld [vmem:[%s1324_s28 + $0xa0] ss:$8 sps:$4 sm:$0xff]   ;;  %v1214_v28 = vld [vmem:[%s1324_s28 + $0xb4] ss:$8 sps:$4 sm:$0xff]  }
  0x15   : > { %v1216_v29 = vld [vmem:[%s1324_s28 + $0x30] ss:$8 sps:$4 sm:$0xff]   ;;  %v1218_v31 = vld [vmem:[%s1324_s28 + $0x44] ss:$8 sps:$4 sm:$0xff]   ;;  %v1222_v33 = vld [vmem:[%s1324_s28 + $0x40] ss:$8 sps:$4 sm:$0xff]  }
  0x16   : > { %549 = vmatpush1.bf16.msra.mxu0 %v1186_v3  ;;  %1150 = vmatpush1.bf16.msra.mxu1 %v1186_v3  ;;  %v1217_v30 = vld [vmem:[%s1324_s28 + $0xb0] ss:$8 sps:$4 sm:$0xff]   ;;  %v1220_v32 = vld [vmem:[%s1324_s28 + $0xc4] ss:$8 sps:$4 sm:$0xff]   ;;  %v1223_v34 = vld [vmem:[%s1324_s28 + $0xc0] ss:$8 sps:$4 sm:$0xff]  }
  0x17   : > { %550 = vmatprep.subr.bf16.mxu0 %v1266_v1  ;;  %1141 = vmatprep.subr.bf16.mxu1 %v1266_v1  ;;  %v1224_v35 = vld [vmem:[%s1324_s28 + $0x54] ss:$8 sps:$4 sm:$0xff]   ;;  %v1228_v37 = vld [vmem:[%s1324_s28 + $0x50] ss:$8 sps:$4 sm:$0xff]   ;;  %v1230_v39 = vld [vmem:[%s1324_s28 + $0x64] ss:$8 sps:$4 sm:$0xff]  }
  0x18   : > { %v1226_v36 = vld [vmem:[%s1324_s28 + $0xd4] ss:$8 sps:$4 sm:$0xff]   ;;  %v1229_v38 = vld [vmem:[%s1324_s28 + $0xd0] ss:$8 sps:$4 sm:$0xff]   ;;  %v1232_v40 = vld [vmem:[%s1324_s28 + $0xe4] ss:$8 sps:$4 sm:$0xff]  }
  0x19   : > { %v1234_v41 = vld [vmem:[%s1324_s28 + $0x60] ss:$8 sps:$4 sm:$0xff]   ;;  %v1236_v43 = vld [vmem:[%s1324_s28 + $0x74] ss:$8 sps:$4 sm:$0xff]   ;;  %v1240_v45 = vld [vmem:[%s1324_s28 + $0x70] ss:$8 sps:$4 sm:$0xff]  }
  0x1a   : > { %551 = vmatpush1.bf16.msra.mxu0 %v1187_v4  ;;  %1151 = vmatpush1.bf16.msra.mxu1 %v1187_v4  ;;  %v1235_v42 = vld [vmem:[%s1324_s28 + $0xe0] ss:$8 sps:$4 sm:$0xff]   ;;  %v1238_v44 = vld [vmem:[%s1324_s28 + $0xf4] ss:$8 sps:$4 sm:$0xff]   ;;  %v1241_v46 = vld [vmem:[%s1324_s28 + $0xf0] ss:$8 sps:$4 sm:$0xff]  }
  0x1b   : > { %552 = vmatprep.subr.bf16.mxu0 %v1266_v1  ;;  %1142 = vmatprep.subr.bf16.mxu1 %v1266_v1  ;;  %v1395_v47 = vld [vmem:[%s1510_s2] ss:$0 sm:$0xff] }
  0x1e   : > { %553 = vmatpush1.bf16.msra.mxu0 %v1188_v5  ;;  %1152 = vmatpush1.bf16.msra.mxu1 %v1188_v5 }
  0x1f   : > { %554 = vmatprep.subr.bf16.mxu0 %v1266_v1  ;;  %1143 = vmatprep.subr.bf16.mxu1 %v1266_v1 }
  0x22   : > { %555 = vmatpush1.bf16.msra.mxu0 %v1189_v8  ;;  %1153 = vmatpush1.bf16.msra.mxu1 %v1189_v8 }
  0x23   : > { %556 = vmatprep.subr.bf16.mxu0 %v1266_v1  ;;  %1144 = vmatprep.subr.bf16.mxu1 %v1266_v1 }
  0x26   : > { %557 = vmatpush1.bf16.msra.mxu0 %v1190_v9  ;;  %1154 = vmatpush1.bf16.msra.mxu1 %v1190_v9 }
  0x27   : > { %558 = vmatprep.subr.bf16.mxu0 %v1266_v1  ;;  %1145 = vmatprep.subr.bf16.mxu1 %v1266_v1 }
  0x2a   : > { %559 = vmatpush1.bf16.msra.mxu0 %v1191_v12  ;;  %1155 = vmatpush1.bf16.msra.mxu1 %v1191_v12 }
  0x2b   : > { %572 = vmatprep.subr.bf16.mxu0 %v1266_v1  ;;  %1146 = vmatprep.subr.bf16.mxu1 %v1266_v1 }
  0x2e   : > { %573 = vmatpush2.bf16.msra.mxu0 %v542_v15  ;;  %1156 = vmatpush2.bf16.msra.mxu1 %v542_v15 }
  0x2f   : > { %574 = vmatprep.subr.bf16.mxu0 %v1266_v1  ;;  %1147 = vmatprep.subr.bf16.mxu1 %v1266_v1 }
  0x32   : > { %575 = vmatpush2.bf16.msra.mxu0 %v1193_v16  ;;  %1157 = vmatpush2.bf16.msra.mxu1 %v1193_v16 }
  0x35   : > { %577 = vmatmul.mubr.bf16.vlgmr.msra.gmra.mxu0 %v1194_v17  ;;  %641 = vmatmul.mubr.bf16.vlgmr.msra.gmra.mxu1 %v1197_v18 }
  0x36   : > { %1056 = vmatprep.mubr.msk.bf16.mxu0 %vm488_vm0, %v1200_v19  ;;  %1064 = vmatprep.mubr.msk.bf16.mxu1 %vm488_vm0, %v1202_v20 }
  0x3d   : > { %585 = vmatmul.mubr.bf16.gmra.mxu0 %v1204_v21  ;;  %649 = vmatmul.mubr.bf16.gmra.mxu1 %v1205_v22 }
  0x3e   : > { %1057 = vmatprep.mubr.msk.bf16.mxu0 %vm488_vm0, %v1206_v23  ;;  %1065 = vmatprep.mubr.msk.bf16.mxu1 %vm488_vm0, %v1208_v24 }
  0x45   : > { %593 = vmatmul.mubr.bf16.gmra.mxu0 %v1210_v25  ;;  %657 = vmatmul.mubr.bf16.gmra.mxu1 %v1211_v26 }
  0x46   : > { %1058 = vmatprep.mubr.msk.bf16.mxu0 %vm488_vm0, %v1212_v27  ;;  %1066 = vmatprep.mubr.msk.bf16.mxu1 %vm488_vm0, %v1214_v28 }
  0x4d   : > { %601 = vmatmul.mubr.bf16.gmra.mxu0 %v1216_v29  ;;  %665 = vmatmul.mubr.bf16.gmra.mxu1 %v1217_v30 }
  0x4e   : > { %1059 = vmatprep.mubr.msk.bf16.mxu0 %vm488_vm0, %v1218_v31  ;;  %1067 = vmatprep.mubr.msk.bf16.mxu1 %vm488_vm0, %v1220_v32 }
  0x55   : > { %609 = vmatmul.mubr.bf16.gmra.mxu0 %v1222_v33  ;;  %673 = vmatmul.mubr.bf16.gmra.mxu1 %v1223_v34 }
  0x56   : > { %1060 = vmatprep.mubr.msk.bf16.mxu0 %vm488_vm0, %v1224_v35  ;;  %1068 = vmatprep.mubr.msk.bf16.mxu1 %vm488_vm0, %v1226_v36 }
  0x5d   : > { %617 = vmatmul.mubr.bf16.gmra.mxu0 %v1228_v37  ;;  %681 = vmatmul.mubr.bf16.gmra.mxu1 %v1229_v38 }
  0x5e   : > { %1061 = vmatprep.mubr.msk.bf16.mxu0 %vm488_vm0, %v1230_v39  ;;  %1069 = vmatprep.mubr.msk.bf16.mxu1 %vm488_vm0, %v1232_v40 }
  0x65   : > { %625 = vmatmul.mubr.bf16.gmra.mxu0 %v1234_v41  ;;  %689 = vmatmul.mubr.bf16.gmra.mxu1 %v1235_v42 }
  0x66   : > { %1062 = vmatprep.mubr.msk.bf16.mxu0 %vm488_vm0, %v1236_v43  ;;  %1070 = vmatprep.mubr.msk.bf16.mxu1 %vm488_vm0, %v1238_v44 }
  0x6d   : > { %633 = vmatmul.mubr.bf16.gmra.mxu0 %v1240_v45  ;;  %697 = vmatmul.mubr.bf16.gmra.mxu1 %v1241_v46 }
  0xf5   : > { %v578_v48 = vpop.f32.mrf.mxu0  ;;  %v642_v49 = vpop.f32.mrf.mxu1 }
  0xf6   : > { %v579_v50 = vadd.f32 %v1395_v47, %v578_v48  ;;  %v643_v51 = vadd.f32 %v1395_v47, %v642_v49 }
  0xf7   : > { %v580_v52 = vpop.f32.mrf.mxu0  ;;  %v644_v53 = vpop.f32.mrf.mxu1 }
  0xf8   : > { %v705_v54 = vmax.f32 %v579_v50, 0.0  ;;  %v721_v55 = vmax.f32 %v643_v51, 0.0 }
  0xf9   : > { %v581_v56 = vpop.f32.mrf.mxu0  ;;  %v645_v57 = vpop.f32.mrf.mxu1 }
  0xfa   : > { %v1106_v58 = vpack.c.bf16 %v705_v54, %v705_v54  ;;  %v1122_v59 = vpack.c.bf16 %v721_v55, %v721_v55  ;;  %v582_v60 = vadd.f32 %v1395_v47, %v581_v56  ;;  %v646_v61 = vadd.f32 %v1395_v47, %v645_v57 }
  0xfb   : > { %v583_v62 = vpop.f32.mrf.mxu0  ;;  %v647_v63 = vpop.f32.mrf.mxu1 }
  0xfc   : > { %866 = vst.msk [vmem:[%s1403_s23] sm:$0xf] %vm865_vm3, %v1106_v58  ;;  %882 = vst.msk [vmem:[%s1403_s23 + $0x40] sm:$0xf] %vm865_vm3, %v1122_v59  ;;  %v706_v0 = vmax.f32 %v582_v60, 0.0  ;;  %v722_v1 = vmax.f32 %v646_v61, 0.0 }
  0xfd   : > { %v586_v2 = vpop.f32.mrf.mxu0  ;;  %v650_v3 = vpop.f32.mrf.mxu1 }
  0xfe   : > { %v1107_v4 = vpack.c.bf16 %v706_v0, %v706_v0  ;;  %v1123_v5 = vpack.c.bf16 %v722_v1, %v722_v1  ;;  %v587_v6 = vadd.f32 %v1395_v47, %v586_v2  ;;  %v651_v7 = vadd.f32 %v1395_v47, %v650_v3 }
  0xff   : > { %v588_v8 = vpop.f32.mrf.mxu0  ;;  %v652_v9 = vpop.f32.mrf.mxu1 }
 0x100   : > { %867 = vst.msk [vmem:[%s1403_s23 + $0x4] sm:$0xf] %vm865_vm3, %v1107_v4  ;;  %883 = vst.msk [vmem:[%s1403_s23 + $0x44] sm:$0xf] %vm865_vm3, %v1123_v5  ;;  %v707_v10 = vmax.f32 %v587_v6, 0.0  ;;  %v723_v11 = vmax.f32 %v651_v7, 0.0 }
 0x101   : > { %v589_v12 = vpop.f32.mrf.mxu0  ;;  %v653_v13 = vpop.f32.mrf.mxu1 }
 0x102   : > { %v1108_v14 = vpack.c.bf16 %v707_v10, %v707_v10  ;;  %v1124_v15 = vpack.c.bf16 %v723_v11, %v723_v11  ;;  %v590_v16 = vadd.f32 %v1395_v47, %v589_v12  ;;  %v654_v17 = vadd.f32 %v1395_v47, %v653_v13 }
 0x103   : > { %v591_v18 = vpop.f32.mrf.mxu0  ;;  %v655_v19 = vpop.f32.mrf.mxu1 }
 0x104   : > { %868 = vst.msk [vmem:[%s1403_s23 + $0x8] sm:$0xf] %vm865_vm3, %v1108_v14  ;;  %884 = vst.msk [vmem:[%s1403_s23 + $0x48] sm:$0xf] %vm865_vm3, %v1124_v15  ;;  %v708_v20 = vmax.f32 %v590_v16, 0.0  ;;  %v724_v21 = vmax.f32 %v654_v17, 0.0 }
 0x105   : > { %v594_v22 = vpop.f32.mrf.mxu0  ;;  %v658_v23 = vpop.f32.mrf.mxu1 }
 0x106   : > { %v1109_v24 = vpack.c.bf16 %v708_v20, %v708_v20  ;;  %v1125_v25 = vpack.c.bf16 %v724_v21, %v724_v21  ;;  %v595_v26 = vadd.f32 %v1395_v47, %v594_v22  ;;  %v659_v27 = vadd.f32 %v1395_v47, %v658_v23 }
 0x107   : > { %v596_v28 = vpop.f32.mrf.mxu0  ;;  %v660_v29 = vpop.f32.mrf.mxu1 }
 0x108   : > { %869 = vst.msk [vmem:[%s1403_s23 + $0xc] sm:$0xf] %vm865_vm3, %v1109_v24  ;;  %885 = vst.msk [vmem:[%s1403_s23 + $0x4c] sm:$0xf] %vm865_vm3, %v1125_v25  ;;  %v709_v30 = vmax.f32 %v595_v26, 0.0  ;;  %v725_v31 = vmax.f32 %v659_v27, 0.0 }
 0x109   : > { %v597_v32 = vpop.f32.mrf.mxu0  ;;  %v661_v33 = vpop.f32.mrf.mxu1 }
 0x10a   : > { %v1110_v34 = vpack.c.bf16 %v709_v30, %v709_v30  ;;  %v1126_v35 = vpack.c.bf16 %v725_v31, %v725_v31  ;;  %v598_v36 = vadd.f32 %v1395_v47, %v597_v32  ;;  %v662_v37 = vadd.f32 %v1395_v47, %v661_v33 }
 0x10b   : > { %v599_v38 = vpop.f32.mrf.mxu0  ;;  %v663_v39 = vpop.f32.mrf.mxu1 }
 0x10c   : > { %870 = vst.msk [vmem:[%s1403_s23 + $0x10] sm:$0xf] %vm865_vm3, %v1110_v34  ;;  %886 = vst.msk [vmem:[%s1403_s23 + $0x50] sm:$0xf] %vm865_vm3, %v1126_v35  ;;  %v710_v40 = vmax.f32 %v598_v36, 0.0  ;;  %v726_v41 = vmax.f32 %v662_v37, 0.0 }
 0x10d   : > { %v602_v42 = vpop.f32.mrf.mxu0  ;;  %v666_v43 = vpop.f32.mrf.mxu1 }
 0x10e   : > { %v1111_v44 = vpack.c.bf16 %v710_v40, %v710_v40  ;;  %v1127_v45 = vpack.c.bf16 %v726_v41, %v726_v41  ;;  %v603_v46 = vadd.f32 %v1395_v47, %v602_v42  ;;  %v667_v48 = vadd.f32 %v1395_v47, %v666_v43 }
 0x10f   : > { %v604_v49 = vpop.f32.mrf.mxu0  ;;  %v668_v50 = vpop.f32.mrf.mxu1 }
 0x110   : > { %871 = vst.msk [vmem:[%s1403_s23 + $0x14] sm:$0xf] %vm865_vm3, %v1111_v44  ;;  %887 = vst.msk [vmem:[%s1403_s23 + $0x54] sm:$0xf] %vm865_vm3, %v1127_v45  ;;  %v711_v51 = vmax.f32 %v603_v46, 0.0  ;;  %v727_v52 = vmax.f32 %v667_v48, 0.0 }
 0x111   : > { %v605_v53 = vpop.f32.mrf.mxu0  ;;  %v669_v54 = vpop.f32.mrf.mxu1 }
 0x112   : > { %v1112_v55 = vpack.c.bf16 %v711_v51, %v711_v51  ;;  %v1128_v56 = vpack.c.bf16 %v727_v52, %v727_v52  ;;  %v606_v57 = vadd.f32 %v1395_v47, %v605_v53  ;;  %v670_v58 = vadd.f32 %v1395_v47, %v669_v54 }
 0x113   : > { %v607_v59 = vpop.f32.mrf.mxu0  ;;  %v671_v60 = vpop.f32.mrf.mxu1 }
 0x114   : > { %872 = vst.msk [vmem:[%s1403_s23 + $0x18] sm:$0xf] %vm865_vm3, %v1112_v55  ;;  %888 = vst.msk [vmem:[%s1403_s23 + $0x58] sm:$0xf] %vm865_vm3, %v1128_v56  ;;  %v712_v61 = vmax.f32 %v606_v57, 0.0  ;;  %v728_v62 = vmax.f32 %v670_v58, 0.0 }
 0x115   : > { %v610_v63 = vpop.f32.mrf.mxu0  ;;  %v674_v0 = vpop.f32.mrf.mxu1 }
 0x116   : > { %v1113_v1 = vpack.c.bf16 %v712_v61, %v712_v61  ;;  %v1129_v2 = vpack.c.bf16 %v728_v62, %v728_v62  ;;  %v611_v3 = vadd.f32 %v1395_v47, %v610_v63  ;;  %v675_v4 = vadd.f32 %v1395_v47, %v674_v0 }
 0x117   : > { %v612_v5 = vpop.f32.mrf.mxu0  ;;  %v676_v6 = vpop.f32.mrf.mxu1 }
 0x118   : > { %873 = vst.msk [vmem:[%s1403_s23 + $0x1c] sm:$0xf] %vm865_vm3, %v1113_v1  ;;  %889 = vst.msk [vmem:[%s1403_s23 + $0x5c] sm:$0xf] %vm865_vm3, %v1129_v2  ;;  %v713_v7 = vmax.f32 %v611_v3, 0.0  ;;  %v729_v8 = vmax.f32 %v675_v4, 0.0 }
 0x119   : > { %v613_v9 = vpop.f32.mrf.mxu0  ;;  %v677_v10 = vpop.f32.mrf.mxu1 }
 0x11a   : > { %v1114_v11 = vpack.c.bf16 %v713_v7, %v713_v7  ;;  %v1130_v12 = vpack.c.bf16 %v729_v8, %v729_v8  ;;  %v614_v13 = vadd.f32 %v1395_v47, %v613_v9  ;;  %v678_v14 = vadd.f32 %v1395_v47, %v677_v10 }
 0x11b   : > { %v615_v15 = vpop.f32.mrf.mxu0  ;;  %v679_v16 = vpop.f32.mrf.mxu1 }
 0x11c   : > { %874 = vst.msk [vmem:[%s1403_s23 + $0x20] sm:$0xf] %vm865_vm3, %v1114_v11  ;;  %890 = vst.msk [vmem:[%s1403_s23 + $0x60] sm:$0xf] %vm865_vm3, %v1130_v12  ;;  %v714_v17 = vmax.f32 %v614_v13, 0.0  ;;  %v730_v18 = vmax.f32 %v678_v14, 0.0 }
 0x11d   : > { %v618_v19 = vpop.f32.mrf.mxu0  ;;  %v682_v20 = vpop.f32.mrf.mxu1 }
 0x11e   : > { %v1115_v21 = vpack.c.bf16 %v714_v17, %v714_v17  ;;  %v1131_v22 = vpack.c.bf16 %v730_v18, %v730_v18  ;;  %v619_v23 = vadd.f32 %v1395_v47, %v618_v19  ;;  %v683_v24 = vadd.f32 %v1395_v47, %v682_v20 }
 0x11f   : > { %v620_v25 = vpop.f32.mrf.mxu0  ;;  %v684_v26 = vpop.f32.mrf.mxu1 }
 0x120   : > { %875 = vst.msk [vmem:[%s1403_s23 + $0x24] sm:$0xf] %vm865_vm3, %v1115_v21  ;;  %891 = vst.msk [vmem:[%s1403_s23 + $0x64] sm:$0xf] %vm865_vm3, %v1131_v22  ;;  %v715_v27 = vmax.f32 %v619_v23, 0.0  ;;  %v731_v28 = vmax.f32 %v683_v24, 0.0 }
 0x121   : > { %v621_v29 = vpop.f32.mrf.mxu0  ;;  %v685_v30 = vpop.f32.mrf.mxu1 }
 0x122   : > { %v1116_v31 = vpack.c.bf16 %v715_v27, %v715_v27  ;;  %v1132_v32 = vpack.c.bf16 %v731_v28, %v731_v28  ;;  %v622_v33 = vadd.f32 %v1395_v47, %v621_v29  ;;  %v686_v34 = vadd.f32 %v1395_v47, %v685_v30 }
 0x123   : > { %v623_v35 = vpop.f32.mrf.mxu0  ;;  %v687_v36 = vpop.f32.mrf.mxu1 }
 0x124   : > { %876 = vst.msk [vmem:[%s1403_s23 + $0x28] sm:$0xf] %vm865_vm3, %v1116_v31  ;;  %892 = vst.msk [vmem:[%s1403_s23 + $0x68] sm:$0xf] %vm865_vm3, %v1132_v32  ;;  %v716_v37 = vmax.f32 %v622_v33, 0.0  ;;  %v732_v38 = vmax.f32 %v686_v34, 0.0 }
 0x125   : > { %v626_v39 = vpop.f32.mrf.mxu0  ;;  %v690_v40 = vpop.f32.mrf.mxu1 }
 0x126   : > { %v1117_v41 = vpack.c.bf16 %v716_v37, %v716_v37  ;;  %v1133_v42 = vpack.c.bf16 %v732_v38, %v732_v38  ;;  %v627_v43 = vadd.f32 %v1395_v47, %v626_v39  ;;  %v691_v44 = vadd.f32 %v1395_v47, %v690_v40 }
 0x127   : > { %v628_v45 = vpop.f32.mrf.mxu0  ;;  %v692_v46 = vpop.f32.mrf.mxu1 }
 0x128   : > { %877 = vst.msk [vmem:[%s1403_s23 + $0x2c] sm:$0xf] %vm865_vm3, %v1117_v41  ;;  %893 = vst.msk [vmem:[%s1403_s23 + $0x6c] sm:$0xf] %vm865_vm3, %v1133_v42  ;;  %v717_v48 = vmax.f32 %v627_v43, 0.0  ;;  %v733_v49 = vmax.f32 %v691_v44, 0.0 }
 0x129   : > { %v629_v50 = vpop.f32.mrf.mxu0  ;;  %v693_v51 = vpop.f32.mrf.mxu1 }
 0x12a   : > { %v1118_v52 = vpack.c.bf16 %v717_v48, %v717_v48  ;;  %v1134_v53 = vpack.c.bf16 %v733_v49, %v733_v49  ;;  %v630_v54 = vadd.f32 %v1395_v47, %v629_v50  ;;  %v694_v55 = vadd.f32 %v1395_v47, %v693_v51 }
 0x12b   : > { %v631_v56 = vpop.f32.mrf.mxu0  ;;  %v695_v57 = vpop.f32.mrf.mxu1 }
 0x12c   : > { %878 = vst.msk [vmem:[%s1403_s23 + $0x30] sm:$0xf] %vm865_vm3, %v1118_v52  ;;  %894 = vst.msk [vmem:[%s1403_s23 + $0x70] sm:$0xf] %vm865_vm3, %v1134_v53  ;;  %v718_v58 = vmax.f32 %v630_v54, 0.0  ;;  %v734_v59 = vmax.f32 %v694_v55, 0.0 }
 0x12d   : > { %v634_v60 = vpop.f32.mrf.mxu0  ;;  %v698_v61 = vpop.f32.mrf.mxu1 }
 0x12e   : > { %v1119_v62 = vpack.c.bf16 %v718_v58, %v718_v58  ;;  %v1135_v63 = vpack.c.bf16 %v734_v59, %v734_v59  ;;  %v635_v0 = vadd.f32 %v1395_v47, %v634_v60  ;;  %v699_v1 = vadd.f32 %v1395_v47, %v698_v61 }
 0x12f   : > { %v636_v2 = vpop.f32.mrf.mxu0  ;;  %v700_v3 = vpop.f32.mrf.mxu1 }
 0x130   : > { %879 = vst.msk [vmem:[%s1403_s23 + $0x34] sm:$0xf] %vm865_vm3, %v1119_v62  ;;  %895 = vst.msk [vmem:[%s1403_s23 + $0x74] sm:$0xf] %vm865_vm3, %v1135_v63  ;;  %v719_v4 = vmax.f32 %v635_v0, 0.0  ;;  %v735_v5 = vmax.f32 %v699_v1, 0.0 }
 0x131   : > { %v637_v6 = vpop.f32.mrf.mxu0  ;;  %v701_v7 = vpop.f32.mrf.mxu1 }
 0x132   : > { %v1120_v8 = vpack.c.bf16 %v719_v4, %v719_v4  ;;  %v1136_v9 = vpack.c.bf16 %v735_v5, %v735_v5  ;;  %v638_v10 = vadd.f32 %v1395_v47, %v637_v6  ;;  %v702_v11 = vadd.f32 %v1395_v47, %v701_v7 }
 0x133   : > { %v639_v12 = vpop.f32.mrf.mxu0  ;;  %v703_v13 = vpop.f32.mrf.mxu1 }
 0x134   : > { %880 = vst.msk [vmem:[%s1403_s23 + $0x38] sm:$0xf] %vm865_vm3, %v1120_v8  ;;  %896 = vst.msk [vmem:[%s1403_s23 + $0x78] sm:$0xf] %vm865_vm3, %v1136_v9  ;;  %v720_v14 = vmax.f32 %v638_v10, 0.0  ;;  %v736_v15 = vmax.f32 %v702_v11, 0.0 }
 0x136   : > { %v1121_v16 = vpack.c.bf16 %v720_v14, %v720_v14  ;;  %v1137_v17 = vpack.c.bf16 %v736_v15, %v736_v15 }
 0x138   : > { %881 = vst.msk [vmem:[%s1403_s23 + $0x3c] sm:$0xf] %vm865_vm3, %v1121_v16  ;;  %897 = vst.msk [vmem:[%s1403_s23 + $0x7c] sm:$0xf] %vm865_vm3, %v1137_v17 }
 0x139 PF: > { %s13_s14 = sadd.s32 1, %s1264_s14   ;;  %s1512_s12 = smov %s1260_s13 }
 0x13a   : > { %p10_p5 = scmp.ge.s32.totalorder %s13_s14, 4   ;;  %s1513_s13 = smov %s1515_s15 }
 0x13c   :  { %12 = sbr.rel (!%p10_p5) target bundleno = 2 (0x2), region = 68 }

// kernel: opt_resnet_forward.28
= control target key start
LH: loop header
LB: loop body
LE: loop exit
PB: predicated region body
PF: predicated region fallthrough
CT: control target
= control target key end

     0   :  { %vm110_vm0 = vcmask 523264   ;;  %vm312_vm1 = vcmask 519168   ;;  %s591_s1 = inlined_call_operand.vmem [shape: bf16[64,64], index: 1, kind: input, shape index: {}]   ;;  %s592_s0 = inlined_call_operand.vmem [shape: bf16[128,64], index: 0, kind: input, shape index: {}]   ;;  %s593_s2 = inlined_call_operand.vmem [shape: f32[1,64], index: 2, kind: input, shape index: {}]   ;;  %s594_s3 = inlined_call_operand.vmem [shape: bf16[128,64], index: 3, kind: output, shape index: {}]  }
   0x1   :  { %v430_v0 = vld [vmem:[%s591_s1 + $0x18] sm:$0xff]   ;;  %v431_v1 = vld [vmem:[%s591_s1 + $0x10] sm:$0xff]   ;;  %v432_v2 = vld [vmem:[%s591_s1 + $0x8] sm:$0xff]  }
   0x2   :  { %398 = vmatprep.subr.bf16.mxu0 %v430_v0  ;;  %422 = vmatprep.subr.bf16.mxu1 %v430_v0  ;;  %v434_v3 = vld [vmem:[%s592_s0] sm:$0xff]   ;;  %v436_v6 = vld [vmem:[%s592_s0 + $0x8] sm:$0xff]   ;;  %v438_v8 = vld [vmem:[%s592_s0 + $0x10] sm:$0xff]  }
   0x3   :  { %399 = vmatpush3.bf16.msra.mxu0 %v430_v0  ;;  %426 = vmatpush3.bf16.msra.mxu1 %v430_v0  ;;  %v435_v4 = vld [vmem:[%s592_s0 + $0x20] sm:$0xff]   ;;  %v437_v7 = vld [vmem:[%s592_s0 + $0x28] sm:$0xff]   ;;  %v439_v9 = vld [vmem:[%s592_s0 + $0x30] sm:$0xff]  }
   0x4   :  { %400 = vmatprep.subr.bf16.mxu0 %v431_v1  ;;  %423 = vmatprep.subr.bf16.mxu1 %v431_v1  ;;  %v433_v5 = vld [vmem:[%s591_s1] sm:$0xff]   ;;  %v440_v10 = vld [vmem:[%s592_s0 + $0x18] sm:$0xff]  }
   0x5   :  { %406 = vmatprep.mubr.msk.bf16.mxu0 %vm110_vm0, %v434_v3  ;;  %414 = vmatprep.mubr.msk.bf16.mxu1 %vm110_vm0, %v435_v4  ;;  %v441_v11 = vld [vmem:[%s592_s0 + $0x38] sm:$0xff]   ;;  %v509_v12 = vld [vmem:[%s593_s2] ss:$0 sm:$0xff] }
   0x7   :  { %401 = vmatpush3.bf16.msra.mxu0 %v431_v1  ;;  %427 = vmatpush3.bf16.msra.mxu1 %v431_v1 }
   0x8   :  { %402 = vmatprep.subr.bf16.mxu0 %v432_v2  ;;  %424 = vmatprep.subr.bf16.mxu1 %v432_v2 }
   0xb   :  { %403 = vmatpush3.bf16.msra.mxu0 %v432_v2  ;;  %428 = vmatpush3.bf16.msra.mxu1 %v432_v2 }
   0xc   :  { %404 = vmatprep.subr.bf16.mxu0 %v433_v5  ;;  %425 = vmatprep.subr.bf16.mxu1 %v433_v5 }
   0xf   :  { %405 = vmatpush3.bf16.msra.mxu0 %v433_v5  ;;  %429 = vmatpush3.bf16.msra.mxu1 %v433_v5 }
  0x12   :  { %407 = vmatmul.mubr.msk.bf16.vlgmr.msra.gmra.mxu0 %vm110_vm0, %v436_v6  ;;  %415 = vmatmul.mubr.msk.bf16.vlgmr.msra.gmra.mxu1 %vm110_vm0, %v437_v7 }
  0x13   :  { %410 = vmatprep.mubr.msk.bf16.mxu0 %vm110_vm0, %v438_v8  ;;  %418 = vmatprep.mubr.msk.bf16.mxu1 %vm110_vm0, %v439_v9 }
  0x1a   :  { %411 = vmatmul.mubr.msk.bf16.gmra.mxu0 %vm110_vm0, %v440_v10  ;;  %419 = vmatmul.mubr.msk.bf16.gmra.mxu1 %vm110_vm0, %v441_v11 }
  0xd2   :  { %v408_v13 = vpop.f32.mrf.mxu0  ;;  %v416_v14 = vpop.f32.mrf.mxu1 }
  0xd3   :  { %v178_v15 = vadd.f32 %v408_v13, %v509_v12  ;;  %v210_v16 = vadd.f32 %v416_v14, %v509_v12 }
  0xd4   :  { %v169_v17 = vpop.f32.mrf.mxu0  ;;  %v201_v18 = vpop.f32.mrf.mxu1 }
  0xd5   :  { %v234_v19 = vmax.f32 %v178_v15, 0.0  ;;  %v242_v20 = vmax.f32 %v210_v16, 0.0  ;;  %v170_v21 = vadd.f32 %v509_v12, %v169_v17  ;;  %v202_v22 = vadd.f32 %v509_v12, %v201_v18 }
  0xd6   :  { %v409_v23 = vpop.f32.mrf.mxu0  ;;  %v417_v24 = vpop.f32.mrf.mxu1 }
  0xd7   :  { %v372_v25 = vpack.c.bf16 %v234_v19, %v234_v19  ;;  %v380_v26 = vpack.c.bf16 %v242_v20, %v242_v20  ;;  %v232_v27 = vmax.f32 %v170_v21, 0.0  ;;  %v240_v28 = vmax.f32 %v202_v22, 0.0 }
  0xd8   :  { %v181_v29 = vadd.f32 %v409_v23, %v509_v12  ;;  %v213_v30 = vadd.f32 %v417_v24, %v509_v12  ;;  %v172_v31 = vpop.f32.mrf.mxu0  ;;  %v204_v32 = vpop.f32.mrf.mxu1 }
  0xd9   :  { %315 = vst.msk [vmem:[%s594_s3 + $0x8] sm:$0xf] %vm312_vm1, %v372_v25  ;;  %323 = vst.msk [vmem:[%s594_s3 + $0x28] sm:$0xf] %vm312_vm1, %v380_v26  ;;  %v370_v33 = vpack.c.bf16 %v232_v27, %v232_v27  ;;  %v378_v34 = vpack.c.bf16 %v240_v28, %v240_v28  ;;  %v173_v35 = vadd.f32 %v509_v12, %v172_v31 }
  0xda   :  { %v205_v36 = vadd.f32 %v509_v12, %v204_v32  ;;  %v235_v37 = vmax.f32 %v181_v29, 0.0  ;;  %v243_v38 = vmax.f32 %v213_v30, 0.0  ;;  %v412_v39 = vpop.f32.mrf.mxu0  ;;  %v420_v40 = vpop.f32.mrf.mxu1 }
  0xdb   :  { %313 = vst.msk [vmem:[%s594_s3] sm:$0xf] %vm312_vm1, %v370_v33  ;;  %321 = vst.msk [vmem:[%s594_s3 + $0x20] sm:$0xf] %vm312_vm1, %v378_v34  ;;  %v233_v41 = vmax.f32 %v173_v35, 0.0  ;;  %v194_v43 = vadd.f32 %v412_v39, %v509_v12  ;;  %v226_v44 = vadd.f32 %v420_v40, %v509_v12 }
  0xdc   :  { %v241_v42 = vmax.f32 %v205_v36, 0.0  ;;  %v373_v45 = vpack.c.bf16 %v235_v37, %v235_v37  ;;  %v381_v46 = vpack.c.bf16 %v243_v38, %v243_v38  ;;  %v185_v47 = vpop.f32.mrf.mxu0  ;;  %v217_v48 = vpop.f32.mrf.mxu1 }
  0xdd   :  { %v371_v49 = vpack.c.bf16 %v233_v41, %v233_v41  ;;  %v238_v51 = vmax.f32 %v194_v43, 0.0  ;;  %v246_v52 = vmax.f32 %v226_v44, 0.0  ;;  %v186_v53 = vadd.f32 %v509_v12, %v185_v47 }
  0xde   :  { %v379_v50 = vpack.c.bf16 %v241_v42, %v241_v42  ;;  %316 = vst.msk [vmem:[%s594_s3 + $0xc] sm:$0xf] %vm312_vm1, %v373_v45  ;;  %324 = vst.msk [vmem:[%s594_s3 + $0x2c] sm:$0xf] %vm312_vm1, %v381_v46  ;;  %v218_v54 = vadd.f32 %v509_v12, %v217_v48  ;;  %v413_v55 = vpop.f32.mrf.mxu0  ;;  %v421_v56 = vpop.f32.mrf.mxu1 }
  0xdf   :  { %314 = vst.msk [vmem:[%s594_s3 + $0x4] sm:$0xf] %vm312_vm1, %v371_v49  ;;  %v376_v57 = vpack.c.bf16 %v238_v51, %v238_v51  ;;  %v384_v58 = vpack.c.bf16 %v246_v52, %v246_v52  ;;  %v197_v59 = vadd.f32 %v413_v55, %v509_v12  ;;  %v229_v60 = vadd.f32 %v421_v56, %v509_v12 }
  0xe0   :  { %322 = vst.msk [vmem:[%s594_s3 + $0x24] sm:$0xf] %vm312_vm1, %v379_v50  ;;  %v236_v61 = vmax.f32 %v186_v53, 0.0  ;;  %v244_v62 = vmax.f32 %v218_v54, 0.0  ;;  %v188_v63 = vpop.f32.mrf.mxu0  ;;  %v220_v0 = vpop.f32.mrf.mxu1 }
  0xe1   :  { %319 = vst.msk [vmem:[%s594_s3 + $0x18] sm:$0xf] %vm312_vm1, %v376_v57  ;;  %327 = vst.msk [vmem:[%s594_s3 + $0x38] sm:$0xf] %vm312_vm1, %v384_v58  ;;  %v239_v1 = vmax.f32 %v197_v59, 0.0  ;;  %v247_v2 = vmax.f32 %v229_v60, 0.0  ;;  %v189_v3 = vadd.f32 %v509_v12, %v188_v63  ;;  %v221_v4 = vadd.f32 %v509_v12, %v220_v0 }
  0xe2   :  { %v374_v5 = vpack.c.bf16 %v236_v61, %v236_v61  ;;  %v382_v6 = vpack.c.bf16 %v244_v62, %v244_v62 }
  0xe3   :  { %v377_v7 = vpack.c.bf16 %v239_v1, %v239_v1  ;;  %v385_v8 = vpack.c.bf16 %v247_v2, %v247_v2  ;;  %v237_v9 = vmax.f32 %v189_v3, 0.0  ;;  %v245_v10 = vmax.f32 %v221_v4, 0.0 }
  0xe4   :  { %317 = vst.msk [vmem:[%s594_s3 + $0x10] sm:$0xf] %vm312_vm1, %v374_v5  ;;  %325 = vst.msk [vmem:[%s594_s3 + $0x30] sm:$0xf] %vm312_vm1, %v382_v6 }
  0xe5   :  { %320 = vst.msk [vmem:[%s594_s3 + $0x1c] sm:$0xf] %vm312_vm1, %v377_v7  ;;  %328 = vst.msk [vmem:[%s594_s3 + $0x3c] sm:$0xf] %vm312_vm1, %v385_v8  ;;  %v375_v11 = vpack.c.bf16 %v237_v9, %v237_v9  ;;  %v383_v12 = vpack.c.bf16 %v245_v10, %v245_v10 }
  0xe7   :  { %318 = vst.msk [vmem:[%s594_s3 + $0x14] sm:$0xf] %vm312_vm1, %v375_v11  ;;  %326 = vst.msk [vmem:[%s594_s3 + $0x34] sm:$0xf] %vm312_vm1, %v383_v12 }

// kernel: opt_resnet_forward.26
= control target key start
LH: loop header
LB: loop body
LE: loop exit
PB: predicated region body
PF: predicated region fallthrough
CT: control target
= control target key end

     0   :  { %s792_s15 = smov 0   ;;  %s1025_s0 = inlined_call_operand.vmem [shape: bf16[2,9,9,64], index: 0, kind: input, shape index: {}]   ;;  %s1026_s1 = inlined_call_operand.vmem [shape: bf16[2,9,8,64], index: 1, kind: input, shape index: {}]   ;;  %s1027_s2 = inlined_call_operand.vmem [shape: bf16[2,8,9,64], index: 2, kind: input, shape index: {}]   ;;  %s1028_s3 = inlined_call_operand.vmem [shape: bf16[2,8,8,64], index: 3, kind: input, shape index: {}]   ;;  %s1029_s4 = inlined_call_operand.vmem [shape: bf16[2,8,8,64], index: 4, kind: output, shape index: {}]  }
   0x1 LB: > { %s731_s16 = sadd.s32 4294967295, %s765_s15   ;;  %p735_p0 = scmp.ge.s32.totalorder %s765_s15, 1  ;;  %s765_s15 = sphi %s792_s15, %s14_s15  }
   0x2   : > { %p192_p1 = scmp.lt.s32.totalorder %s765_s15, 3 }
   0x4   : > { %p193_p2 = pnand %p735_p0, %p192_p1 }
   0x5   : > { %p233_p3 = scmp.lt.s32.totalorder (!%p193_p2), %s731_s16, 1 }
   0x6   : > { %196 = sbr.rel (%p193_p2) target bundleno = 81 (0x51), region = 36 }
   0xb   : > { %s1033_s16 = smov (!%p233_p3, %s731_s16), 1  ;;  %vm317_vm0 = vsmask.f32 3328  ;;  %vm318_vm1 = vsmask.f32 7440  ;;  %vm631_vm3 = vcmask 519168  }
   0xc   : > { %s749_s17 = smul.u32 72, %s1033_s16  ;;  %s746_s18 = sshll.u32 %s1033_s16, 6  ;;  %vm849_vm2 = vmor %vm317_vm0, %vm318_vm1 }
   0xd   : > { %s807_s21 = scalar_lea.vmem %s1027_s2, %s746_s18  ;;  %s747_s25 = sshll.u32 %s1033_s16, 5 }
   0xe   : > { %s812_s24 = scalar_lea.vmem %s1025_s0, %s749_s17  ;;  %s820_s28 = scalar_lea.vmem %s1028_s3, %s747_s25  ;;  %v829_v4 = vld [vmem:[%s807_s21] sm:$0xf]  ;;  %v286_v9 = vld [vmem:[%s807_s21 + $0x4] sm:$0x1]  ;;  %v845_v28 = vld [vmem:[%s807_s21 + $0x8] sm:$0xf] }
   0xf   : > { %v258_v0 = vld [vmem:[%s812_s24] sm:$0xf]  ;;  %v259_v1 = vld [vmem:[%s812_s24 + $0x4] sm:$0x1]  ;;  %v825_v2 = vld [vmem:[%s812_s24 + $0x8] sm:$0xf]  ;;  %s910_s9 = scalar_lea.vmem %s1029_s4, %s747_s25 }
  0x10   : > { %v261_v3 = vld [vmem:[%s812_s24 + $0xc] sm:$0x1]  ;;  %v301_v5 = vld [vmem:[%s820_s28] sm:$0xf]  ;;  %v302_v6 = vld [vmem:[%s820_s28 + $0x4] sm:$0xf] }
  0x11   : > { %v321_v7 = vshrl.u32 %v258_v0, 16  ;;  %v324_v8 = vshll.u32 %v258_v0, 16  ;;  %v309_v10 = vmax.bf16 %v301_v5, %v258_v0  ;;  %v310_v11 = vmax.bf16 %v302_v6, %v825_v2  ;;  %v838_v18 = vld [vmem:[%s812_s24 + $0x10] sm:$0xf]  ;;  %v263_v23 = vld [vmem:[%s812_s24 + $0x14] sm:$0x1] }
  0x12   : > { %v330_v12 = vshll.u32 %v259_v1, 16  ;;  %v335_v13 = vshrl.u32 %v825_v2, 16  ;;  %v338_v16 = vshll.u32 %v825_v2, 16  ;;  %v344_v17 = vshll.u32 %v261_v3, 16  ;;  %s750_s29 = smul.u32 36, %s1033_s16 }
  0x13   : > { %v323_v14 = vrot.slane %v321_v7, 4  ;;  %v326_v15 = vrot.slane %v324_v8, 5  ;;  %v504_v21 = vshrl.u32 %v829_v4, 16  ;;  %v507_v22 = vshll.u32 %v829_v4, 16  ;;  %v303_v32 = vld [vmem:[%s820_s28 + $0x8] sm:$0xf] }
  0x14   : > { %v332_v19 = vrot.slane %v330_v12, 5  ;;  %v337_v20 = vrot.slane %v335_v13, 4  ;;  %v340_v25 = vrot.slane %v338_v16, 5  ;;  %v346_v26 = vrot.slane %v344_v17, 5  ;;  %v288_v40 = vld [vmem:[%s807_s21 + $0xc] sm:$0x1]  ;;  %s867_s6 = scalar_lea.vmem %s1026_s1, %s750_s29 }
  0x15   : > { %v327_v24 = vor.u32 %v326_v15, %v323_v14  ;;  %v513_v27 = vshll.u32 %v286_v9, 16  ;;  %v506_v30 = vrot.slane %v504_v21, 4  ;;  %v509_v31 = vrot.slane %v507_v22, 5  ;;  %v870_v52 = vld [vmem:[%s812_s24 + $0x18] sm:$0xf] }
  0x16   : > { %v349_v33 = vshrl.u32 %v838_v18, 16  ;;  %v352_v34 = vshll.u32 %v838_v18, 16  ;;  %v341_v36 = vor.u32 %v340_v25, %v337_v20  ;;  %v311_v38 = vmax.bf16 %v303_v32, %v838_v18  ;;  %v265_v60 = vld [vmem:[%s812_s24 + $0x1c] sm:$0x1]  ;;  %v276_v61 = vld [vmem:[%s867_s6] sm:$0xf] }
  0x17   : > { %v328_v35 = vrot.slane %v327_v24, 4  ;;  %v856_v37 = vrot.slane %v513_v27, 5  ;;  %v510_v39 = vor.u32 %v509_v31, %v506_v30  ;;  %v358_v43 = vshll.u32 %v263_v23, 16  ;;  %v881_v1 = vld [vmem:[%s807_s21 + $0x10] sm:$0xf] }
  0x18   : > { %v351_v41 = vrot.slane %v349_v33, 4  ;;  %v354_v42 = vrot.slane %v352_v34, 5  ;;  %v342_v45 = vrot.slane %v341_v36, 4  ;;  %v518_v46 = vshrl.u32 %v845_v28, 16  ;;  %v304_v7 = vld [vmem:[%s820_s28 + $0xc] sm:$0xf] }
  0x19   : > { %v333_v44 = vsel %vm849_vm2, %v328_v35, %v332_v19  ;;  %v521_v47 = vshll.u32 %v845_v28, 16  ;;  %v511_v49 = vrot.slane %v510_v39, 4  ;;  %v360_v51 = vrot.slane %v358_v43, 5  ;;  %v277_v9 = vld [vmem:[%s867_s6 + $0x4] sm:$0xf] }
  0x1a   : > { %v440_v48 = vmax.bf16 %v333_v44, %v309_v10  ;;  %v355_v50 = vor.u32 %v354_v42, %v351_v41  ;;  %v347_v53 = vsel %vm849_vm2, %v342_v45, %v346_v26  ;;  %v520_v54 = vrot.slane %v518_v46, 4  ;;  %v290_v16 = vld [vmem:[%s807_s21 + $0x14] sm:$0x1]  ;;  %v893_v20 = vld [vmem:[%s812_s24 + $0x20] sm:$0xf] }
  0x1b   : > { %v523_v55 = vrot.slane %v521_v47, 5  ;;  %v527_v56 = vshll.u32 %v288_v40, 16  ;;  %v441_v57 = vmax.bf16 %v347_v53, %v310_v11  ;;  %v516_v62 = vsel %vm849_vm2, %v511_v49, %v856_v37  ;;  %v267_v30 = vld [vmem:[%s812_s24 + $0x24] sm:$0x1]  ;;  %v278_v31 = vld [vmem:[%s867_s6 + $0x8] sm:$0xf] }
  0x1c   : > { %v448_v58 = vmax.bf16 %v440_v48, %v825_v2  ;;  %v356_v59 = vrot.slane %v355_v50, 4  ;;  %v363_v3 = vshrl.u32 %v870_v52, 16  ;;  %v366_v8 = vshll.u32 %v870_v52, 16  ;;  %v913_v42 = vld [vmem:[%s807_s21 + $0x18] sm:$0xf] }
  0x1d   : > { %v524_v63 = vor.u32 %v523_v55, %v520_v54  ;;  %v529_v0 = vrot.slane %v527_v56, 5  ;;  %v449_v6 = vmax.bf16 %v441_v57, %v838_v18  ;;  %v372_v13 = vshll.u32 %v265_v60, 16  ;;  %v292_v47 = vld [vmem:[%s807_s21 + $0x1c] sm:$0x1]  ;;  %v305_v48 = vld [vmem:[%s820_s28 + $0x10] sm:$0xf] }
  0x1e   : > { %v471_v5 = vmax.bf16 %v448_v58, %v347_v53  ;;  %v361_v2 = vsel %vm849_vm2, %v356_v59, %v360_v51  ;;  %v365_v12 = vrot.slane %v363_v3, 4  ;;  %v368_v17 = vrot.slane %v366_v8, 5  ;;  %v925_v57 = vld [vmem:[%s812_s24 + $0x28] sm:$0xf] }
  0x1f   : > { %v442_v10 = vmax.bf16 %v361_v2, %v311_v38  ;;  %v525_v11 = vrot.slane %v524_v63, 4  ;;  %v472_v15 = vmax.bf16 %v449_v6, %v361_v2  ;;  %v532_v19 = vshrl.u32 %v881_v1, 16  ;;  %v931_v63 = vld [vmem:[%s807_s21 + $0x20] sm:$0xf] }
  0x20   : > { %v479_v14 = vmax.bf16 %v471_v5, %v276_v61  ;;  %v312_v21 = vmax.bf16 %v304_v7, %v870_v52  ;;  %v374_v22 = vrot.slane %v372_v13, 5  ;;  %v535_v23 = vshll.u32 %v881_v1, 16 }
  0x21   : > { %v530_v18 = vsel %vm849_vm2, %v525_v11, %v529_v0  ;;  %v480_v25 = vmax.bf16 %v472_v15, %v277_v9  ;;  %v369_v26 = vor.u32 %v368_v17, %v365_v12  ;;  %v534_v27 = vrot.slane %v532_v19, 4  ;;  %v279_v0 = vld [vmem:[%s867_s6 + $0xc] sm:$0xf] }
  0x22   : > { %v487_v24 = vmax.bf16 %v479_v14, %v277_v9  ;;  %v450_v32 = vmax.bf16 %v442_v10, %v870_v52  ;;  %v537_v33 = vrot.slane %v535_v23, 5  ;;  %v541_v34 = vshll.u32 %v290_v16, 16  ;;  %v306_v9 = vld [vmem:[%s820_s28 + $0x14] sm:$0xf] }
  0x23   : > { %v377_v35 = vshrl.u32 %v893_v20, 16  ;;  %v488_v37 = vmax.bf16 %v480_v25, %v278_v31  ;;  %v370_v38 = vrot.slane %v369_v26, 4  ;;  %v380_v39 = vshll.u32 %v893_v20, 16  ;;  %v271_v26 = vld [vmem:[%s812_s24 + $0x34] sm:$0x1] }
  0x24   : > { %v495_v36 = vmax.bf16 %v487_v24, %v829_v4  ;;  %v538_v40 = vor.u32 %v537_v33, %v534_v27  ;;  %v543_v41 = vrot.slane %v541_v34, 5  ;;  %v386_v44 = vshll.u32 %v267_v30, 16  ;;  %v307_v33 = vld [vmem:[%s820_s28 + $0x18] sm:$0xf]  ;;  %v280_v34 = vld [vmem:[%s867_s6 + $0x10] sm:$0xf] }
  0x25   : > { %v379_v43 = vrot.slane %v377_v35, 4  ;;  %v496_v4 = vmax.bf16 %v488_v37, %v845_v28  ;;  %v375_v46 = vsel %vm849_vm2, %v370_v38, %v374_v22  ;;  %v382_v49 = vrot.slane %v380_v39, 5 }
  0x26   : > { %v623_v45 = vmax.bf16 %v516_v62, %v495_v36  ;;  %v443_v50 = vmax.bf16 %v375_v46, %v312_v21  ;;  %v473_v51 = vmax.bf16 %v450_v32, %v375_v46  ;;  %v539_v52 = vrot.slane %v538_v40, 4  ;;  %v269_v62 = vld [vmem:[%s812_s24 + $0x2c] sm:$0x1]  ;;  %v947_v21 = vld [vmem:[%s812_s24 + $0x30] sm:$0xf] }
  0x27   : > { %v388_v53 = vrot.slane %v386_v44, 5  ;;  %v624_v54 = vmax.bf16 %v530_v18, %v496_v4  ;;  %v383_v55 = vor.u32 %v382_v49, %v379_v43  ;;  %v546_v28 = vshrl.u32 %v913_v42, 16  ;;  %v953_v32 = vld [vmem:[%s807_s21 + $0x28] sm:$0xf]  ;;  %v296_v49 = vld [vmem:[%s807_s21 + $0x2c] sm:$0x1] }
  0x28   : > { %632 = vst.msk [vmem:[%s910_s9] sm:$0xf] %vm631_vm3, %v623_v45  ;;  %v549_v56 = vshll.u32 %v913_v42, 16  ;;  %v481_v58 = vmax.bf16 %v473_v51, %v278_v31  ;;  %v313_v59 = vmax.bf16 %v305_v48, %v893_v20  ;;  %v451_v60 = vmax.bf16 %v443_v50, %v893_v20  ;;  %v294_v20 = vld [vmem:[%s807_s21 + $0x24] sm:$0x1] }
  0x29   : > { %v555_v61 = vshll.u32 %v292_v47, 16  ;;  %633 = vst.msk [vmem:[%s910_s9 + $0x4] sm:$0xf] %vm631_vm3, %v624_v54  ;;  %v544_v3 = vsel %vm849_vm2, %v539_v52, %v543_v41  ;;  %v384_v5 = vrot.slane %v383_v55, 4  ;;  %v548_v2 = vrot.slane %v546_v28, 4 }
  0x2a   : > { %v551_v6 = vrot.slane %v549_v56, 5  ;;  %v489_v7 = vmax.bf16 %v481_v58, %v279_v0  ;;  %v391_v10 = vshrl.u32 %v925_v57, 16  ;;  %v394_v11 = vshll.u32 %v925_v57, 16  ;;  %v969_v52 = vld [vmem:[%s812_s24 + $0x38] sm:$0xf] }
  0x2b   : > { %v557_v8 = vrot.slane %v555_v61, 5  ;;  %v389_v12 = vsel %vm849_vm2, %v384_v5, %v388_v53  ;;  %v400_v14 = vshll.u32 %v269_v62, 16  ;;  %v560_v15 = vshrl.u32 %v931_v63, 16  ;;  %v308_v56 = vld [vmem:[%s820_s28 + $0x1c] sm:$0xf] }
  0x2c   : > { %v552_v13 = vor.u32 %v551_v6, %v548_v2  ;;  %v497_v16 = vmax.bf16 %v489_v7, %v881_v1  ;;  %v444_v17 = vmax.bf16 %v389_v12, %v313_v59  ;;  %v474_v19 = vmax.bf16 %v451_v60, %v389_v12  ;;  %v273_v60 = vld [vmem:[%s812_s24 + $0x3c] sm:$0x1]  ;;  %v977_v5 = vld [vmem:[%s807_s21 + $0x30] sm:$0xf] }
  0x2d   : > { %v393_v18 = vrot.slane %v391_v10, 4  ;;  %v314_v23 = vmax.bf16 %v306_v9, %v925_v57  ;;  %v396_v24 = vrot.slane %v394_v11, 5  ;;  %v402_v25 = vrot.slane %v400_v14, 5  ;;  %v281_v9 = vld [vmem:[%s867_s6 + $0x14] sm:$0xf] }
  0x2e   : > { %v553_v22 = vrot.slane %v552_v13, 4  ;;  %v625_v27 = vmax.bf16 %v544_v3, %v497_v16  ;;  %v482_v30 = vmax.bf16 %v474_v19, %v279_v0  ;;  %v562_v31 = vrot.slane %v560_v15, 4 }
  0x2f   : > { %v563_v1 = vshll.u32 %v931_v63, 16  ;;  %v397_v36 = vor.u32 %v396_v24, %v393_v18  ;;  %v452_v37 = vmax.bf16 %v444_v17, %v925_v57  ;;  %v569_v38 = vshll.u32 %v294_v20, 16  ;;  %v298_v18 = vld [vmem:[%s807_s21 + $0x34] sm:$0x1] }
  0x30   : > { %v558_v35 = vsel %vm849_vm2, %v553_v22, %v557_v8  ;;  %634 = vst.msk [vmem:[%s910_s9 + $0x8] sm:$0xf] %vm631_vm3, %v625_v27  ;;  %v490_v39 = vmax.bf16 %v482_v30, %v280_v34  ;;  %v405_v41 = vshrl.u32 %v947_v21, 16  ;;  %v408_v43 = vshll.u32 %v947_v21, 16  ;;  %v274_v27 = vld [vmem:[%s812_s24 + $0x40] sm:$0xf] }
  0x31   : > { %v565_v40 = vrot.slane %v563_v1, 5  ;;  %v398_v44 = vrot.slane %v397_v36, 4  ;;  %v315_v45 = vmax.bf16 %v307_v33, %v947_v21  ;;  %v414_v4 = vshll.u32 %v271_v26, 16  ;;  %v275_v30 = vld [vmem:[%s812_s24 + $0x44] sm:$0x1] }
  0x32   : > { %v574_v46 = vshrl.u32 %v953_v32, 16  ;;  %v498_v47 = vmax.bf16 %v490_v39, %v913_v42  ;;  %v407_v50 = vrot.slane %v405_v41, 4  ;;  %v410_v51 = vrot.slane %v408_v43, 5 }
  0x33   : > { %v566_v48 = vor.u32 %v565_v40, %v562_v31  ;;  %v403_v53 = vsel %vm849_vm2, %v398_v44, %v402_v25  ;;  %v571_v54 = vrot.slane %v569_v38, 5  ;;  %v577_v28 = vshll.u32 %v953_v32, 16  ;;  %v282_v40 = vld [vmem:[%s867_s6 + $0x18] sm:$0xf] }
  0x34   : > { %v576_v55 = vrot.slane %v574_v46, 4  ;;  %v626_v57 = vmax.bf16 %v558_v35, %v498_v47  ;;  %v445_v58 = vmax.bf16 %v403_v53, %v314_v23  ;;  %v475_v42 = vmax.bf16 %v452_v37, %v403_v53  ;;  %v299_v35 = vld [vmem:[%s807_s21 + $0x38] sm:$0xf] }
  0x35   : > { %v567_v59 = vrot.slane %v566_v48, 4  ;;  %v411_v61 = vor.u32 %v410_v51, %v407_v50  ;;  %v416_v62 = vrot.slane %v414_v4, 5  ;;  %v579_v0 = vrot.slane %v577_v28, 5  ;;  %v300_v28 = vld [vmem:[%s807_s21 + $0x3c] sm:$0x1] }
  0x36   : > { %v583_v3 = vshll.u32 %v296_v49, 16  ;;  %635 = vst.msk [vmem:[%s910_s9 + $0xc] sm:$0xf] %vm631_vm3, %v626_v57  ;;  %v483_v2 = vmax.bf16 %v475_v42, %v280_v34  ;;  %v453_v6 = vmax.bf16 %v445_v58, %v947_v21  ;;  %v316_v7 = vmax.bf16 %v308_v56, %v969_v52 }
  0x37   : > { %v419_v8 = vshrl.u32 %v969_v52, 16  ;;  %v572_v10 = vsel %vm849_vm2, %v567_v59, %v571_v54  ;;  %v412_v11 = vrot.slane %v411_v61, 4  ;;  %v580_v12 = vor.u32 %v579_v0, %v576_v55 }
  0x38   : > { %v422_v13 = vshll.u32 %v969_v52, 16  ;;  %v491_v14 = vmax.bf16 %v483_v2, %v281_v9  ;;  %v428_v16 = vshll.u32 %v273_v60, 16  ;;  %v588_v17 = vshrl.u32 %v977_v5, 16 }
  0x39   : > { %v421_v15 = vrot.slane %v419_v8, 4  ;;  %v417_v19 = vsel %vm849_vm2, %v412_v11, %v416_v62  ;;  %v585_v20 = vrot.slane %v583_v3, 5  ;;  %v591_v22 = vshll.u32 %v977_v5, 16  ;;  %v283_v62 = vld [vmem:[%s867_s6 + $0x1c] sm:$0xf] }
  0x3a   : > { %v424_v21 = vrot.slane %v422_v13, 5  ;;  %v499_v23 = vmax.bf16 %v491_v14, %v931_v63  ;;  %v446_v24 = vmax.bf16 %v417_v19, %v315_v45  ;;  %v476_v25 = vmax.bf16 %v453_v6, %v417_v19  ;;  %v284_v11 = vld [vmem:[%s867_s6 + $0x20] sm:$0xf] }
  0x3b   : > { %v581_v26 = vrot.slane %v580_v12, 4  ;;  %v430_v1 = vrot.slane %v428_v16, 5  ;;  %v590_v33 = vrot.slane %v588_v17, 4  ;;  %v593_v34 = vrot.slane %v591_v22, 5 }
  0x3c   : > { %v425_v31 = vor.u32 %v424_v21, %v421_v15  ;;  %v627_v36 = vmax.bf16 %v572_v10, %v499_v23  ;;  %v484_v37 = vmax.bf16 %v476_v25, %v281_v9  ;;  %v454_v38 = vmax.bf16 %v446_v24, %v969_v52 }
  0x3d   : > { %v597_v39 = vshll.u32 %v298_v18, 16  ;;  %v594_v43 = vor.u32 %v593_v34, %v590_v33  ;;  %v457_v63 = vshrl.u32 %v274_v27, 16  ;;  %v460_v44 = vshll.u32 %v274_v27, 16 }
  0x3e   : > { %v426_v41 = vrot.slane %v425_v31, 4  ;;  %636 = vst.msk [vmem:[%s910_s9 + $0x10] sm:$0xf] %vm631_vm3, %v627_v36  ;;  %v492_v45 = vmax.bf16 %v484_v37, %v282_v40  ;;  %v586_v4 = vsel %vm849_vm2, %v581_v26, %v585_v20  ;;  %v466_v46 = vshll.u32 %v275_v30, 16 }
  0x3f   : > { %v602_v47 = vshrl.u32 %v299_v35, 16  ;;  %v599_v49 = vrot.slane %v597_v39, 5  ;;  %v459_v50 = vrot.slane %v457_v63, 4  ;;  %v462_v51 = vrot.slane %v460_v44, 5 }
  0x40   : > { %v431_v48 = vsel %vm849_vm2, %v426_v41, %v430_v1  ;;  %v500_v52 = vmax.bf16 %v492_v45, %v953_v32  ;;  %v595_v55 = vrot.slane %v594_v43, 4  ;;  %v468_v57 = vrot.slane %v466_v46, 5 }
  0x41   : > { %v447_v53 = vmax.bf16 %v431_v48, %v316_v7  ;;  %v477_v54 = vmax.bf16 %v454_v38, %v431_v48  ;;  %v463_v56 = vor.u32 %v462_v51, %v459_v50  ;;  %v604_v58 = vrot.slane %v602_v47, 4 }
  0x42   : > { %v605_v42 = vshll.u32 %v299_v35, 16  ;;  %v628_v59 = vmax.bf16 %v586_v4, %v500_v52  ;;  %v611_v2 = vshll.u32 %v300_v28, 16  ;;  %v600_v6 = vsel %vm849_vm2, %v595_v55, %v599_v49 }
  0x43   : > { %v485_v60 = vmax.bf16 %v477_v54, %v282_v40  ;;  %v455_v61 = vmax.bf16 %v447_v53, %v274_v27  ;;  %v464_v0 = vrot.slane %v463_v56, 4 }
  0x44   : > { %v607_v3 = vrot.slane %v605_v42, 5  ;;  %637 = vst.msk [vmem:[%s910_s9 + $0x14] sm:$0xf] %vm631_vm3, %v628_v59  ;;  %v613_v13 = vrot.slane %v611_v2, 5 }
  0x45   : > { %v493_v32 = vmax.bf16 %v485_v60, %v283_v62  ;;  %v469_v7 = vsel %vm849_vm2, %v464_v0, %v468_v57 }
  0x46   : > { %v608_v8 = vor.u32 %v607_v3, %v604_v58  ;;  %v478_v10 = vmax.bf16 %v469_v7, %v455_v61 }
  0x47   : > { %v501_v9 = vmax.bf16 %v493_v32, %v977_v5 }
  0x48   : > { %v609_v12 = vrot.slane %v608_v8, 4  ;;  %v486_v15 = vmax.bf16 %v478_v10, %v283_v62 }
  0x49   : > { %v629_v14 = vmax.bf16 %v600_v6, %v501_v9 }
  0x4a   : > { %v494_v16 = vmax.bf16 %v486_v15, %v284_v11  ;;  %v614_v17 = vsel %vm849_vm2, %v609_v12, %v613_v13 }
  0x4b   : > { %638 = vst.msk [vmem:[%s910_s9 + $0x18] sm:$0xf] %vm631_vm3, %v629_v14 }
  0x4c   : > { %v502_v19 = vmax.bf16 %v494_v16, %v299_v35 }
  0x4e   : > { %v630_v20 = vmax.bf16 %v614_v17, %v502_v19 }
  0x50   : > { %639 = vst.msk [vmem:[%s910_s9 + $0x1c] sm:$0xf] %vm631_vm3, %v630_v20 }
  0x51 PF: > { %s14_s15 = sadd.s32 1, %s765_s15  }
  0x52   : > { %p11_p4 = scmp.ge.s32.totalorder %s14_s15, 4  }
  0x54   :  { %13 = sbr.rel (!%p11_p4) target bundleno = 1 (0x1), region = 75 }

// kernel: opt_resnet_forward.29
= control target key start
LH: loop header
LB: loop body
LE: loop exit
PB: predicated region body
PF: predicated region fallthrough
CT: control target
= control target key end

     0   :  { %vm558_vm0 = vcmask 523264   ;;  %vm954_vm1 = vcmask 519168   ;;  %s1775_s1 = inlined_call_operand.vmem [shape: bf16[576,64], index: 1, kind: input, shape index: {}]   ;;  %s1776_s0 = inlined_call_operand.vmem [shape: bf16[128,576], index: 0, kind: input, shape index: {}]   ;;  %s1777_s2 = inlined_call_operand.vmem [shape: f32[1,64], index: 2, kind: input, shape index: {}]   ;;  %s1778_s3 = inlined_call_operand.vmem [shape: bf16[128,64], index: 3, kind: output, shape index: {}]  }
   0x1   :  { %v1264_v0 = vld [vmem:[%s1775_s1 + $0x78] sm:$0xff]   ;;  %v1268_v4 = vld [vmem:[%s1775_s1 + $0x70] sm:$0xff]   ;;  %v1272_v8 = vld [vmem:[%s1775_s1 + $0x68] sm:$0xff]  }
   0x2   :  { %v1265_v1 = vld [vmem:[%s1775_s1 + $0xf8] sm:$0xff]   ;;  %1092 = vmatprep.subr.bf16.mxu0 %v1264_v0  ;;  %v1269_v5 = vld [vmem:[%s1775_s1 + $0xf0] sm:$0xff]   ;;  %v1273_v9 = vld [vmem:[%s1775_s1 + $0xe8] sm:$0xff]  }
   0x3   :  { %v1266_v2 = vld [vmem:[%s1775_s1 + $0x38] sm:$0xff]   ;;  %1156 = vmatprep.subr.bf16.mxu1 %v1265_v1  ;;  %v1270_v6 = vld [vmem:[%s1775_s1 + $0x30] sm:$0xff]   ;;  %v1274_v10 = vld [vmem:[%s1775_s1 + $0x28] sm:$0xff]  }
   0x4   :  { %v1267_v3 = vld [vmem:[%s1775_s1 + $0xb8] sm:$0xff]   ;;  %1093 = vmatpush3.bf16.msra.mxu0 %v1266_v2  ;;  %v1271_v7 = vld [vmem:[%s1775_s1 + $0xb0] sm:$0xff]   ;;  %v1275_v11 = vld [vmem:[%s1775_s1 + $0xa8] sm:$0xff]  }
   0x5   :  { %1157 = vmatpush3.bf16.msra.mxu1 %v1267_v3  ;;  %1094 = vmatprep.subr.bf16.mxu0 %v1268_v4  ;;  %v1276_v12 = vld [vmem:[%s1775_s1 + $0x60] sm:$0xff]   ;;  %v1280_v16 = vld [vmem:[%s1775_s1 + $0x58] sm:$0xff]   ;;  %v1284_v20 = vld [vmem:[%s1775_s1 + $0x50] sm:$0xff]  }
   0x6   :  { %1158 = vmatprep.subr.bf16.mxu1 %v1269_v5  ;;  %v1277_v13 = vld [vmem:[%s1775_s1 + $0xe0] sm:$0xff]   ;;  %v1281_v17 = vld [vmem:[%s1775_s1 + $0xd8] sm:$0xff]   ;;  %v1285_v21 = vld [vmem:[%s1775_s1 + $0xd0] sm:$0xff]  }
   0x7   :  { %v1278_v14 = vld [vmem:[%s1775_s1 + $0x20] sm:$0xff]   ;;  %v1282_v18 = vld [vmem:[%s1775_s1 + $0x18] sm:$0xff]   ;;  %v1286_v22 = vld [vmem:[%s1775_s1 + $0x10] sm:$0xff]  }
   0x8   :  { %1095 = vmatpush3.bf16.msra.mxu0 %v1270_v6  ;;  %v1279_v15 = vld [vmem:[%s1775_s1 + $0xa0] sm:$0xff]   ;;  %v1283_v19 = vld [vmem:[%s1775_s1 + $0x98] sm:$0xff]   ;;  %v1287_v23 = vld [vmem:[%s1775_s1 + $0x90] sm:$0xff]  }
   0x9   :  { %1159 = vmatpush3.bf16.msra.mxu1 %v1271_v7  ;;  %1096 = vmatprep.subr.bf16.mxu0 %v1272_v8  ;;  %v1288_v24 = vld [vmem:[%s1775_s1 + $0x48] sm:$0xff]   ;;  %v1292_v28 = vld [vmem:[%s1775_s1 + $0x40] sm:$0xff]   ;;  %v1302_v36 = vld [vmem:[%s1775_s1 + $0x118] sm:$0xff]  }
   0xa   :  { %1160 = vmatprep.subr.bf16.mxu1 %v1273_v9  ;;  %v1289_v25 = vld [vmem:[%s1775_s1 + $0xc8] sm:$0xff]   ;;  %v1293_v29 = vld [vmem:[%s1775_s1 + $0xc0] sm:$0xff]   ;;  %v1315_v42 = vld [vmem:[%s1775_s1 + $0x110] sm:$0xff]  }
   0xb   :  { %v1290_v26 = vld [vmem:[%s1775_s1 + $0x8] sm:$0xff]   ;;  %v1294_v30 = vld [vmem:[%s1775_s1] sm:$0xff]   ;;  %v1311_v43 = vld [vmem:[%s1776_s0 + $0x5c] ss:$20 sps:$4 sm:$0xff]  }
   0xc   :  { %1097 = vmatpush3.bf16.msra.mxu0 %v1274_v10  ;;  %v1291_v27 = vld [vmem:[%s1775_s1 + $0x88] sm:$0xff]   ;;  %v1295_v31 = vld [vmem:[%s1775_s1 + $0x80] sm:$0xff]   ;;  %v1316_v47 = vld [vmem:[%s1776_s0 + $0x7c] ss:$20 sps:$4 sm:$0xff]  }
   0xd   :  { %1161 = vmatpush3.bf16.msra.mxu1 %v1275_v11  ;;  %1098 = vmatprep.subr.bf16.mxu0 %v1276_v12  ;;  %v1296_v32 = vld [vmem:[%s1776_s0] ss:$20 sps:$4 sm:$0xff]   ;;  %v1298_v33 = vld [vmem:[%s1776_s0 + $0x4] ss:$20 sps:$4 sm:$0xff]   ;;  %v1299_v34 = vld [vmem:[%s1776_s0 + $0x8] ss:$20 sps:$4 sm:$0xff]  }
   0xe   :  { %1162 = vmatprep.subr.bf16.mxu1 %v1277_v13  ;;  %v1301_v35 = vld [vmem:[%s1776_s0 + $0xc] ss:$20 sps:$4 sm:$0xff]   ;;  %615 = vmatprep.mubr.bf16.mxu0 %v1298_v33  ;;  %v1305_v38 = vld [vmem:[%s1776_s0 + $0x34] ss:$20 sps:$4 sm:$0xff]   ;;  %v1308_v40 = vld [vmem:[%s1776_s0 + $0x30] ss:$20 sps:$4 sm:$0xff]  }
   0xf   :  { %712 = vmatprep.mubr.bf16.mxu1 %v1301_v35  ;;  %v1303_v37 = vld [vmem:[%s1776_s0 + $0x2c] ss:$20 sps:$4 sm:$0xff]   ;;  %v1307_v39 = vld [vmem:[%s1776_s0 + $0x28] ss:$20 sps:$4 sm:$0xff]   ;;  %v1313_v44 = vld [vmem:[%s1776_s0 + $0x50] ss:$20 sps:$4 sm:$0xff]  }
  0x10   :  { %1099 = vmatpush3.bf16.msra.mxu0 %v1278_v14  ;;  %v1309_v41 = vld [vmem:[%s1776_s0 + $0x54] ss:$20 sps:$4 sm:$0xff]   ;;  %v1314_v45 = vld [vmem:[%s1776_s0 + $0x58] ss:$20 sps:$4 sm:$0xff]   ;;  %v1341_v49 = vld [vmem:[%s1775_s1 + $0x100] sm:$0xff]  }
  0x11   :  { %1163 = vmatpush3.bf16.msra.mxu1 %v1279_v15  ;;  %1100 = vmatprep.subr.bf16.mxu0 %v1280_v16  ;;  %v1328_v46 = vld [vmem:[%s1775_s1 + $0x108] sm:$0xff]   ;;  %v1318_v48 = vld [vmem:[%s1776_s0 + $0x84] ss:$20 sps:$4 sm:$0xff]   ;;  %v1321_v51 = vld [vmem:[%s1776_s0 + $0x80] ss:$20 sps:$4 sm:$0xff]  }
  0x12   :  { %1164 = vmatprep.subr.bf16.mxu1 %v1281_v17  ;;  %v1320_v50 = vld [vmem:[%s1776_s0 + $0x78] ss:$20 sps:$4 sm:$0xff]   ;;  %v1326_v54 = vld [vmem:[%s1776_s0 + $0xa0] ss:$20 sps:$4 sm:$0xff]   ;;  %v1327_v55 = vld [vmem:[%s1776_s0 + $0xa8] ss:$20 sps:$4 sm:$0xff]  }
  0x13   :  { %v1322_v52 = vld [vmem:[%s1776_s0 + $0xa4] ss:$20 sps:$4 sm:$0xff]   ;;  %v1324_v53 = vld [vmem:[%s1776_s0 + $0xac] ss:$20 sps:$4 sm:$0xff]   ;;  %v1331_v57 = vld [vmem:[%s1776_s0 + $0xd4] ss:$20 sps:$4 sm:$0xff]  }
  0x14   :  { %1101 = vmatpush3.bf16.msra.mxu0 %v1282_v18  ;;  %v1329_v56 = vld [vmem:[%s1776_s0 + $0xcc] ss:$20 sps:$4 sm:$0xff]   ;;  %v1333_v58 = vld [vmem:[%s1776_s0 + $0xc8] ss:$20 sps:$4 sm:$0xff]   ;;  %v1334_v59 = vld [vmem:[%s1776_s0 + $0xd0] ss:$20 sps:$4 sm:$0xff]  }
  0x15   :  { %1165 = vmatpush3.bf16.msra.mxu1 %v1283_v19  ;;  %1102 = vmatprep.subr.bf16.mxu0 %v1284_v20  ;;  %v1335_v60 = vld [vmem:[%s1776_s0 + $0xf4] ss:$20 sps:$4 sm:$0xff]   ;;  %v1337_v61 = vld [vmem:[%s1776_s0 + $0xfc] ss:$20 sps:$4 sm:$0xff]   ;;  %v1340_v63 = vld [vmem:[%s1776_s0 + $0xf8] ss:$20 sps:$4 sm:$0xff]  }
  0x16   :  { %1166 = vmatprep.subr.bf16.mxu1 %v1285_v21  ;;  %v1339_v62 = vld [vmem:[%s1776_s0 + $0xf0] ss:$20 sps:$4 sm:$0xff]   ;;  %v1346_v2 = vld [vmem:[%s1776_s0 + $0x118] ss:$20 sps:$4 sm:$0xff]   ;;  %v1347_v3 = vld [vmem:[%s1776_s0 + $0x120] ss:$20 sps:$4 sm:$0xff]  }
  0x17   :  { %v1342_v0 = vld [vmem:[%s1776_s0 + $0x11c] ss:$20 sps:$4 sm:$0xff]   ;;  %v1344_v1 = vld [vmem:[%s1776_s0 + $0x124] ss:$20 sps:$4 sm:$0xff]   ;;  %v1352_v8 = vld [vmem:[%s1776_s0 + $0x60] ss:$20 sps:$4 sm:$0xff]  }
  0x18   :  { %1103 = vmatpush3.bf16.msra.mxu0 %v1286_v22  ;;  %v1348_v4 = vld [vmem:[%s1776_s0 + $0x10] ss:$20 sps:$4 sm:$0xff]   ;;  %v1350_v6 = vld [vmem:[%s1776_s0 + $0x38] ss:$20 sps:$4 sm:$0xff]   ;;  %v1353_v9 = vld [vmem:[%s1776_s0 + $0x100] ss:$20 sps:$4 sm:$0xff]  }
  0x19   :  { %1167 = vmatpush3.bf16.msra.mxu1 %v1287_v23  ;;  %1104 = vmatprep.subr.bf16.mxu0 %v1288_v24  ;;  %v1349_v5 = vld [vmem:[%s1776_s0 + $0xb0] ss:$20 sps:$4 sm:$0xff]   ;;  %v1351_v7 = vld [vmem:[%s1776_s0 + $0xd8] ss:$20 sps:$4 sm:$0xff]   ;;  %v1354_v10 = vld [vmem:[%s1776_s0 + $0x88] ss:$20 sps:$4 sm:$0xff]  }
  0x1a   :  { %1168 = vmatprep.subr.bf16.mxu1 %v1289_v25  ;;  %v1355_v11 = vld [vmem:[%s1776_s0 + $0x128] ss:$20 sps:$4 sm:$0xff]  }
  0x1c   :  { %1105 = vmatpush3.bf16.msra.mxu0 %v1290_v26 }
  0x1d   :  { %1169 = vmatpush3.bf16.msra.mxu1 %v1291_v27  ;;  %1106 = vmatprep.subr.bf16.mxu0 %v1292_v28 }
  0x1e   :  { %1170 = vmatprep.subr.bf16.mxu1 %v1293_v29 }
  0x20   :  { %1107 = vmatpush3.bf16.msra.mxu0 %v1294_v30 }
  0x21   :  { %1171 = vmatpush3.bf16.msra.mxu1 %v1295_v31  ;;  %1232 = vmatprep.subr.bf16.mxu0 %v1302_v36 }
  0x22   :  { %1256 = vmatprep.subr.bf16.mxu1 %v1302_v36 }
  0x23   :  { %616 = vmatmul.mubr.bf16.vlgmr.msra.gmra.mxu0 %v1296_v32 }
  0x24   :  { %713 = vmatmul.mubr.bf16.vlgmr.msra.gmra.mxu1 %v1299_v34  ;;  %1233 = vmatpush3.bf16.msra.mxu0 %v1302_v36 }
  0x25   :  { %1260 = vmatpush3.bf16.msra.mxu1 %v1302_v36  ;;  %623 = vmatprep.mubr.bf16.mxu0 %v1303_v37 }
  0x26   :  { %720 = vmatprep.mubr.bf16.mxu1 %v1305_v38  ;;  %1234 = vmatprep.subr.bf16.mxu0 %v1315_v42 }
  0x27   :  { %1257 = vmatprep.subr.bf16.mxu1 %v1315_v42 }
  0x28   :  { %1235 = vmatpush3.bf16.msra.mxu0 %v1315_v42 }
  0x29   :  { %1261 = vmatpush3.bf16.msra.mxu1 %v1315_v42  ;;  %1236 = vmatprep.subr.bf16.mxu0 %v1328_v46 }
  0x2a   :  { %1258 = vmatprep.subr.bf16.mxu1 %v1328_v46 }
  0x2b   :  { %624 = vmatmul.mubr.bf16.gmra.mxu0 %v1307_v39 }
  0x2c   :  { %721 = vmatmul.mubr.bf16.gmra.mxu1 %v1308_v40  ;;  %631 = vmatprep.mubr.bf16.mxu0 %v1309_v41 }
  0x2d   :  { %728 = vmatprep.mubr.bf16.mxu1 %v1311_v43  ;;  %1237 = vmatpush3.bf16.msra.mxu0 %v1328_v46 }
  0x2e   :  { %1262 = vmatpush3.bf16.msra.mxu1 %v1328_v46  ;;  %1238 = vmatprep.subr.bf16.mxu0 %v1341_v49 }
  0x2f   :  { %1259 = vmatprep.subr.bf16.mxu1 %v1341_v49 }
  0x31   :  { %1239 = vmatpush3.bf16.msra.mxu0 %v1341_v49 }
  0x32   :  { %1263 = vmatpush3.bf16.msra.mxu1 %v1341_v49 }
  0x33   :  { %632 = vmatmul.mubr.bf16.gmra.mxu0 %v1313_v44 }
  0x34   :  { %729 = vmatmul.mubr.bf16.gmra.mxu1 %v1314_v45  ;;  %639 = vmatprep.mubr.bf16.mxu0 %v1316_v47 }
  0x35   :  { %736 = vmatprep.mubr.bf16.mxu1 %v1318_v48 }
  0x3b   :  { %640 = vmatmul.mubr.bf16.gmra.mxu0 %v1320_v50 }
  0x3c   :  { %737 = vmatmul.mubr.bf16.gmra.mxu1 %v1321_v51  ;;  %647 = vmatprep.mubr.bf16.mxu0 %v1322_v52 }
  0x3d   :  { %744 = vmatprep.mubr.bf16.mxu1 %v1324_v53 }
  0x43   :  { %648 = vmatmul.mubr.bf16.gmra.mxu0 %v1326_v54 }
  0x44   :  { %745 = vmatmul.mubr.bf16.gmra.mxu1 %v1327_v55  ;;  %655 = vmatprep.mubr.bf16.mxu0 %v1329_v56 }
  0x45   :  { %752 = vmatprep.mubr.bf16.mxu1 %v1331_v57 }
  0x4b   :  { %656 = vmatmul.mubr.bf16.gmra.mxu0 %v1333_v58 }
  0x4c   :  { %753 = vmatmul.mubr.bf16.gmra.mxu1 %v1334_v59  ;;  %663 = vmatprep.mubr.bf16.mxu0 %v1335_v60 }
  0x4d   :  { %760 = vmatprep.mubr.bf16.mxu1 %v1337_v61 }
  0x53   :  { %664 = vmatmul.mubr.bf16.gmra.mxu0 %v1339_v62 }
  0x54   :  { %761 = vmatmul.mubr.bf16.gmra.mxu1 %v1340_v63  ;;  %671 = vmatprep.mubr.bf16.mxu0 %v1342_v0 }
  0x55   :  { %768 = vmatprep.mubr.bf16.mxu1 %v1344_v1 }
  0x5b   :  { %672 = vmatmul.mubr.bf16.gmra.mxu0 %v1346_v2 }
  0x5c   :  { %769 = vmatmul.mubr.bf16.gmra.mxu1 %v1347_v3  ;;  %1240 = vmatprep.mubr.msk.bf16.mxu0 %vm558_vm0, %v1348_v4  ;;  %v1649_v3 = vld [vmem:[%s1777_s2] ss:$0 sm:$0xff] }
  0x5d   :  { %1248 = vmatprep.mubr.msk.bf16.mxu1 %vm558_vm0, %v1349_v5 }
  0x63   :  { %1241 = vmatmul.mubr.msk.bf16.vlgmr.msra.gmra.mxu0 %vm558_vm0, %v1350_v6 }
  0x64   :  { %1249 = vmatmul.mubr.msk.bf16.vlgmr.msra.gmra.mxu1 %vm558_vm0, %v1351_v7  ;;  %1244 = vmatprep.mubr.msk.bf16.mxu0 %vm558_vm0, %v1352_v8 }
  0x65   :  { %1252 = vmatprep.mubr.msk.bf16.mxu1 %vm558_vm0, %v1353_v9 }
  0x6b   :  { %1245 = vmatmul.mubr.msk.bf16.gmra.mxu0 %vm558_vm0, %v1354_v10 }
  0x6c   :  { %1253 = vmatmul.mubr.msk.bf16.gmra.mxu1 %vm558_vm0, %v1355_v11 }
  0xe3   :  { %v1108_v12 = vpop.f32.mrf.mxu0 }
  0xe4   :  { %v1172_v13 = vpop.f32.mrf.mxu1 }
  0xe5   :  { %v1109_v14 = vpop.f32.mrf.mxu0 }
  0xe6   :  { %v1173_v15 = vpop.f32.mrf.mxu1  ;;  %v1110_v63 = vadd.f32 %v1109_v14, %v1108_v12 }
  0xe7   :  { %v1111_v16 = vpop.f32.mrf.mxu0  ;;  %v1174_v10 = vadd.f32 %v1173_v15, %v1172_v13 }
  0xe8   :  { %v1175_v17 = vpop.f32.mrf.mxu1  ;;  %v618_v9 = vadd.f32 %v1110_v63, %v1649_v3 }
  0xe9   :  { %v1112_v18 = vpop.f32.mrf.mxu0 }
  0xea   :  { %v1176_v19 = vpop.f32.mrf.mxu1  ;;  %v1113_v0 = vadd.f32 %v1112_v18, %v1111_v16 }
  0xeb   :  { %v1114_v20 = vpop.f32.mrf.mxu0  ;;  %v1177_v16 = vadd.f32 %v1176_v19, %v1175_v17  ;;  %v715_v19 = vadd.f32 %v1174_v10, %v618_v9 }
  0xec   :  { %v1612_v21 = vpop.f32.mrf.mxu1  ;;  %v621_v11 = vadd.f32 %v1113_v0, %v1649_v3 }
  0xed   :  { %v1115_v22 = vpop.f32.mrf.mxu0 }
  0xee   :  { %v1179_v23 = vpop.f32.mrf.mxu1  ;;  %v1116_v1 = vadd.f32 %v1115_v22, %v1114_v20 }
  0xef   :  { %v1117_v24 = vpop.f32.mrf.mxu0 }
  0xf0   :  { %v1614_v25 = vpop.f32.mrf.mxu1  ;;  %v626_v12 = vadd.f32 %v1116_v1, %v1649_v3 }
  0xf1   :  { %v1118_v26 = vpop.f32.mrf.mxu0 }
  0xf2   :  { %v1182_v27 = vpop.f32.mrf.mxu1  ;;  %v1119_v4 = vadd.f32 %v1118_v26, %v1117_v24  ;;  %v1180_v26 = vadd.f32 %v1179_v23, %v1612_v21 }
  0xf3   :  { %v1120_v28 = vpop.f32.mrf.mxu0  ;;  %v1183_v13 = vadd.f32 %v1182_v27, %v1614_v25 }
  0xf4   :  { %v1184_v29 = vpop.f32.mrf.mxu1  ;;  %v629_v18 = vadd.f32 %v1119_v4, %v1649_v3  ;;  %v723_v17 = vadd.f32 %v1180_v26, %v626_v12  ;;  %v718_v4 = vadd.f32 %v1177_v16, %v621_v11 }
  0xf5   :  { %v1121_v30 = vpop.f32.mrf.mxu0 }
  0xf6   :  { %v1185_v31 = vpop.f32.mrf.mxu1  ;;  %v1122_v5 = vadd.f32 %v1121_v30, %v1120_v28  ;;  %v726_v23 = vadd.f32 %v1183_v13, %v629_v18 }
  0xf7   :  { %v1616_v32 = vpop.f32.mrf.mxu0  ;;  %v1186_v15 = vadd.f32 %v1185_v31, %v1184_v29 }
  0xf8   :  { %v1618_v33 = vpop.f32.mrf.mxu1  ;;  %v634_v20 = vadd.f32 %v1122_v5, %v1649_v3 }
  0xf9   :  { %v1620_v34 = vpop.f32.mrf.mxu0 }
  0xfa   :  { %v1622_v35 = vpop.f32.mrf.mxu1 }
  0xfb   :  { %v1126_v36 = vpop.f32.mrf.mxu0  ;;  %v1673_v25 = vadd.f32 %v1622_v35, %v1618_v33 }
  0xfc   :  { %v1624_v37 = vpop.f32.mrf.mxu1 }
  0xfd   :  { %v1127_v38 = vpop.f32.mrf.mxu0 }
  0xfe   :  { %v1626_v39 = vpop.f32.mrf.mxu1  ;;  %v1128_v28 = vadd.f32 %v1127_v38, %v1126_v36  ;;  %v1669_v36 = vadd.f32 %v1186_v15, %v634_v20 }
  0xff   :  { %v1129_v40 = vpop.f32.mrf.mxu0 }
 0x100   :  { %v1628_v41 = vpop.f32.mrf.mxu1  ;;  %v642_v27 = vadd.f32 %v1128_v28, %v1649_v3 }
 0x101   :  { %v1130_v42 = vpop.f32.mrf.mxu0 }
 0x102   :  { %v1630_v43 = vpop.f32.mrf.mxu1  ;;  %v1131_v30 = vadd.f32 %v1130_v42, %v1129_v40 }
 0x103   :  { %v1132_v44 = vpop.f32.mrf.mxu0  ;;  %v1195_v33 = vadd.f32 %v1630_v43, %v1628_v41 }
 0x104   :  { %v1632_v45 = vpop.f32.mrf.mxu1  ;;  %v645_v29 = vadd.f32 %v1131_v30, %v1649_v3 }
 0x105   :  { %v1133_v46 = vpop.f32.mrf.mxu0 }
 0x106   :  { %v1634_v47 = vpop.f32.mrf.mxu1  ;;  %v1694_v41 = vadd.f32 %v1195_v33, %v645_v29 }
 0x107   :  { %v1135_v48 = vpop.f32.mrf.mxu0  ;;  %v1198_v35 = vadd.f32 %v1634_v47, %v1632_v45 }
 0x108   :  { %v1636_v49 = vpop.f32.mrf.mxu1 }
 0x109   :  { %v1136_v50 = vpop.f32.mrf.mxu0 }
 0x10a   :  { %v1638_v51 = vpop.f32.mrf.mxu1  ;;  %v1137_v0 = vadd.f32 %v1136_v50, %v1135_v48 }
 0x10b   :  { %v1138_v52 = vpop.f32.mrf.mxu0 }
 0x10c   :  { %v1202_v53 = vpop.f32.mrf.mxu1 }
 0x10d   :  { %v1139_v54 = vpop.f32.mrf.mxu0 }
 0x10e   :  { %v1203_v55 = vpop.f32.mrf.mxu1  ;;  %v1140_v22 = vadd.f32 %v1139_v54, %v1138_v52  ;;  %v1125_v52 = vadd.f32 %v1620_v34, %v1616_v32  ;;  %v653_v32 = vadd.f32 %v1137_v0, %v1649_v3 }
 0x10f   :  { %v1141_v56 = vpop.f32.mrf.mxu0  ;;  %v1204_v34 = vadd.f32 %v1203_v55, %v1202_v53  ;;  %v1201_v53 = vadd.f32 %v1638_v51, %v1636_v49 }
 0x110   :  { %v1640_v57 = vpop.f32.mrf.mxu1  ;;  %v658_v54 = vadd.f32 %v1140_v22, %v1649_v3 }
 0x111   :  { %v1142_v58 = vpop.f32.mrf.mxu0 }
 0x112   :  { %v1206_v59 = vpop.f32.mrf.mxu1  ;;  %v1143_v1 = vadd.f32 %v1142_v58, %v1141_v56  ;;  %v1689_v56 = vadd.f32 %v1125_v52, %v1649_v3 }
 0x113   :  { %v1144_v60 = vpop.f32.mrf.mxu0  ;;  %v1207_v55 = vadd.f32 %v1206_v59, %v1640_v57 }
 0x114   :  { %v1642_v61 = vpop.f32.mrf.mxu1  ;;  %v661_v40 = vadd.f32 %v1143_v1, %v1649_v3 }
 0x115   :  { %v1145_v62 = vpop.f32.mrf.mxu0 }
 0x116   :  { %v1644_v2 = vpop.f32.mrf.mxu1  ;;  %v1146_v42 = vadd.f32 %v1145_v62, %v1144_v60  ;;  %v755_v60 = vadd.f32 %v1204_v34, %v658_v54 }
 0x117   :  { %v1651_v6 = vpop.f32.mrf.mxu0  ;;  %v1210_v9 = vadd.f32 %v1644_v2, %v1642_v61 }
 0x118   :  { %v1653_v7 = vpop.f32.mrf.mxu1  ;;  %v666_v43 = vadd.f32 %v1146_v42, %v1649_v3 }
 0x119   :  { %1779 = vst [vmem:[#allocation2_spill] sm:$0xff] %v1653_v7  ;;  %v1655_v8 = vpop.f32.mrf.mxu0  ;;  %v1134_v7 = vadd.f32 %v1133_v46, %v1132_v44  ;;  %v1192_v46 = vadd.f32 %v1626_v39, %v1624_v37 }
 0x11a   :  { %1780 = vst [vmem:[#allocation3_spill] sm:$0xff] %v1655_v8  ;;  %v1660_v14 = vpop.f32.mrf.mxu1  ;;  %v763_v0 = vadd.f32 %v1210_v9, %v666_v43 }
 0x11b   :  { %1781 = vst [vmem:[#allocation4_spill] sm:$0xff] %v1660_v14  ;;  %v1150_v24 = vpop.f32.mrf.mxu0  ;;  %v650_v31 = vadd.f32 %v1134_v7, %v1649_v3  ;;  %v739_v5 = vadd.f32 %v1192_v46, %v642_v27  ;;  %v758_v7 = vadd.f32 %v1207_v55, %v661_v40 }
 0x11c   :  { %v1214_v63 = vpop.f32.mrf.mxu1 }
 0x11d   :  { %v1151_v8 = vpop.f32.mrf.mxu0  ;;  %v747_v39 = vadd.f32 %v1198_v35, %v650_v31 }
 0x11e   :  { %v1215_v14 = vpop.f32.mrf.mxu1  ;;  %v1152_v48 = vadd.f32 %v1151_v8, %v1150_v24  ;;  %v750_v8 = vadd.f32 %v1201_v53, %v653_v32 }
 0x11f   :  { %v1153_v21 = vpop.f32.mrf.mxu0  ;;  %v1216_v22 = vadd.f32 %v1215_v14, %v1214_v63 }
 0x120   :  { %v1678_v38 = vpop.f32.mrf.mxu1  ;;  %v674_v49 = vadd.f32 %v1152_v48, %v1649_v3  ;;  %v1783_v46 = vld [vmem:[#allocation2_spill] sm:$0xff] }
 0x121   :  { %v1154_v44 = vpop.f32.mrf.mxu0  ;;  %v1782_v10 = vld [vmem:[#allocation3_spill] sm:$0xff] }
 0x122   :  { %v1218_v50 = vpop.f32.mrf.mxu1  ;;  %v1149_v11 = vadd.f32 %v1782_v10, %v1651_v6  ;;  %v1155_v12 = vadd.f32 %v1154_v44, %v1153_v21  ;;  %v771_v52 = vadd.f32 %v1216_v22, %v674_v49  ;;  %v1784_v33 = vld [vmem:[#allocation4_spill] sm:$0xff] }
 0x123   :  { %v1242_v58 = vpop.f32.mrf.mxu0  ;;  %v1219_v34 = vadd.f32 %v1218_v50, %v1678_v38  ;;  %v1213_v35 = vadd.f32 %v1784_v33, %v1783_v46 }
 0x124   :  { %v820_v62 = vadd.f32 %v1242_v58, %v723_v17  ;;  %v1250_v37 = vpop.f32.mrf.mxu1  ;;  %v677_v14 = vadd.f32 %v1155_v12, %v1649_v3  ;;  %v669_v27 = vadd.f32 %v1149_v11, %v1649_v3 }
 0x125   :  { %v852_v45 = vadd.f32 %v1250_v37, %v755_v60  ;;  %v811_v47 = vpop.f32.mrf.mxu0 }
 0x126   :  { %v876_v51 = vmax.f32 %v820_v62, 0.0  ;;  %v812_v57 = vadd.f32 %v811_v47, %v715_v19  ;;  %v843_v59 = vpop.f32.mrf.mxu1  ;;  %v774_v37 = vadd.f32 %v1219_v34, %v677_v14  ;;  %v766_v49 = vadd.f32 %v1213_v35, %v669_v27 }
 0x127   :  { %v884_v16 = vmax.f32 %v852_v45, 0.0  ;;  %v844_v18 = vadd.f32 %v843_v59, %v747_v39  ;;  %v1243_v20 = vpop.f32.mrf.mxu0  ;;  %v734_v45 = vadd.f32 %v1673_v25, %v1689_v56 }
 0x128   :  { %v1078_v24 = vpack.c.bf16 %v876_v51, %v876_v51  ;;  %v874_v26 = vmax.f32 %v812_v57, 0.0  ;;  %v823_v28 = vadd.f32 %v1243_v20, %v726_v23  ;;  %v1251_v30 = vpop.f32.mrf.mxu1 }
 0x129   :  { %v1086_v13 = vpack.c.bf16 %v884_v16, %v884_v16  ;;  %v882_v15 = vmax.f32 %v844_v18, 0.0  ;;  %v855_v61 = vadd.f32 %v1251_v30, %v758_v7  ;;  %v814_v2 = vpop.f32.mrf.mxu0 }
 0x12a   :  { %957 = vst.msk [vmem:[%s1778_s3 + $0x8] sm:$0xf] %vm954_vm1, %v1078_v24  ;;  %v1076_v6 = vpack.c.bf16 %v874_v26, %v874_v26  ;;  %v877_v1 = vmax.f32 %v823_v28, 0.0  ;;  %v815_v17 = vadd.f32 %v814_v2, %v718_v4  ;;  %v846_v19 = vpop.f32.mrf.mxu1 }
 0x12b   :  { %965 = vst.msk [vmem:[%s1778_s3 + $0x28] sm:$0xf] %vm954_vm1, %v1086_v13  ;;  %v1084_v63 = vpack.c.bf16 %v882_v15, %v882_v15  ;;  %v885_v54 = vmax.f32 %v855_v61, 0.0  ;;  %v847_v21 = vadd.f32 %v846_v19, %v750_v8  ;;  %v1246_v23 = vpop.f32.mrf.mxu0 }
 0x12c   :  { %955 = vst.msk [vmem:[%s1778_s3] sm:$0xf] %vm954_vm1, %v1076_v6  ;;  %v1079_v4 = vpack.c.bf16 %v877_v1, %v877_v1  ;;  %v875_v29 = vmax.f32 %v815_v17, 0.0  ;;  %v836_v31 = vadd.f32 %v1246_v23, %v739_v5  ;;  %v1254_v32 = vpop.f32.mrf.mxu1 }
 0x12d   :  { %963 = vst.msk [vmem:[%s1778_s3 + $0x20] sm:$0xf] %vm954_vm1, %v1084_v63  ;;  %v1087_v40 = vpack.c.bf16 %v885_v54, %v885_v54  ;;  %v883_v42 = vmax.f32 %v847_v21, 0.0  ;;  %v868_v44 = vadd.f32 %v1254_v32, %v771_v52  ;;  %v827_v3 = vpop.f32.mrf.mxu0 }
 0x12e   :  { %958 = vst.msk [vmem:[%s1778_s3 + $0xc] sm:$0xf] %vm954_vm1, %v1079_v4  ;;  %v1077_v48 = vpack.c.bf16 %v875_v29, %v875_v29  ;;  %v880_v53 = vmax.f32 %v836_v31, 0.0  ;;  %v828_v38 = vadd.f32 %v827_v3, %v1669_v36  ;;  %v859_v50 = vpop.f32.mrf.mxu1 }
 0x12f   :  { %966 = vst.msk [vmem:[%s1778_s3 + $0x2c] sm:$0xf] %vm954_vm1, %v1087_v40  ;;  %v1085_v55 = vpack.c.bf16 %v883_v42, %v883_v42  ;;  %v888_v58 = vmax.f32 %v868_v44, 0.0  ;;  %v860_v60 = vadd.f32 %v859_v50, %v763_v0  ;;  %v1247_v62 = vpop.f32.mrf.mxu0 }
 0x130   :  { %956 = vst.msk [vmem:[%s1778_s3 + $0x4] sm:$0xf] %vm954_vm1, %v1077_v48  ;;  %v1082_v39 = vpack.c.bf16 %v880_v53, %v880_v53  ;;  %v878_v5 = vmax.f32 %v828_v38, 0.0  ;;  %v839_v36 = vadd.f32 %v1247_v62, %v1694_v41  ;;  %v1255_v43 = vpop.f32.mrf.mxu1 }
 0x131   :  { %964 = vst.msk [vmem:[%s1778_s3 + $0x24] sm:$0xf] %vm954_vm1, %v1085_v55  ;;  %v1090_v47 = vpack.c.bf16 %v888_v58, %v888_v58  ;;  %v886_v7 = vmax.f32 %v860_v60, 0.0  ;;  %v871_v8 = vadd.f32 %v1255_v43, %v774_v37  ;;  %v830_v9 = vpop.f32.mrf.mxu0 }
 0x132   :  { %961 = vst.msk [vmem:[%s1778_s3 + $0x18] sm:$0xf] %vm954_vm1, %v1082_v39  ;;  %v1080_v41 = vpack.c.bf16 %v878_v5, %v878_v5  ;;  %v881_v51 = vmax.f32 %v839_v36, 0.0  ;;  %v831_v57 = vadd.f32 %v830_v9, %v734_v45  ;;  %v862_v59 = vpop.f32.mrf.mxu1 }
 0x133   :  { %969 = vst.msk [vmem:[%s1778_s3 + $0x38] sm:$0xf] %vm954_vm1, %v1090_v47  ;;  %v1088_v25 = vpack.c.bf16 %v886_v7, %v886_v7  ;;  %v889_v56 = vmax.f32 %v871_v8, 0.0  ;;  %v863_v10 = vadd.f32 %v862_v59, %v766_v49 }
 0x134   :  { %959 = vst.msk [vmem:[%s1778_s3 + $0x10] sm:$0xf] %vm954_vm1, %v1080_v41  ;;  %v1083_v11 = vpack.c.bf16 %v881_v51, %v881_v51  ;;  %v879_v12 = vmax.f32 %v831_v57, 0.0 }
 0x135   :  { %967 = vst.msk [vmem:[%s1778_s3 + $0x30] sm:$0xf] %vm954_vm1, %v1088_v25  ;;  %v1091_v16 = vpack.c.bf16 %v889_v56, %v889_v56  ;;  %v887_v18 = vmax.f32 %v863_v10, 0.0 }
 0x136   :  { %962 = vst.msk [vmem:[%s1778_s3 + $0x1c] sm:$0xf] %vm954_vm1, %v1083_v11  ;;  %v1081_v20 = vpack.c.bf16 %v879_v12, %v879_v12 }
 0x137   :  { %970 = vst.msk [vmem:[%s1778_s3 + $0x3c] sm:$0xf] %vm954_vm1, %v1091_v16  ;;  %v1089_v22 = vpack.c.bf16 %v887_v18, %v887_v18 }
 0x138   :  { %960 = vst.msk [vmem:[%s1778_s3 + $0x14] sm:$0xf] %vm954_vm1, %v1081_v20 }
 0x139   :  { %968 = vst.msk [vmem:[%s1778_s3 + $0x34] sm:$0xf] %vm954_vm1, %v1089_v22 }

// kernel: opt_resnet_forward.27
= control target key start
LH: loop header
LB: loop body
LE: loop exit
PB: predicated region body
PF: predicated region fallthrough
CT: control target
= control target key end

     0   :  { %v470_v1 = vmov 0   ;;  %vm131_vm0 = vcmask 523264   ;;  %v41_v17 = vlaneseq  ;;  %s634_s1 = inlined_call_operand.vmem [shape: bf16[64,256], index: 1, kind: input, shape index: {}]   ;;  %s635_s0 = inlined_call_operand.vmem [shape: bf16[128,64], index: 0, kind: input, shape index: {}]   ;;  %s636_s2 = inlined_call_operand.vmem [shape: f32[1,256], index: 2, kind: input, shape index: {}]   ;;  %s637_s3 = inlined_call_operand.vmem [shape: bf16[128,256], index: 3, kind: output, shape index: {}]  }
   0x1   :  { %v450_v0 = vld [vmem:[%s634_s1 + $0x34] ss:$8 sps:$4 sm:$0xff]   ;;  %188 = vmatprep.mubr.bf16.mxu0 %v470_v1  ;;  %228 = vmatprep.mubr.bf16.mxu1 %v470_v1  ;;  %v452_v2 = vld [vmem:[%s634_s1 + $0x30] ss:$8 sps:$4 sm:$0xff]   ;;  %v453_v3 = vld [vmem:[%s634_s1 + $0x24] ss:$8 sps:$4 sm:$0xff]  }
   0x2   :  { %164 = vmatprep.subr.bf16.mxu0 %v450_v0  ;;  %441 = vmatprep.subr.bf16.mxu1 %v450_v0  ;;  %v455_v4 = vld [vmem:[%s634_s1 + $0x20] ss:$8 sps:$4 sm:$0xff]   ;;  %v456_v5 = vld [vmem:[%s634_s1 + $0x14] ss:$8 sps:$4 sm:$0xff]   ;;  %v458_v6 = vld [vmem:[%s634_s1 + $0x10] ss:$8 sps:$4 sm:$0xff]  }
   0x3   :  { %165 = vmatpush1.bf16.msra.mxu0 %v452_v2  ;;  %445 = vmatpush1.bf16.msra.mxu1 %v452_v2  ;;  %v459_v7 = vld [vmem:[%s634_s1 + $0x4] ss:$8 sps:$4 sm:$0xff]   ;;  %v461_v8 = vld [vmem:[%s634_s1] ss:$8 sps:$4 sm:$0xff]   ;;  %v466_v13 = vld [vmem:[%s635_s0 + $0x10] sm:$0xff]   ;;  %v42_v18 = vshrl.u32 %v41_v17, 7 }
   0x4   :  { %166 = vmatprep.subr.bf16.mxu0 %v453_v3  ;;  %442 = vmatprep.subr.bf16.mxu1 %v453_v3  ;;  %v462_v9 = vld [vmem:[%s635_s0] sm:$0xff]   ;;  %v464_v11 = vld [vmem:[%s635_s0 + $0x8] sm:$0xff]   ;;  %v467_v14 = vld [vmem:[%s635_s0 + $0x30] sm:$0xff]  }
   0x5   :  { %v463_v10 = vld [vmem:[%s635_s0 + $0x20] sm:$0xff]   ;;  %v465_v12 = vld [vmem:[%s635_s0 + $0x28] sm:$0xff]   ;;  %v468_v15 = vld [vmem:[%s635_s0 + $0x18] sm:$0xff]   ;;  %v43_v19 = vsub.s32 0, %v42_v18  ;;  %v47_v20 = vsub.s32 1, %v42_v18 }
   0x6   :  { %v469_v16 = vld [vmem:[%s635_s0 + $0x38] sm:$0xff]   ;;  %v39_v21 = vld [vmem:[%s636_s2] sm:$0x3] }
   0x7   :  { %167 = vmatpush1.bf16.msra.mxu0 %v455_v4  ;;  %446 = vmatpush1.bf16.msra.mxu1 %v455_v4  ;;  %v550_v22 = vrot.slane %v39_v21, %v43_v19  ;;  %v552_v23 = vrot.slane %v39_v21, %v47_v20 }
   0x8   :  { %168 = vmatprep.subr.bf16.mxu0 %v456_v5  ;;  %443 = vmatprep.subr.bf16.mxu1 %v456_v5 }
   0xb   :  { %169 = vmatpush1.bf16.msra.mxu0 %v458_v6  ;;  %447 = vmatpush1.bf16.msra.mxu1 %v458_v6 }
   0xc   :  { %170 = vmatprep.subr.bf16.mxu0 %v459_v7  ;;  %444 = vmatprep.subr.bf16.mxu1 %v459_v7 }
   0xf   :  { %171 = vmatpush1.bf16.msra.mxu0 %v461_v8  ;;  %448 = vmatpush1.bf16.msra.mxu1 %v461_v8 }
  0x12   :  { %401 = vmatmul.mubr.msk.bf16.vlgmr.msra.gmra.mxu0 %vm131_vm0, %v462_v9  ;;  %405 = vmatmul.mubr.msk.bf16.vlgmr.msra.gmra.mxu1 %vm131_vm0, %v463_v10 }
  0x13   :  { %198 = vmatprep.mubr.bf16.mxu0 %v470_v1  ;;  %238 = vmatprep.mubr.bf16.mxu1 %v470_v1 }
  0x1a   :  { %402 = vmatmul.mubr.msk.bf16.gmra.mxu0 %vm131_vm0, %v464_v11  ;;  %406 = vmatmul.mubr.msk.bf16.gmra.mxu1 %vm131_vm0, %v465_v12 }
  0x1b   :  { %208 = vmatprep.mubr.bf16.mxu0 %v470_v1  ;;  %248 = vmatprep.mubr.bf16.mxu1 %v470_v1 }
  0x22   :  { %403 = vmatmul.mubr.msk.bf16.gmra.mxu0 %vm131_vm0, %v466_v13  ;;  %407 = vmatmul.mubr.msk.bf16.gmra.mxu1 %vm131_vm0, %v467_v14 }
  0x23   :  { %218 = vmatprep.mubr.bf16.mxu0 %v470_v1  ;;  %258 = vmatprep.mubr.bf16.mxu1 %v470_v1 }
  0x2a   :  { %404 = vmatmul.mubr.msk.bf16.gmra.mxu0 %vm131_vm0, %v468_v15  ;;  %408 = vmatmul.mubr.msk.bf16.gmra.mxu1 %vm131_vm0, %v469_v16 }
  0xd2   :  { %v190_v24 = vpop.f32.mrf.mxu0  ;;  %v230_v25 = vpop.f32.mrf.mxu1 }
  0xd3   :  { %v191_v28 = vadd.f32 %v190_v24, %v550_v22  ;;  %v231_v29 = vadd.f32 %v230_v25, %v550_v22 }
  0xd4   :  { %v192_v26 = vpop.f32.mrf.mxu0  ;;  %v232_v27 = vpop.f32.mrf.mxu1 }
  0xd5   :  { %v193_v30 = vadd.f32 %v192_v26, %v552_v23  ;;  %v233_v31 = vadd.f32 %v232_v27, %v552_v23 }
  0xd6   :  { %v194_v32 = vpop.f32.mrf.mxu0  ;;  %v234_v33 = vpop.f32.mrf.mxu1 }
  0xd7   :  { %v425_v34 = vpack.c.bf16 %v193_v30, %v191_v28  ;;  %v433_v35 = vpack.c.bf16 %v233_v31, %v231_v29  ;;  %v195_v38 = vadd.f32 %v194_v32, %v550_v22  ;;  %v235_v39 = vadd.f32 %v234_v33, %v550_v22 }
  0xd8   :  { %v196_v36 = vpop.f32.mrf.mxu0  ;;  %v236_v37 = vpop.f32.mrf.mxu1 }
  0xd9   :  { %365 = vst [vmem:[%s637_s3] sm:$0xff] %v425_v34  ;;  %373 = vst [vmem:[%s637_s3 + $0x40] sm:$0xff] %v433_v35  ;;  %v197_v40 = vadd.f32 %v196_v36, %v552_v23  ;;  %v237_v41 = vadd.f32 %v236_v37, %v552_v23 }
  0xda   :  { %v200_v42 = vpop.f32.mrf.mxu0  ;;  %v240_v43 = vpop.f32.mrf.mxu1 }
  0xdb   :  { %v426_v44 = vpack.c.bf16 %v197_v40, %v195_v38  ;;  %v434_v45 = vpack.c.bf16 %v237_v41, %v235_v39  ;;  %v201_v48 = vadd.f32 %v200_v42, %v550_v22  ;;  %v241_v49 = vadd.f32 %v240_v43, %v550_v22 }
  0xdc   :  { %v202_v46 = vpop.f32.mrf.mxu0  ;;  %v242_v47 = vpop.f32.mrf.mxu1 }
  0xdd   :  { %366 = vst [vmem:[%s637_s3 + $0x8] sm:$0xff] %v426_v44  ;;  %374 = vst [vmem:[%s637_s3 + $0x48] sm:$0xff] %v434_v45  ;;  %v203_v50 = vadd.f32 %v202_v46, %v552_v23  ;;  %v243_v51 = vadd.f32 %v242_v47, %v552_v23 }
  0xde   :  { %v204_v52 = vpop.f32.mrf.mxu0  ;;  %v244_v53 = vpop.f32.mrf.mxu1 }
  0xdf   :  { %v427_v54 = vpack.c.bf16 %v203_v50, %v201_v48  ;;  %v435_v55 = vpack.c.bf16 %v243_v51, %v241_v49  ;;  %v205_v58 = vadd.f32 %v204_v52, %v550_v22  ;;  %v245_v59 = vadd.f32 %v244_v53, %v550_v22 }
  0xe0   :  { %v206_v56 = vpop.f32.mrf.mxu0  ;;  %v246_v57 = vpop.f32.mrf.mxu1 }
  0xe1   :  { %367 = vst [vmem:[%s637_s3 + $0x10] sm:$0xff] %v427_v54  ;;  %375 = vst [vmem:[%s637_s3 + $0x50] sm:$0xff] %v435_v55  ;;  %v207_v60 = vadd.f32 %v206_v56, %v552_v23  ;;  %v247_v61 = vadd.f32 %v246_v57, %v552_v23 }
  0xe2   :  { %v210_v62 = vpop.f32.mrf.mxu0  ;;  %v250_v63 = vpop.f32.mrf.mxu1 }
  0xe3   :  { %v428_v0 = vpack.c.bf16 %v207_v60, %v205_v58  ;;  %v436_v1 = vpack.c.bf16 %v247_v61, %v245_v59  ;;  %v211_v4 = vadd.f32 %v210_v62, %v550_v22  ;;  %v251_v5 = vadd.f32 %v250_v63, %v550_v22 }
  0xe4   :  { %v212_v2 = vpop.f32.mrf.mxu0  ;;  %v252_v3 = vpop.f32.mrf.mxu1 }
  0xe5   :  { %368 = vst [vmem:[%s637_s3 + $0x18] sm:$0xff] %v428_v0  ;;  %376 = vst [vmem:[%s637_s3 + $0x58] sm:$0xff] %v436_v1  ;;  %v213_v6 = vadd.f32 %v212_v2, %v552_v23  ;;  %v253_v7 = vadd.f32 %v252_v3, %v552_v23 }
  0xe6   :  { %v214_v8 = vpop.f32.mrf.mxu0  ;;  %v254_v9 = vpop.f32.mrf.mxu1 }
  0xe7   :  { %v429_v10 = vpack.c.bf16 %v213_v6, %v211_v4  ;;  %v437_v11 = vpack.c.bf16 %v253_v7, %v251_v5  ;;  %v215_v14 = vadd.f32 %v214_v8, %v550_v22  ;;  %v255_v15 = vadd.f32 %v254_v9, %v550_v22 }
  0xe8   :  { %v216_v12 = vpop.f32.mrf.mxu0  ;;  %v256_v13 = vpop.f32.mrf.mxu1 }
  0xe9   :  { %369 = vst [vmem:[%s637_s3 + $0x20] sm:$0xff] %v429_v10  ;;  %377 = vst [vmem:[%s637_s3 + $0x60] sm:$0xff] %v437_v11  ;;  %v217_v16 = vadd.f32 %v216_v12, %v552_v23  ;;  %v257_v17 = vadd.f32 %v256_v13, %v552_v23 }
  0xea   :  { %v220_v18 = vpop.f32.mrf.mxu0  ;;  %v260_v19 = vpop.f32.mrf.mxu1 }
  0xeb   :  { %v430_v20 = vpack.c.bf16 %v217_v16, %v215_v14  ;;  %v438_v21 = vpack.c.bf16 %v257_v17, %v255_v15  ;;  %v221_v26 = vadd.f32 %v220_v18, %v550_v22  ;;  %v261_v27 = vadd.f32 %v260_v19, %v550_v22 }
  0xec   :  { %v222_v24 = vpop.f32.mrf.mxu0  ;;  %v262_v25 = vpop.f32.mrf.mxu1 }
  0xed   :  { %370 = vst [vmem:[%s637_s3 + $0x28] sm:$0xff] %v430_v20  ;;  %378 = vst [vmem:[%s637_s3 + $0x68] sm:$0xff] %v438_v21  ;;  %v223_v28 = vadd.f32 %v222_v24, %v552_v23  ;;  %v263_v29 = vadd.f32 %v262_v25, %v552_v23 }
  0xee   :  { %v224_v30 = vpop.f32.mrf.mxu0  ;;  %v264_v31 = vpop.f32.mrf.mxu1 }
  0xef   :  { %v431_v32 = vpack.c.bf16 %v223_v28, %v221_v26  ;;  %v439_v33 = vpack.c.bf16 %v263_v29, %v261_v27  ;;  %v225_v36 = vadd.f32 %v224_v30, %v550_v22  ;;  %v265_v37 = vadd.f32 %v264_v31, %v550_v22 }
  0xf0   :  { %v226_v34 = vpop.f32.mrf.mxu0  ;;  %v266_v35 = vpop.f32.mrf.mxu1 }
  0xf1   :  { %371 = vst [vmem:[%s637_s3 + $0x30] sm:$0xff] %v431_v32  ;;  %379 = vst [vmem:[%s637_s3 + $0x70] sm:$0xff] %v439_v33  ;;  %v227_v38 = vadd.f32 %v226_v34, %v552_v23  ;;  %v267_v39 = vadd.f32 %v266_v35, %v552_v23 }
  0xf3   :  { %v432_v40 = vpack.c.bf16 %v227_v38, %v225_v36  ;;  %v440_v41 = vpack.c.bf16 %v267_v39, %v265_v37 }
  0xf5   :  { %372 = vst [vmem:[%s637_s3 + $0x38] sm:$0xff] %v432_v40  ;;  %380 = vst [vmem:[%s637_s3 + $0x78] sm:$0xff] %v440_v41 }

// kernel: opt_resnet_forward.31
= control target key start
LH: loop header
LB: loop body
LE: loop exit
PB: predicated region body
PF: predicated region fallthrough
CT: control target
= control target key end

     0   :  { %vm423_vm0 = vcmask 519168   ;;  %s830_s1 = inlined_call_operand.vmem [shape: bf16[256,64], index: 1, kind: input, shape index: {}]   ;;  %s831_s0 = inlined_call_operand.vmem [shape: bf16[128,256], index: 0, kind: input, shape index: {}]   ;;  %s832_s2 = inlined_call_operand.vmem [shape: f32[1,64], index: 2, kind: input, shape index: {}]   ;;  %s833_s3 = inlined_call_operand.vmem [shape: bf16[128,64], index: 3, kind: output, shape index: {}]  }
   0x1   :  { %v589_v0 = vld [vmem:[%s830_s1 + $0x78] sm:$0xff]   ;;  %v591_v2 = vld [vmem:[%s830_s1 + $0x70] sm:$0xff]   ;;  %v593_v4 = vld [vmem:[%s830_s1 + $0x68] sm:$0xff]  }
   0x2   :  { %v590_v1 = vld [vmem:[%s830_s1 + $0x38] sm:$0xff]   ;;  %509 = vmatprep.subr.bf16.mxu0 %v589_v0  ;;  %573 = vmatprep.subr.bf16.mxu1 %v589_v0  ;;  %v592_v3 = vld [vmem:[%s830_s1 + $0x30] sm:$0xff]   ;;  %v594_v5 = vld [vmem:[%s830_s1 + $0x28] sm:$0xff]  }
   0x3   :  { %510 = vmatpush3.bf16.msra.mxu0 %v590_v1  ;;  %581 = vmatpush3.bf16.msra.mxu1 %v590_v1  ;;  %v595_v6 = vld [vmem:[%s830_s1 + $0x60] sm:$0xff]   ;;  %v597_v8 = vld [vmem:[%s830_s1 + $0x58] sm:$0xff]   ;;  %v599_v10 = vld [vmem:[%s830_s1 + $0x50] sm:$0xff]  }
   0x4   :  { %511 = vmatprep.subr.bf16.mxu0 %v591_v2  ;;  %574 = vmatprep.subr.bf16.mxu1 %v591_v2  ;;  %v596_v7 = vld [vmem:[%s830_s1 + $0x20] sm:$0xff]   ;;  %v598_v9 = vld [vmem:[%s830_s1 + $0x18] sm:$0xff]   ;;  %v600_v13 = vld [vmem:[%s830_s1 + $0x10] sm:$0xff]  }
   0x5   :  { %v607_v11 = vld [vmem:[%s831_s0 + $0x4] ss:$8 sps:$4 sm:$0xff]   ;;  %v605_v18 = vld [vmem:[%s831_s0] ss:$8 sps:$4 sm:$0xff]   ;;  %v611_v20 = vld [vmem:[%s831_s0 + $0x14] ss:$8 sps:$4 sm:$0xff]  }
   0x6   :  { %v610_v12 = vld [vmem:[%s831_s0 + $0x44] ss:$8 sps:$4 sm:$0xff]   ;;  %278 = vmatprep.mubr.bf16.mxu0 %v607_v11  ;;  %v608_v19 = vld [vmem:[%s831_s0 + $0x40] ss:$8 sps:$4 sm:$0xff]   ;;  %v613_v21 = vld [vmem:[%s831_s0 + $0x54] ss:$8 sps:$4 sm:$0xff]  }
   0x7   :  { %512 = vmatpush3.bf16.msra.mxu0 %v592_v3  ;;  %582 = vmatpush3.bf16.msra.mxu1 %v592_v3  ;;  %v601_v14 = vld [vmem:[%s830_s1 + $0x48] sm:$0xff]   ;;  %v603_v16 = vld [vmem:[%s830_s1 + $0x40] sm:$0xff]   ;;  %v615_v22 = vld [vmem:[%s831_s0 + $0x10] ss:$8 sps:$4 sm:$0xff]  }
   0x8   :  { %513 = vmatprep.subr.bf16.mxu0 %v593_v4  ;;  %575 = vmatprep.subr.bf16.mxu1 %v593_v4  ;;  %v602_v15 = vld [vmem:[%s830_s1 + $0x8] sm:$0xff]   ;;  %v604_v17 = vld [vmem:[%s830_s1] sm:$0xff]   ;;  %v616_v23 = vld [vmem:[%s831_s0 + $0x50] ss:$8 sps:$4 sm:$0xff]  }
   0x9   :  { %310 = vmatprep.mubr.bf16.mxu1 %v610_v12  ;;  %v617_v24 = vld [vmem:[%s831_s0 + $0x24] ss:$8 sps:$4 sm:$0xff]   ;;  %v621_v26 = vld [vmem:[%s831_s0 + $0x20] ss:$8 sps:$4 sm:$0xff]   ;;  %v623_v28 = vld [vmem:[%s831_s0 + $0x34] ss:$8 sps:$4 sm:$0xff]  }
   0xa   :  { %v619_v25 = vld [vmem:[%s831_s0 + $0x64] ss:$8 sps:$4 sm:$0xff]   ;;  %v622_v27 = vld [vmem:[%s831_s0 + $0x60] ss:$8 sps:$4 sm:$0xff]   ;;  %v625_v29 = vld [vmem:[%s831_s0 + $0x74] ss:$8 sps:$4 sm:$0xff]  }
   0xb   :  { %514 = vmatpush3.bf16.msra.mxu0 %v594_v5  ;;  %583 = vmatpush3.bf16.msra.mxu1 %v594_v5  ;;  %v627_v30 = vld [vmem:[%s831_s0 + $0x30] ss:$8 sps:$4 sm:$0xff]   ;;  %v748_v34 = vld [vmem:[%s832_s2] ss:$0 sm:$0xff] }
   0xc   :  { %515 = vmatprep.subr.bf16.mxu0 %v595_v6  ;;  %576 = vmatprep.subr.bf16.mxu1 %v595_v6  ;;  %v628_v31 = vld [vmem:[%s831_s0 + $0x70] ss:$8 sps:$4 sm:$0xff]  }
   0xf   :  { %516 = vmatpush3.bf16.msra.mxu0 %v596_v7  ;;  %584 = vmatpush3.bf16.msra.mxu1 %v596_v7 }
  0x10   :  { %517 = vmatprep.subr.bf16.mxu0 %v597_v8  ;;  %577 = vmatprep.subr.bf16.mxu1 %v597_v8 }
  0x13   :  { %518 = vmatpush3.bf16.msra.mxu0 %v598_v9  ;;  %585 = vmatpush3.bf16.msra.mxu1 %v598_v9 }
  0x14   :  { %519 = vmatprep.subr.bf16.mxu0 %v599_v10  ;;  %578 = vmatprep.subr.bf16.mxu1 %v599_v10 }
  0x17   :  { %520 = vmatpush3.bf16.msra.mxu0 %v600_v13  ;;  %586 = vmatpush3.bf16.msra.mxu1 %v600_v13 }
  0x18   :  { %521 = vmatprep.subr.bf16.mxu0 %v601_v14  ;;  %579 = vmatprep.subr.bf16.mxu1 %v601_v14 }
  0x1b   :  { %522 = vmatpush3.bf16.msra.mxu0 %v602_v15  ;;  %587 = vmatpush3.bf16.msra.mxu1 %v602_v15 }
  0x1c   :  { %523 = vmatprep.subr.bf16.mxu0 %v603_v16  ;;  %580 = vmatprep.subr.bf16.mxu1 %v603_v16 }
  0x1f   :  { %524 = vmatpush3.bf16.msra.mxu0 %v604_v17  ;;  %588 = vmatpush3.bf16.msra.mxu1 %v604_v17 }
  0x22   :  { %279 = vmatmul.mubr.bf16.vlgmr.msra.gmra.mxu0 %v605_v18  ;;  %311 = vmatmul.mubr.bf16.vlgmr.msra.gmra.mxu1 %v608_v19 }
  0x23   :  { %286 = vmatprep.mubr.bf16.mxu0 %v611_v20  ;;  %318 = vmatprep.mubr.bf16.mxu1 %v613_v21 }
  0x2a   :  { %287 = vmatmul.mubr.bf16.gmra.mxu0 %v615_v22  ;;  %319 = vmatmul.mubr.bf16.gmra.mxu1 %v616_v23 }
  0x2b   :  { %294 = vmatprep.mubr.bf16.mxu0 %v617_v24  ;;  %326 = vmatprep.mubr.bf16.mxu1 %v619_v25 }
  0x32   :  { %295 = vmatmul.mubr.bf16.gmra.mxu0 %v621_v26  ;;  %327 = vmatmul.mubr.bf16.gmra.mxu1 %v622_v27 }
  0x33   :  { %302 = vmatprep.mubr.bf16.mxu0 %v623_v28  ;;  %334 = vmatprep.mubr.bf16.mxu1 %v625_v29 }
  0x3a   :  { %303 = vmatmul.mubr.bf16.gmra.mxu0 %v627_v30  ;;  %335 = vmatmul.mubr.bf16.gmra.mxu1 %v628_v31 }
  0xe2   :  { %v525_v32 = vpop.f32.mrf.mxu0  ;;  %v549_v33 = vpop.f32.mrf.mxu1 }
  0xe4   :  { %v526_v35 = vpop.f32.mrf.mxu0  ;;  %v550_v36 = vpop.f32.mrf.mxu1 }
  0xe5   :  { %v527_v37 = vadd.f32 %v526_v35, %v525_v32  ;;  %v551_v38 = vadd.f32 %v550_v36, %v549_v33 }
  0xe6   :  { %v528_v39 = vpop.f32.mrf.mxu0  ;;  %v552_v40 = vpop.f32.mrf.mxu1 }
  0xe7   :  { %v281_v41 = vadd.f32 %v527_v37, %v748_v34  ;;  %v313_v42 = vadd.f32 %v551_v38, %v748_v34 }
  0xe8   :  { %v529_v43 = vpop.f32.mrf.mxu0  ;;  %v553_v44 = vpop.f32.mrf.mxu1 }
  0xe9   :  { %v343_v45 = vmax.f32 %v281_v41, 0.0  ;;  %v351_v46 = vmax.f32 %v313_v42, 0.0  ;;  %v530_v47 = vadd.f32 %v529_v43, %v528_v39  ;;  %v554_v48 = vadd.f32 %v553_v44, %v552_v40 }
  0xea   :  { %v531_v49 = vpop.f32.mrf.mxu0  ;;  %v555_v50 = vpop.f32.mrf.mxu1 }
  0xeb   :  { %v493_v51 = vpack.c.bf16 %v343_v45, %v343_v45  ;;  %v501_v52 = vpack.c.bf16 %v351_v46, %v351_v46  ;;  %v284_v53 = vadd.f32 %v530_v47, %v748_v34  ;;  %v316_v54 = vadd.f32 %v554_v48, %v748_v34 }
  0xec   :  { %v532_v55 = vpop.f32.mrf.mxu0  ;;  %v556_v56 = vpop.f32.mrf.mxu1 }
  0xed   :  { %424 = vst.msk [vmem:[%s833_s3] sm:$0xf] %vm423_vm0, %v493_v51  ;;  %432 = vst.msk [vmem:[%s833_s3 + $0x20] sm:$0xf] %vm423_vm0, %v501_v52  ;;  %v344_v57 = vmax.f32 %v284_v53, 0.0  ;;  %v352_v58 = vmax.f32 %v316_v54, 0.0  ;;  %v533_v59 = vadd.f32 %v532_v55, %v531_v49  ;;  %v557_v60 = vadd.f32 %v556_v56, %v555_v50 }
  0xee   :  { %v534_v61 = vpop.f32.mrf.mxu0  ;;  %v558_v62 = vpop.f32.mrf.mxu1 }
  0xef   :  { %v494_v63 = vpack.c.bf16 %v344_v57, %v344_v57  ;;  %v502_v0 = vpack.c.bf16 %v352_v58, %v352_v58  ;;  %v289_v1 = vadd.f32 %v533_v59, %v748_v34  ;;  %v321_v2 = vadd.f32 %v557_v60, %v748_v34 }
  0xf0   :  { %v535_v3 = vpop.f32.mrf.mxu0  ;;  %v559_v4 = vpop.f32.mrf.mxu1 }
  0xf1   :  { %425 = vst.msk [vmem:[%s833_s3 + $0x4] sm:$0xf] %vm423_vm0, %v494_v63  ;;  %433 = vst.msk [vmem:[%s833_s3 + $0x24] sm:$0xf] %vm423_vm0, %v502_v0  ;;  %v345_v5 = vmax.f32 %v289_v1, 0.0  ;;  %v353_v6 = vmax.f32 %v321_v2, 0.0  ;;  %v536_v7 = vadd.f32 %v535_v3, %v534_v61  ;;  %v560_v8 = vadd.f32 %v559_v4, %v558_v62 }
  0xf2   :  { %v537_v9 = vpop.f32.mrf.mxu0  ;;  %v561_v10 = vpop.f32.mrf.mxu1 }
  0xf3   :  { %v495_v11 = vpack.c.bf16 %v345_v5, %v345_v5  ;;  %v503_v12 = vpack.c.bf16 %v353_v6, %v353_v6  ;;  %v292_v13 = vadd.f32 %v536_v7, %v748_v34  ;;  %v324_v14 = vadd.f32 %v560_v8, %v748_v34 }
  0xf4   :  { %v538_v15 = vpop.f32.mrf.mxu0  ;;  %v562_v16 = vpop.f32.mrf.mxu1 }
  0xf5   :  { %426 = vst.msk [vmem:[%s833_s3 + $0x8] sm:$0xf] %vm423_vm0, %v495_v11  ;;  %434 = vst.msk [vmem:[%s833_s3 + $0x28] sm:$0xf] %vm423_vm0, %v503_v12  ;;  %v346_v17 = vmax.f32 %v292_v13, 0.0  ;;  %v354_v18 = vmax.f32 %v324_v14, 0.0  ;;  %v539_v19 = vadd.f32 %v538_v15, %v537_v9  ;;  %v563_v20 = vadd.f32 %v562_v16, %v561_v10 }
  0xf6   :  { %v540_v21 = vpop.f32.mrf.mxu0  ;;  %v564_v22 = vpop.f32.mrf.mxu1 }
  0xf7   :  { %v496_v23 = vpack.c.bf16 %v346_v17, %v346_v17  ;;  %v504_v24 = vpack.c.bf16 %v354_v18, %v354_v18  ;;  %v297_v25 = vadd.f32 %v539_v19, %v748_v34  ;;  %v329_v26 = vadd.f32 %v563_v20, %v748_v34 }
  0xf8   :  { %v541_v27 = vpop.f32.mrf.mxu0  ;;  %v565_v28 = vpop.f32.mrf.mxu1 }
  0xf9   :  { %427 = vst.msk [vmem:[%s833_s3 + $0xc] sm:$0xf] %vm423_vm0, %v496_v23  ;;  %435 = vst.msk [vmem:[%s833_s3 + $0x2c] sm:$0xf] %vm423_vm0, %v504_v24  ;;  %v347_v29 = vmax.f32 %v297_v25, 0.0  ;;  %v355_v30 = vmax.f32 %v329_v26, 0.0  ;;  %v542_v31 = vadd.f32 %v541_v27, %v540_v21  ;;  %v566_v32 = vadd.f32 %v565_v28, %v564_v22 }
  0xfa   :  { %v543_v33 = vpop.f32.mrf.mxu0  ;;  %v567_v35 = vpop.f32.mrf.mxu1 }
  0xfb   :  { %v497_v36 = vpack.c.bf16 %v347_v29, %v347_v29  ;;  %v505_v37 = vpack.c.bf16 %v355_v30, %v355_v30  ;;  %v300_v38 = vadd.f32 %v542_v31, %v748_v34  ;;  %v332_v39 = vadd.f32 %v566_v32, %v748_v34 }
  0xfc   :  { %v544_v40 = vpop.f32.mrf.mxu0  ;;  %v568_v41 = vpop.f32.mrf.mxu1 }
  0xfd   :  { %428 = vst.msk [vmem:[%s833_s3 + $0x10] sm:$0xf] %vm423_vm0, %v497_v36  ;;  %436 = vst.msk [vmem:[%s833_s3 + $0x30] sm:$0xf] %vm423_vm0, %v505_v37  ;;  %v348_v42 = vmax.f32 %v300_v38, 0.0  ;;  %v356_v43 = vmax.f32 %v332_v39, 0.0  ;;  %v545_v44 = vadd.f32 %v544_v40, %v543_v33  ;;  %v569_v45 = vadd.f32 %v568_v41, %v567_v35 }
  0xfe   :  { %v546_v46 = vpop.f32.mrf.mxu0  ;;  %v570_v47 = vpop.f32.mrf.mxu1 }
  0xff   :  { %v498_v48 = vpack.c.bf16 %v348_v42, %v348_v42  ;;  %v506_v49 = vpack.c.bf16 %v356_v43, %v356_v43  ;;  %v305_v50 = vadd.f32 %v545_v44, %v748_v34  ;;  %v337_v51 = vadd.f32 %v569_v45, %v748_v34 }
 0x100   :  { %v547_v52 = vpop.f32.mrf.mxu0  ;;  %v571_v53 = vpop.f32.mrf.mxu1 }
 0x101   :  { %429 = vst.msk [vmem:[%s833_s3 + $0x14] sm:$0xf] %vm423_vm0, %v498_v48  ;;  %437 = vst.msk [vmem:[%s833_s3 + $0x34] sm:$0xf] %vm423_vm0, %v506_v49  ;;  %v349_v54 = vmax.f32 %v305_v50, 0.0  ;;  %v357_v55 = vmax.f32 %v337_v51, 0.0  ;;  %v548_v56 = vadd.f32 %v547_v52, %v546_v46  ;;  %v572_v57 = vadd.f32 %v571_v53, %v570_v47 }
 0x103   :  { %v499_v58 = vpack.c.bf16 %v349_v54, %v349_v54  ;;  %v507_v59 = vpack.c.bf16 %v357_v55, %v357_v55  ;;  %v308_v60 = vadd.f32 %v548_v56, %v748_v34  ;;  %v340_v61 = vadd.f32 %v572_v57, %v748_v34 }
 0x105   :  { %430 = vst.msk [vmem:[%s833_s3 + $0x18] sm:$0xf] %vm423_vm0, %v499_v58  ;;  %438 = vst.msk [vmem:[%s833_s3 + $0x38] sm:$0xf] %vm423_vm0, %v507_v59  ;;  %v350_v62 = vmax.f32 %v308_v60, 0.0  ;;  %v358_v63 = vmax.f32 %v340_v61, 0.0 }
 0x107   :  { %v500_v0 = vpack.c.bf16 %v350_v62, %v350_v62  ;;  %v508_v1 = vpack.c.bf16 %v358_v63, %v358_v63 }
 0x109   :  { %431 = vst.msk [vmem:[%s833_s3 + $0x1c] sm:$0xf] %vm423_vm0, %v500_v0  ;;  %439 = vst.msk [vmem:[%s833_s3 + $0x3c] sm:$0xf] %vm423_vm0, %v508_v1 }

// kernel: opt_resnet_forward.30
= control target key start
LH: loop header
LB: loop body
LE: loop exit
PB: predicated region body
PF: predicated region fallthrough
CT: control target
= control target key end

     0   :  { %v585_v1 = vmov 0   ;;  %vm134_vm0 = vcmask 523264   ;;  %v44_v17 = vlaneseq  ;;  %s886_s1 = inlined_call_operand.vmem [shape: bf16[64,256], index: 1, kind: input, shape index: {}]   ;;  %s887_s0 = inlined_call_operand.vmem [shape: bf16[128,64], index: 0, kind: input, shape index: {}]   ;;  %s888_s2 = inlined_call_operand.vmem [shape: f32[1,256], index: 2, kind: input, shape index: {}]   ;;  %s889_s3 = inlined_call_operand.vmem [shape: bf16[128,256], index: 3, kind: input, shape index: {}]   ;;  %s890_s4 = inlined_call_operand.vmem [shape: bf16[128,256], index: 4, kind: output, shape index: {}]  }
   0x1   :  { %v565_v0 = vld [vmem:[%s886_s1 + $0x34] ss:$8 sps:$4 sm:$0xff]   ;;  %191 = vmatprep.mubr.bf16.mxu0 %v585_v1  ;;  %231 = vmatprep.mubr.bf16.mxu1 %v585_v1  ;;  %v567_v2 = vld [vmem:[%s886_s1 + $0x30] ss:$8 sps:$4 sm:$0xff]   ;;  %v568_v3 = vld [vmem:[%s886_s1 + $0x24] ss:$8 sps:$4 sm:$0xff]  }
   0x2   :  { %167 = vmatprep.subr.bf16.mxu0 %v565_v0  ;;  %556 = vmatprep.subr.bf16.mxu1 %v565_v0  ;;  %v570_v4 = vld [vmem:[%s886_s1 + $0x20] ss:$8 sps:$4 sm:$0xff]   ;;  %v571_v5 = vld [vmem:[%s886_s1 + $0x14] ss:$8 sps:$4 sm:$0xff]   ;;  %v573_v6 = vld [vmem:[%s886_s1 + $0x10] ss:$8 sps:$4 sm:$0xff]  }
   0x3   :  { %168 = vmatpush1.bf16.msra.mxu0 %v567_v2  ;;  %560 = vmatpush1.bf16.msra.mxu1 %v567_v2  ;;  %v574_v7 = vld [vmem:[%s886_s1 + $0x4] ss:$8 sps:$4 sm:$0xff]   ;;  %v576_v8 = vld [vmem:[%s886_s1] ss:$8 sps:$4 sm:$0xff]   ;;  %v581_v13 = vld [vmem:[%s887_s0 + $0x10] sm:$0xff]   ;;  %v45_v18 = vshrl.u32 %v44_v17, 7 }
   0x4   :  { %169 = vmatprep.subr.bf16.mxu0 %v568_v3  ;;  %557 = vmatprep.subr.bf16.mxu1 %v568_v3  ;;  %v577_v9 = vld [vmem:[%s887_s0] sm:$0xff]   ;;  %v579_v11 = vld [vmem:[%s887_s0 + $0x8] sm:$0xff]   ;;  %v582_v14 = vld [vmem:[%s887_s0 + $0x30] sm:$0xff]  }
   0x5   :  { %v578_v10 = vld [vmem:[%s887_s0 + $0x20] sm:$0xff]   ;;  %v580_v12 = vld [vmem:[%s887_s0 + $0x28] sm:$0xff]   ;;  %v583_v15 = vld [vmem:[%s887_s0 + $0x18] sm:$0xff]   ;;  %v46_v19 = vsub.s32 0, %v45_v18  ;;  %v50_v22 = vsub.s32 1, %v45_v18 }
   0x6   :  { %v584_v16 = vld [vmem:[%s887_s0 + $0x38] sm:$0xff]   ;;  %v42_v20 = vld [vmem:[%s888_s2] sm:$0x3]  ;;  %v681_v25 = vld [vmem:[%s889_s3 + $0x8] sm:$0xff] }
   0x7   :  { %170 = vmatpush1.bf16.msra.mxu0 %v570_v4  ;;  %561 = vmatpush1.bf16.msra.mxu1 %v570_v4  ;;  %v272_v21 = vld [vmem:[%s889_s3] sm:$0xff]  ;;  %v676_v24 = vrot.slane %v42_v20, %v46_v19  ;;  %v686_v26 = vld [vmem:[%s889_s3 + $0x48] sm:$0xff]  ;;  %v691_v28 = vld [vmem:[%s889_s3 + $0x10] sm:$0xff]  ;;  %v698_v31 = vrot.slane %v42_v20, %v50_v22  ;;  %v290_v38 = vunpack.c.l.bf16 %v681_v25  ;;  %v291_v40 = vunpack.c.h.bf16 %v681_v25 }
   0x8   :  { %171 = vmatprep.subr.bf16.mxu0 %v571_v5  ;;  %558 = vmatprep.subr.bf16.mxu1 %v571_v5  ;;  %v280_v23 = vld [vmem:[%s889_s3 + $0x40] sm:$0xff]  ;;  %v288_v27 = vunpack.c.l.bf16 %v272_v21  ;;  %v696_v29 = vld [vmem:[%s889_s3 + $0x50] sm:$0xff]  ;;  %v289_v32 = vunpack.c.h.bf16 %v272_v21  ;;  %v703_v34 = vld [vmem:[%s889_s3 + $0x18] sm:$0xff]  ;;  %v306_v39 = vunpack.c.l.bf16 %v686_v26  ;;  %v307_v41 = vunpack.c.h.bf16 %v686_v26 }
   0x9   :  { %v304_v30 = vunpack.c.l.bf16 %v280_v23  ;;  %v305_v33 = vunpack.c.h.bf16 %v280_v23  ;;  %v708_v35 = vld [vmem:[%s889_s3 + $0x58] sm:$0xff]  ;;  %v292_v44 = vunpack.c.l.bf16 %v691_v28  ;;  %v308_v45 = vunpack.c.l.bf16 %v696_v29  ;;  %v721_v46 = vld [vmem:[%s889_s3 + $0x20] sm:$0xff]  ;;  %v743_v4 = vld [vmem:[%s889_s3 + $0x28] sm:$0xff] }
   0xa   :  { %v726_v47 = vld [vmem:[%s889_s3 + $0x60] sm:$0xff]  ;;  %v293_v50 = vunpack.c.h.bf16 %v691_v28  ;;  %v309_v51 = vunpack.c.h.bf16 %v696_v29  ;;  %v294_v52 = vunpack.c.l.bf16 %v703_v34  ;;  %v310_v53 = vunpack.c.l.bf16 %v708_v35  ;;  %v748_v5 = vld [vmem:[%s889_s3 + $0x68] sm:$0xff] }
   0xb   :  { %172 = vmatpush1.bf16.msra.mxu0 %v573_v6  ;;  %562 = vmatpush1.bf16.msra.mxu1 %v573_v6  ;;  %v295_v60 = vunpack.c.h.bf16 %v703_v34  ;;  %v311_v61 = vunpack.c.h.bf16 %v708_v35  ;;  %v296_v62 = vunpack.c.l.bf16 %v721_v46  ;;  %v312_v63 = vunpack.c.l.bf16 %v726_v47 }
   0xc   :  { %173 = vmatprep.subr.bf16.mxu0 %v574_v7  ;;  %559 = vmatprep.subr.bf16.mxu1 %v574_v7  ;;  %v297_v2 = vunpack.c.h.bf16 %v721_v46  ;;  %v313_v3 = vunpack.c.h.bf16 %v726_v47  ;;  %v298_v20 = vunpack.c.l.bf16 %v743_v4  ;;  %v314_v21 = vunpack.c.l.bf16 %v748_v5 }
   0xf   :  { %174 = vmatpush1.bf16.msra.mxu0 %v576_v8  ;;  %563 = vmatpush1.bf16.msra.mxu1 %v576_v8 }
  0x12   :  { %516 = vmatmul.mubr.msk.bf16.vlgmr.msra.gmra.mxu0 %vm134_vm0, %v577_v9  ;;  %520 = vmatmul.mubr.msk.bf16.vlgmr.msra.gmra.mxu1 %vm134_vm0, %v578_v10 }
  0x13   :  { %201 = vmatprep.mubr.bf16.mxu0 %v585_v1  ;;  %241 = vmatprep.mubr.bf16.mxu1 %v585_v1 }
  0x1a   :  { %517 = vmatmul.mubr.msk.bf16.gmra.mxu0 %vm134_vm0, %v579_v11  ;;  %521 = vmatmul.mubr.msk.bf16.gmra.mxu1 %vm134_vm0, %v580_v12 }
  0x1b   :  { %211 = vmatprep.mubr.bf16.mxu0 %v585_v1  ;;  %251 = vmatprep.mubr.bf16.mxu1 %v585_v1 }
  0x22   :  { %518 = vmatmul.mubr.msk.bf16.gmra.mxu0 %vm134_vm0, %v581_v13  ;;  %522 = vmatmul.mubr.msk.bf16.gmra.mxu1 %vm134_vm0, %v582_v14 }
  0x23   :  { %221 = vmatprep.mubr.bf16.mxu0 %v585_v1  ;;  %261 = vmatprep.mubr.bf16.mxu1 %v585_v1 }
  0x2a   :  { %519 = vmatmul.mubr.msk.bf16.gmra.mxu0 %vm134_vm0, %v583_v15  ;;  %523 = vmatmul.mubr.msk.bf16.gmra.mxu1 %vm134_vm0, %v584_v16 }
  0xd2   :  { %v193_v36 = vpop.f32.mrf.mxu0  ;;  %v233_v37 = vpop.f32.mrf.mxu1 }
  0xd3   :  { %v194_v42 = vadd.f32 %v193_v36, %v676_v24  ;;  %v234_v43 = vadd.f32 %v233_v37, %v676_v24 }
  0xd4   :  { %v195_v48 = vpop.f32.mrf.mxu0  ;;  %v235_v49 = vpop.f32.mrf.mxu1 }
  0xd5   :  { %v320_v54 = vadd.f32 %v288_v27, %v194_v42  ;;  %v336_v55 = vadd.f32 %v304_v30, %v234_v43  ;;  %v196_v56 = vadd.f32 %v195_v48, %v698_v31  ;;  %v236_v57 = vadd.f32 %v235_v49, %v698_v31 }
  0xd6   :  { %v197_v58 = vpop.f32.mrf.mxu0  ;;  %v237_v59 = vpop.f32.mrf.mxu1  ;;  %v299_v48 = vunpack.c.h.bf16 %v743_v4  ;;  %v315_v49 = vunpack.c.h.bf16 %v748_v5 }
  0xd7   :  { %v321_v0 = vadd.f32 %v289_v32, %v196_v56  ;;  %v337_v1 = vadd.f32 %v305_v33, %v236_v57  ;;  %v352_v6 = vmax.f32 %v320_v54, 0.0  ;;  %v368_v7 = vmax.f32 %v336_v55, 0.0 }
  0xd8   :  { %v198_v8 = vadd.f32 %v197_v58, %v676_v24  ;;  %v238_v9 = vadd.f32 %v237_v59, %v676_v24  ;;  %v199_v10 = vpop.f32.mrf.mxu0  ;;  %v239_v11 = vpop.f32.mrf.mxu1  ;;  %v771_v58 = vld [vmem:[%s889_s3 + $0x30] sm:$0xff] }
  0xd9   :  { %v353_v12 = vmax.f32 %v321_v0, 0.0  ;;  %v369_v13 = vmax.f32 %v337_v1, 0.0  ;;  %v200_v14 = vadd.f32 %v199_v10, %v698_v31  ;;  %v240_v15 = vadd.f32 %v239_v11, %v698_v31 }
  0xda   :  { %v322_v16 = vadd.f32 %v290_v38, %v198_v8  ;;  %v338_v17 = vadd.f32 %v306_v39, %v238_v9  ;;  %v203_v18 = vpop.f32.mrf.mxu0  ;;  %v243_v19 = vpop.f32.mrf.mxu1 }
  0xdb   :  { %v540_v22 = vpack.c.bf16 %v353_v12, %v352_v6  ;;  %v548_v23 = vpack.c.bf16 %v369_v13, %v368_v7  ;;  %v323_v25 = vadd.f32 %v291_v40, %v200_v14  ;;  %v339_v26 = vadd.f32 %v307_v41, %v240_v15 }
  0xdc   :  { %v354_v27 = vmax.f32 %v322_v16, 0.0  ;;  %v370_v28 = vmax.f32 %v338_v17, 0.0  ;;  %v204_v29 = vadd.f32 %v203_v18, %v676_v24  ;;  %v244_v30 = vadd.f32 %v243_v19, %v676_v24  ;;  %v205_v32 = vpop.f32.mrf.mxu0  ;;  %v245_v33 = vpop.f32.mrf.mxu1 }
  0xdd   :  { %480 = vst [vmem:[%s890_s4] sm:$0xff] %v540_v22  ;;  %488 = vst [vmem:[%s890_s4 + $0x40] sm:$0xff] %v548_v23  ;;  %v355_v36 = vmax.f32 %v323_v25, 0.0  ;;  %v371_v37 = vmax.f32 %v339_v26, 0.0  ;;  %v206_v38 = vadd.f32 %v205_v32, %v698_v31  ;;  %v246_v39 = vadd.f32 %v245_v33, %v698_v31 }
  0xde   :  { %v324_v40 = vadd.f32 %v292_v44, %v204_v29  ;;  %v340_v41 = vadd.f32 %v308_v45, %v244_v30  ;;  %v207_v42 = vpop.f32.mrf.mxu0  ;;  %v247_v43 = vpop.f32.mrf.mxu1  ;;  %v776_v44 = vld [vmem:[%s889_s3 + $0x70] sm:$0xff]  ;;  %v300_v14 = vunpack.c.l.bf16 %v771_v58  ;;  %v301_v32 = vunpack.c.h.bf16 %v771_v58 }
  0xdf   :  { %v541_v54 = vpack.c.bf16 %v355_v36, %v354_v27  ;;  %v549_v55 = vpack.c.bf16 %v371_v37, %v370_v28  ;;  %v325_v56 = vadd.f32 %v293_v50, %v206_v38  ;;  %v341_v57 = vadd.f32 %v309_v51, %v246_v39 }
  0xe0   :  { %v356_v45 = vmax.f32 %v324_v40, 0.0  ;;  %v372_v59 = vmax.f32 %v340_v41, 0.0  ;;  %v208_v0 = vadd.f32 %v207_v42, %v676_v24  ;;  %v248_v1 = vadd.f32 %v247_v43, %v676_v24  ;;  %v209_v6 = vpop.f32.mrf.mxu0  ;;  %v249_v7 = vpop.f32.mrf.mxu1 }
  0xe1   :  { %481 = vst [vmem:[%s890_s4 + $0x8] sm:$0xff] %v541_v54  ;;  %489 = vst [vmem:[%s890_s4 + $0x48] sm:$0xff] %v549_v55  ;;  %v357_v50 = vmax.f32 %v325_v56, 0.0  ;;  %v373_v51 = vmax.f32 %v341_v57, 0.0  ;;  %v210_v8 = vadd.f32 %v209_v6, %v698_v31  ;;  %v250_v9 = vadd.f32 %v249_v7, %v698_v31 }
  0xe2   :  { %v326_v10 = vadd.f32 %v294_v52, %v208_v0  ;;  %v342_v11 = vadd.f32 %v310_v53, %v248_v1  ;;  %v213_v12 = vpop.f32.mrf.mxu0  ;;  %v253_v13 = vpop.f32.mrf.mxu1  ;;  %v316_v15 = vunpack.c.l.bf16 %v776_v44  ;;  %v317_v33 = vunpack.c.h.bf16 %v776_v44 }
  0xe3   :  { %v542_v16 = vpack.c.bf16 %v357_v50, %v356_v45  ;;  %v550_v17 = vpack.c.bf16 %v373_v51, %v372_v59  ;;  %v327_v18 = vadd.f32 %v295_v60, %v210_v8  ;;  %v343_v19 = vadd.f32 %v311_v61, %v250_v9 }
  0xe4   :  { %v358_v22 = vmax.f32 %v326_v10, 0.0  ;;  %v374_v23 = vmax.f32 %v342_v11, 0.0  ;;  %v214_v52 = vadd.f32 %v213_v12, %v676_v24  ;;  %v254_v53 = vadd.f32 %v253_v13, %v676_v24  ;;  %v215_v25 = vpop.f32.mrf.mxu0  ;;  %v255_v26 = vpop.f32.mrf.mxu1 }
  0xe5   :  { %482 = vst [vmem:[%s890_s4 + $0x10] sm:$0xff] %v542_v16  ;;  %490 = vst [vmem:[%s890_s4 + $0x50] sm:$0xff] %v550_v17  ;;  %v359_v34 = vmax.f32 %v327_v18, 0.0  ;;  %v375_v60 = vmax.f32 %v343_v19, 0.0  ;;  %v216_v35 = vadd.f32 %v215_v25, %v698_v31  ;;  %v256_v61 = vadd.f32 %v255_v26, %v698_v31 }
  0xe6   :  { %v328_v27 = vadd.f32 %v296_v62, %v214_v52  ;;  %v344_v28 = vadd.f32 %v312_v63, %v254_v53  ;;  %v217_v29 = vpop.f32.mrf.mxu0  ;;  %v257_v30 = vpop.f32.mrf.mxu1  ;;  %v821_v62 = vld [vmem:[%s889_s3 + $0x38] sm:$0xff] }
  0xe7   :  { %v543_v36 = vpack.c.bf16 %v359_v34, %v358_v22  ;;  %v551_v37 = vpack.c.bf16 %v375_v60, %v374_v23  ;;  %v329_v38 = vadd.f32 %v297_v2, %v216_v35  ;;  %v345_v39 = vadd.f32 %v313_v3, %v256_v61  ;;  %v826_v63 = vld [vmem:[%s889_s3 + $0x78] sm:$0xff] }
  0xe8   :  { %v360_v40 = vmax.f32 %v328_v27, 0.0  ;;  %v376_v41 = vmax.f32 %v344_v28, 0.0  ;;  %v218_v42 = vadd.f32 %v217_v29, %v676_v24  ;;  %v258_v46 = vadd.f32 %v257_v30, %v676_v24  ;;  %v219_v2 = vpop.f32.mrf.mxu0  ;;  %v259_v43 = vpop.f32.mrf.mxu1 }
  0xe9   :  { %483 = vst [vmem:[%s890_s4 + $0x18] sm:$0xff] %v543_v36  ;;  %491 = vst [vmem:[%s890_s4 + $0x58] sm:$0xff] %v551_v37  ;;  %v361_v47 = vmax.f32 %v329_v38, 0.0  ;;  %v377_v3 = vmax.f32 %v345_v39, 0.0  ;;  %v220_v54 = vadd.f32 %v219_v2, %v698_v31  ;;  %v260_v55 = vadd.f32 %v259_v43, %v698_v31 }
  0xea   :  { %v330_v56 = vadd.f32 %v298_v20, %v218_v42  ;;  %v346_v57 = vadd.f32 %v314_v21, %v258_v46  ;;  %v223_v45 = vpop.f32.mrf.mxu0  ;;  %v263_v59 = vpop.f32.mrf.mxu1  ;;  %v302_v0 = vunpack.c.l.bf16 %v821_v62  ;;  %v318_v1 = vunpack.c.l.bf16 %v826_v63 }
  0xeb   :  { %v544_v6 = vpack.c.bf16 %v361_v47, %v360_v40  ;;  %v552_v7 = vpack.c.bf16 %v377_v3, %v376_v41  ;;  %v331_v50 = vadd.f32 %v299_v48, %v220_v54  ;;  %v347_v51 = vadd.f32 %v315_v49, %v260_v55 }
  0xec   :  { %v362_v8 = vmax.f32 %v330_v56, 0.0  ;;  %v378_v9 = vmax.f32 %v346_v57, 0.0  ;;  %v224_v20 = vadd.f32 %v223_v45, %v676_v24  ;;  %v264_v21 = vadd.f32 %v263_v59, %v676_v24  ;;  %v225_v10 = vpop.f32.mrf.mxu0  ;;  %v265_v11 = vpop.f32.mrf.mxu1 }
  0xed   :  { %484 = vst [vmem:[%s890_s4 + $0x20] sm:$0xff] %v544_v6  ;;  %492 = vst [vmem:[%s890_s4 + $0x60] sm:$0xff] %v552_v7  ;;  %v363_v4 = vmax.f32 %v331_v50, 0.0  ;;  %v379_v48 = vmax.f32 %v347_v51, 0.0  ;;  %v226_v5 = vadd.f32 %v225_v10, %v698_v31  ;;  %v266_v49 = vadd.f32 %v265_v11, %v698_v31 }
  0xee   :  { %v332_v12 = vadd.f32 %v300_v14, %v224_v20  ;;  %v348_v13 = vadd.f32 %v316_v15, %v264_v21  ;;  %v227_v16 = vpop.f32.mrf.mxu0  ;;  %v267_v17 = vpop.f32.mrf.mxu1  ;;  %v303_v18 = vunpack.c.h.bf16 %v821_v62  ;;  %v319_v19 = vunpack.c.h.bf16 %v826_v63 }
  0xef   :  { %v545_v22 = vpack.c.bf16 %v363_v4, %v362_v8  ;;  %v553_v23 = vpack.c.bf16 %v379_v48, %v378_v9  ;;  %v333_v52 = vadd.f32 %v301_v32, %v226_v5  ;;  %v349_v53 = vadd.f32 %v317_v33, %v266_v49 }
  0xf0   :  { %v364_v25 = vmax.f32 %v332_v12, 0.0  ;;  %v380_v26 = vmax.f32 %v348_v13, 0.0  ;;  %v228_v34 = vadd.f32 %v227_v16, %v676_v24  ;;  %v268_v58 = vadd.f32 %v267_v17, %v676_v24  ;;  %v229_v14 = vpop.f32.mrf.mxu0  ;;  %v269_v60 = vpop.f32.mrf.mxu1 }
  0xf1   :  { %485 = vst [vmem:[%s890_s4 + $0x28] sm:$0xff] %v545_v22  ;;  %493 = vst [vmem:[%s890_s4 + $0x68] sm:$0xff] %v553_v23  ;;  %v365_v44 = vmax.f32 %v333_v52, 0.0  ;;  %v381_v15 = vmax.f32 %v349_v53, 0.0  ;;  %v230_v35 = vadd.f32 %v229_v14, %v698_v31  ;;  %v270_v61 = vadd.f32 %v269_v60, %v698_v31 }
  0xf2   :  { %v334_v27 = vadd.f32 %v302_v0, %v228_v34  ;;  %v350_v28 = vadd.f32 %v318_v1, %v268_v58 }
  0xf3   :  { %v546_v29 = vpack.c.bf16 %v365_v44, %v364_v25  ;;  %v554_v24 = vpack.c.bf16 %v381_v15, %v380_v26  ;;  %v335_v30 = vadd.f32 %v303_v18, %v230_v35  ;;  %v351_v32 = vadd.f32 %v319_v19, %v270_v61 }
  0xf4   :  { %v366_v33 = vmax.f32 %v334_v27, 0.0  ;;  %v382_v36 = vmax.f32 %v350_v28, 0.0 }
  0xf5   :  { %486 = vst [vmem:[%s890_s4 + $0x30] sm:$0xff] %v546_v29  ;;  %494 = vst [vmem:[%s890_s4 + $0x70] sm:$0xff] %v554_v24  ;;  %v367_v37 = vmax.f32 %v335_v30, 0.0  ;;  %v383_v38 = vmax.f32 %v351_v32, 0.0 }
  0xf7   :  { %v547_v39 = vpack.c.bf16 %v367_v37, %v366_v33  ;;  %v555_v31 = vpack.c.bf16 %v383_v38, %v382_v36 }
  0xf9   :  { %487 = vst [vmem:[%s890_s4 + $0x38] sm:$0xff] %v547_v39  ;;  %495 = vst [vmem:[%s890_s4 + $0x78] sm:$0xff] %v555_v31 }

// kernel: opt_resnet_forward.38
= control target key start
LH: loop header
LB: loop body
LE: loop exit
PB: predicated region body
PF: predicated region fallthrough
CT: control target
= control target key end

     0   :  { %s836_s1 = inlined_call_operand.vmem [shape: bf16[256,128], index: 1, kind: input, shape index: {}]   ;;  %s837_s0 = inlined_call_operand.vmem [shape: bf16[128,256], index: 0, kind: input, shape index: {}]   ;;  %s838_s2 = inlined_call_operand.vmem [shape: f32[1,128], index: 2, kind: input, shape index: {}]   ;;  %s839_s3 = inlined_call_operand.vmem [shape: bf16[128,128], index: 3, kind: output, shape index: {}]  }
   0x1   :  { %v635_v0 = vld [vmem:[%s836_s1 + $0x78] sm:$0xff]   ;;  %v637_v2 = vld [vmem:[%s836_s1 + $0x70] sm:$0xff]   ;;  %v639_v4 = vld [vmem:[%s836_s1 + $0x68] sm:$0xff]  }
   0x2   :  { %v636_v1 = vld [vmem:[%s836_s1 + $0x38] sm:$0xff]   ;;  %555 = vmatprep.subr.bf16.mxu0 %v635_v0  ;;  %619 = vmatprep.subr.bf16.mxu1 %v635_v0  ;;  %v638_v3 = vld [vmem:[%s836_s1 + $0x30] sm:$0xff]   ;;  %v640_v5 = vld [vmem:[%s836_s1 + $0x28] sm:$0xff]  }
   0x3   :  { %556 = vmatpush3.bf16.msra.mxu0 %v636_v1  ;;  %627 = vmatpush3.bf16.msra.mxu1 %v636_v1  ;;  %v641_v6 = vld [vmem:[%s836_s1 + $0x60] sm:$0xff]   ;;  %v643_v8 = vld [vmem:[%s836_s1 + $0x58] sm:$0xff]   ;;  %v645_v10 = vld [vmem:[%s836_s1 + $0x50] sm:$0xff]  }
   0x4   :  { %557 = vmatprep.subr.bf16.mxu0 %v637_v2  ;;  %620 = vmatprep.subr.bf16.mxu1 %v637_v2  ;;  %v642_v7 = vld [vmem:[%s836_s1 + $0x20] sm:$0xff]   ;;  %v644_v9 = vld [vmem:[%s836_s1 + $0x18] sm:$0xff]   ;;  %v646_v13 = vld [vmem:[%s836_s1 + $0x10] sm:$0xff]  }
   0x5   :  { %v653_v11 = vld [vmem:[%s837_s0 + $0x4] ss:$8 sps:$4 sm:$0xff]   ;;  %v651_v18 = vld [vmem:[%s837_s0] ss:$8 sps:$4 sm:$0xff]   ;;  %v657_v20 = vld [vmem:[%s837_s0 + $0x14] ss:$8 sps:$4 sm:$0xff]  }
   0x6   :  { %v656_v12 = vld [vmem:[%s837_s0 + $0x44] ss:$8 sps:$4 sm:$0xff]   ;;  %278 = vmatprep.mubr.bf16.mxu0 %v653_v11  ;;  %v654_v19 = vld [vmem:[%s837_s0 + $0x40] ss:$8 sps:$4 sm:$0xff]   ;;  %v659_v21 = vld [vmem:[%s837_s0 + $0x54] ss:$8 sps:$4 sm:$0xff]  }
   0x7   :  { %558 = vmatpush3.bf16.msra.mxu0 %v638_v3  ;;  %628 = vmatpush3.bf16.msra.mxu1 %v638_v3  ;;  %v647_v14 = vld [vmem:[%s836_s1 + $0x48] sm:$0xff]   ;;  %v649_v16 = vld [vmem:[%s836_s1 + $0x40] sm:$0xff]   ;;  %v661_v22 = vld [vmem:[%s837_s0 + $0x10] ss:$8 sps:$4 sm:$0xff]  }
   0x8   :  { %559 = vmatprep.subr.bf16.mxu0 %v639_v4  ;;  %621 = vmatprep.subr.bf16.mxu1 %v639_v4  ;;  %v648_v15 = vld [vmem:[%s836_s1 + $0x8] sm:$0xff]   ;;  %v650_v17 = vld [vmem:[%s836_s1] sm:$0xff]   ;;  %v662_v23 = vld [vmem:[%s837_s0 + $0x50] ss:$8 sps:$4 sm:$0xff]  }
   0x9   :  { %310 = vmatprep.mubr.bf16.mxu1 %v656_v12  ;;  %v663_v24 = vld [vmem:[%s837_s0 + $0x24] ss:$8 sps:$4 sm:$0xff]   ;;  %v667_v26 = vld [vmem:[%s837_s0 + $0x20] ss:$8 sps:$4 sm:$0xff]   ;;  %v669_v28 = vld [vmem:[%s837_s0 + $0x34] ss:$8 sps:$4 sm:$0xff]  }
   0xa   :  { %v665_v25 = vld [vmem:[%s837_s0 + $0x64] ss:$8 sps:$4 sm:$0xff]   ;;  %v668_v27 = vld [vmem:[%s837_s0 + $0x60] ss:$8 sps:$4 sm:$0xff]   ;;  %v671_v29 = vld [vmem:[%s837_s0 + $0x74] ss:$8 sps:$4 sm:$0xff]  }
   0xb   :  { %560 = vmatpush3.bf16.msra.mxu0 %v640_v5  ;;  %629 = vmatpush3.bf16.msra.mxu1 %v640_v5  ;;  %v673_v30 = vld [vmem:[%s837_s0 + $0x30] ss:$8 sps:$4 sm:$0xff]   ;;  %v794_v36 = vld [vmem:[%s838_s2] ss:$0 sm:$0xff] }
   0xc   :  { %561 = vmatprep.subr.bf16.mxu0 %v641_v6  ;;  %622 = vmatprep.subr.bf16.mxu1 %v641_v6  ;;  %v674_v31 = vld [vmem:[%s837_s0 + $0x70] ss:$8 sps:$4 sm:$0xff]  }
   0xf   :  { %562 = vmatpush3.bf16.msra.mxu0 %v642_v7  ;;  %630 = vmatpush3.bf16.msra.mxu1 %v642_v7 }
  0x10   :  { %563 = vmatprep.subr.bf16.mxu0 %v643_v8  ;;  %623 = vmatprep.subr.bf16.mxu1 %v643_v8 }
  0x13   :  { %564 = vmatpush3.bf16.msra.mxu0 %v644_v9  ;;  %631 = vmatpush3.bf16.msra.mxu1 %v644_v9 }
  0x14   :  { %565 = vmatprep.subr.bf16.mxu0 %v645_v10  ;;  %624 = vmatprep.subr.bf16.mxu1 %v645_v10 }
  0x17   :  { %566 = vmatpush3.bf16.msra.mxu0 %v646_v13  ;;  %632 = vmatpush3.bf16.msra.mxu1 %v646_v13 }
  0x18   :  { %567 = vmatprep.subr.bf16.mxu0 %v647_v14  ;;  %625 = vmatprep.subr.bf16.mxu1 %v647_v14 }
  0x1b   :  { %568 = vmatpush3.bf16.msra.mxu0 %v648_v15  ;;  %633 = vmatpush3.bf16.msra.mxu1 %v648_v15 }
  0x1c   :  { %569 = vmatprep.subr.bf16.mxu0 %v649_v16  ;;  %626 = vmatprep.subr.bf16.mxu1 %v649_v16 }
  0x1f   :  { %570 = vmatpush3.bf16.msra.mxu0 %v650_v17  ;;  %634 = vmatpush3.bf16.msra.mxu1 %v650_v17 }
  0x22   :  { %279 = vmatmul.mubr.bf16.vlgmr.msra.gmra.mxu0 %v651_v18  ;;  %311 = vmatmul.mubr.bf16.vlgmr.msra.gmra.mxu1 %v654_v19 }
  0x23   :  { %286 = vmatprep.mubr.bf16.mxu0 %v657_v20  ;;  %318 = vmatprep.mubr.bf16.mxu1 %v659_v21 }
  0x2a   :  { %287 = vmatmul.mubr.bf16.gmra.mxu0 %v661_v22  ;;  %319 = vmatmul.mubr.bf16.gmra.mxu1 %v662_v23 }
  0x2b   :  { %294 = vmatprep.mubr.bf16.mxu0 %v663_v24  ;;  %326 = vmatprep.mubr.bf16.mxu1 %v665_v25 }
  0x32   :  { %295 = vmatmul.mubr.bf16.gmra.mxu0 %v667_v26  ;;  %327 = vmatmul.mubr.bf16.gmra.mxu1 %v668_v27 }
  0x33   :  { %302 = vmatprep.mubr.bf16.mxu0 %v669_v28  ;;  %334 = vmatprep.mubr.bf16.mxu1 %v671_v29 }
  0x3a   :  { %303 = vmatmul.mubr.bf16.gmra.mxu0 %v673_v30  ;;  %335 = vmatmul.mubr.bf16.gmra.mxu1 %v674_v31 }
  0xe2   :  { %v571_v32 = vpop.f32.mrf.mxu0  ;;  %v595_v33 = vpop.f32.mrf.mxu1 }
  0xe4   :  { %v572_v34 = vpop.f32.mrf.mxu0  ;;  %v596_v35 = vpop.f32.mrf.mxu1 }
  0xe5   :  { %v573_v37 = vadd.f32 %v572_v34, %v571_v32  ;;  %v597_v38 = vadd.f32 %v596_v35, %v595_v33 }
  0xe6   :  { %v574_v39 = vpop.f32.mrf.mxu0  ;;  %v598_v40 = vpop.f32.mrf.mxu1 }
  0xe7   :  { %v281_v41 = vadd.f32 %v573_v37, %v794_v36  ;;  %v313_v42 = vadd.f32 %v597_v38, %v794_v36 }
  0xe8   :  { %v575_v43 = vpop.f32.mrf.mxu0  ;;  %v599_v44 = vpop.f32.mrf.mxu1 }
  0xe9   :  { %v576_v45 = vadd.f32 %v575_v43, %v574_v39  ;;  %v600_v46 = vadd.f32 %v599_v44, %v598_v40  ;;  %v343_v51 = vmax.f32 %v281_v41, 0.0  ;;  %v351_v52 = vmax.f32 %v313_v42, 0.0 }
  0xea   :  { %v577_v47 = vpop.f32.mrf.mxu0  ;;  %v601_v48 = vpop.f32.mrf.mxu1 }
  0xeb   :  { %v284_v49 = vadd.f32 %v576_v45, %v794_v36  ;;  %v316_v50 = vadd.f32 %v600_v46, %v794_v36 }
  0xec   :  { %v578_v53 = vpop.f32.mrf.mxu0  ;;  %v602_v54 = vpop.f32.mrf.mxu1 }
  0xed   :  { %v344_v55 = vmax.f32 %v284_v49, 0.0  ;;  %v352_v56 = vmax.f32 %v316_v50, 0.0  ;;  %v579_v57 = vadd.f32 %v578_v53, %v577_v47  ;;  %v603_v58 = vadd.f32 %v602_v54, %v601_v48 }
  0xee   :  { %v580_v59 = vpop.f32.mrf.mxu0  ;;  %v604_v60 = vpop.f32.mrf.mxu1 }
  0xef   :  { %v511_v61 = vpack.c.bf16 %v344_v55, %v343_v51  ;;  %v531_v62 = vpack.c.bf16 %v352_v56, %v351_v52  ;;  %v289_v63 = vadd.f32 %v579_v57, %v794_v36  ;;  %v321_v0 = vadd.f32 %v603_v58, %v794_v36 }
  0xf0   :  { %v581_v1 = vpop.f32.mrf.mxu0  ;;  %v605_v2 = vpop.f32.mrf.mxu1 }
  0xf1   :  { %512 = vst [vmem:[%s839_s3] sm:$0xff] %v511_v61   ;;  %551 = vst [vmem:[%s839_s3 + $0x20] sm:$0xff] %v531_v62   ;;  %v582_v3 = vadd.f32 %v581_v1, %v580_v59  ;;  %v606_v4 = vadd.f32 %v605_v2, %v604_v60  ;;  %v345_v9 = vmax.f32 %v289_v63, 0.0  ;;  %v353_v10 = vmax.f32 %v321_v0, 0.0 }
  0xf2   :  { %v583_v5 = vpop.f32.mrf.mxu0  ;;  %v607_v6 = vpop.f32.mrf.mxu1 }
  0xf3   :  { %v292_v7 = vadd.f32 %v582_v3, %v794_v36  ;;  %v324_v8 = vadd.f32 %v606_v4, %v794_v36 }
  0xf4   :  { %v584_v11 = vpop.f32.mrf.mxu0  ;;  %v608_v12 = vpop.f32.mrf.mxu1 }
  0xf5   :  { %v346_v13 = vmax.f32 %v292_v7, 0.0  ;;  %v354_v14 = vmax.f32 %v324_v8, 0.0  ;;  %v585_v15 = vadd.f32 %v584_v11, %v583_v5  ;;  %v609_v16 = vadd.f32 %v608_v12, %v607_v6 }
  0xf6   :  { %v586_v17 = vpop.f32.mrf.mxu0  ;;  %v610_v18 = vpop.f32.mrf.mxu1 }
  0xf7   :  { %v516_v19 = vpack.c.bf16 %v346_v13, %v345_v9  ;;  %v536_v20 = vpack.c.bf16 %v354_v14, %v353_v10  ;;  %v297_v21 = vadd.f32 %v585_v15, %v794_v36  ;;  %v329_v22 = vadd.f32 %v609_v16, %v794_v36 }
  0xf8   :  { %v587_v23 = vpop.f32.mrf.mxu0  ;;  %v611_v24 = vpop.f32.mrf.mxu1 }
  0xf9   :  { %548 = vst [vmem:[%s839_s3 + $0x8] sm:$0xff] %v516_v19   ;;  %552 = vst [vmem:[%s839_s3 + $0x28] sm:$0xff] %v536_v20   ;;  %v588_v25 = vadd.f32 %v587_v23, %v586_v17  ;;  %v612_v26 = vadd.f32 %v611_v24, %v610_v18  ;;  %v347_v31 = vmax.f32 %v297_v21, 0.0  ;;  %v355_v32 = vmax.f32 %v329_v22, 0.0 }
  0xfa   :  { %v589_v27 = vpop.f32.mrf.mxu0  ;;  %v613_v28 = vpop.f32.mrf.mxu1 }
  0xfb   :  { %v300_v29 = vadd.f32 %v588_v25, %v794_v36  ;;  %v332_v30 = vadd.f32 %v612_v26, %v794_v36 }
  0xfc   :  { %v590_v33 = vpop.f32.mrf.mxu0  ;;  %v614_v34 = vpop.f32.mrf.mxu1 }
  0xfd   :  { %v348_v35 = vmax.f32 %v300_v29, 0.0  ;;  %v356_v37 = vmax.f32 %v332_v30, 0.0  ;;  %v591_v38 = vadd.f32 %v590_v33, %v589_v27  ;;  %v615_v39 = vadd.f32 %v614_v34, %v613_v28 }
  0xfe   :  { %v592_v40 = vpop.f32.mrf.mxu0  ;;  %v616_v41 = vpop.f32.mrf.mxu1 }
  0xff   :  { %v521_v42 = vpack.c.bf16 %v348_v35, %v347_v31  ;;  %v541_v43 = vpack.c.bf16 %v356_v37, %v355_v32  ;;  %v305_v46 = vadd.f32 %v591_v38, %v794_v36  ;;  %v337_v47 = vadd.f32 %v615_v39, %v794_v36 }
 0x100   :  { %v593_v44 = vpop.f32.mrf.mxu0  ;;  %v617_v45 = vpop.f32.mrf.mxu1 }
 0x101   :  { %549 = vst [vmem:[%s839_s3 + $0x10] sm:$0xff] %v521_v42   ;;  %553 = vst [vmem:[%s839_s3 + $0x30] sm:$0xff] %v541_v43   ;;  %v594_v48 = vadd.f32 %v593_v44, %v592_v40  ;;  %v618_v49 = vadd.f32 %v617_v45, %v616_v41  ;;  %v349_v52 = vmax.f32 %v305_v46, 0.0  ;;  %v357_v53 = vmax.f32 %v337_v47, 0.0 }
 0x103   :  { %v308_v50 = vadd.f32 %v594_v48, %v794_v36  ;;  %v340_v51 = vadd.f32 %v618_v49, %v794_v36 }
 0x105   :  { %v350_v54 = vmax.f32 %v308_v50, 0.0  ;;  %v358_v55 = vmax.f32 %v340_v51, 0.0 }
 0x107   :  { %v526_v56 = vpack.c.bf16 %v350_v54, %v349_v52  ;;  %v546_v57 = vpack.c.bf16 %v358_v55, %v357_v53 }
 0x109   :  { %550 = vst [vmem:[%s839_s3 + $0x18] sm:$0xff] %v526_v56   ;;  %554 = vst [vmem:[%s839_s3 + $0x38] sm:$0xff] %v546_v57  }

// kernel: opt_resnet_forward.40
= control target key start
LH: loop header
LB: loop body
LE: loop exit
PB: predicated region body
PF: predicated region fallthrough
CT: control target
= control target key end

     0   :  { %s1025_s15 = smov 0   ;;  %s1027_s16 = smov 0   ;;  %s1164_s0 = inlined_call_operand.vmem [shape: bf16[32,128], index: 0, kind: input, shape index: {}]   ;;  %s1165_s1 = inlined_call_operand.vmem [shape: bf16[128,512], index: 1, kind: input, shape index: {}]   ;;  %s1166_s2 = inlined_call_operand.vmem [shape: f32[1,512], index: 2, kind: input, shape index: {}]   ;;  %s1167_s3 = inlined_call_operand.vmem [shape: bf16[32,512], index: 3, kind: input, shape index: {}]   ;;  %s1168_s4 = inlined_call_operand.vmem [shape: bf16[32,512], index: 4, kind: output, shape index: {}]  }
   0x1   :  { %s1029_s17 = smov 0   ;;  %s1031_s18 = smov 0  }
   0x2   :  { %s1033_s19 = smov 0  }
   0x3 LB: > { %s23_s20 = sadd.s32 1, %s993_s18  ;;  %s826_s21 = sadd.s32 4294967295, %s997_s19   ;;  %s997_s19 = sphi %s1033_s19, %s14_s19   ;;  %s993_s18 = sphi %s1031_s18, %s1174_s18   ;;  %s989_s17 = sphi %s1029_s17, %s1173_s17   ;;  %s985_s16 = sphi %s1027_s16, %s1172_s16   ;;  %s981_s15 = sphi %s1025_s15, %s1171_s15  }
   0x4   : > { %p24_p0 = scmp.ge.s32.totalorder %s23_s20, 2  ;;  %p66_p1 = scmp.ne.s32.totalorder %s985_s16, %s981_s15 }
   0x5   : > { %p67_p2 = scmp.eq.s32.totalorder %s997_s19, 0  ;;  %p152_p4 = scmp.eq.s32.totalorder %s826_s21, 1 }
   0x6   : > { %s1176_s20 = smov (%p24_p0, %s23_s20), 0  ;;  %s59_s24 = sadd.s32 1, %s985_s16 }
   0x7   : > { %p1057_p3 = por %p67_p2, %p66_p1  ;;  %s56_s23 = ssub.s32 %s993_s18, %s1176_s20 }
   0x8   : > { %p57_p5 = scmp.eq.s32.totalorder %s56_s23, 0  ;;  %p1064_p6 = por %p152_p4, %p66_p1 }
   0x9   : > { %p830_p7 = scmp.ge.s32.totalorder %s997_s19, 2 }
   0xa   : > { %s1069_s26 = scalar_select %p57_p5, %s985_s16, %s59_s24  }
   0xb   : > { %183 = sbr.rel (%p830_p7) target bundleno = 34 (0x22), region = 20 }
  0x10   : > { %186 = sbr.rel (!%p1057_p3) target bundleno = 28 (0x1c), region = 24  ;;  %s188_s27 = sand.u32 (%p1057_p3), 1, %s985_s16  }
  0x11   : > { %s869_s28 = sshll.u32 (%p1057_p3), %s993_s18, 3  ;;  %s831_s29 = sshll.u32 (%p1057_p3), %s188_s27, 7 }
  0x12   : > { %s1079_s6 = scalar_lea.vmem (%p1057_p3), %s1165_s1, %s869_s28  ;;  %s190_s7 = scalar_lea.vmem (%p1057_p3), [#allocation2], %s831_s29 }
  0x13   : > { %v252_v0 = vld [vmem:[%s1079_s6] sm:$0xff] (%p1057_p3)  ;;  %v254_v1 = vld [vmem:[%s1079_s6 + $0x10] sm:$0xff] (%p1057_p3) }
  0x14   : > { %v256_v2 = vld [vmem:[%s1079_s6 + $0x20] sm:$0xff] (%p1057_p3)  ;;  %253 = vst [vmem:[%s190_s7] sm:$0xff] (%p1057_p3), %v252_v0  ;;  %255 = vst [vmem:[%s190_s7 + $0x8] sm:$0xff] (%p1057_p3), %v254_v1  ;;  %v258_v3 = vld [vmem:[%s1079_s6 + $0x30] sm:$0xff] (%p1057_p3) }
  0x15   : > { %257 = vst [vmem:[%s190_s7 + $0x10] sm:$0xff] %v256_v2  ;;  %v260_v4 = vld [vmem:[%s1079_s6 + $0x40] sm:$0xff]  ;;  %v262_v5 = vld [vmem:[%s1079_s6 + $0x50] sm:$0xff]  ;;  %259 = vst [vmem:[%s190_s7 + $0x18] sm:$0xff] %v258_v3 }
  0x16   : > { %261 = vst [vmem:[%s190_s7 + $0x20] sm:$0xff] %v260_v4  ;;  %263 = vst [vmem:[%s190_s7 + $0x28] sm:$0xff] %v262_v5  ;;  %v264_v6 = vld [vmem:[%s1079_s6 + $0x60] sm:$0xff]  ;;  %v266_v7 = vld [vmem:[%s1079_s6 + $0x70] sm:$0xff] }
  0x17   : > { %v268_v8 = vld [vmem:[%s1079_s6 + $0x80] sm:$0xff]  ;;  %265 = vst [vmem:[%s190_s7 + $0x30] sm:$0xff] %v264_v6  ;;  %267 = vst [vmem:[%s190_s7 + $0x38] sm:$0xff] %v266_v7  ;;  %v270_v9 = vld [vmem:[%s1079_s6 + $0x90] sm:$0xff] }
  0x18   : > { %269 = vst [vmem:[%s190_s7 + $0x40] sm:$0xff] %v268_v8  ;;  %v272_v10 = vld [vmem:[%s1079_s6 + $0xa0] sm:$0xff]  ;;  %v274_v11 = vld [vmem:[%s1079_s6 + $0xb0] sm:$0xff]  ;;  %271 = vst [vmem:[%s190_s7 + $0x48] sm:$0xff] %v270_v9 }
  0x19   : > { %273 = vst [vmem:[%s190_s7 + $0x50] sm:$0xff] %v272_v10  ;;  %275 = vst [vmem:[%s190_s7 + $0x58] sm:$0xff] %v274_v11  ;;  %v276_v12 = vld [vmem:[%s1079_s6 + $0xc0] sm:$0xff]  ;;  %v278_v13 = vld [vmem:[%s1079_s6 + $0xd0] sm:$0xff] }
  0x1a   : > { %v280_v14 = vld [vmem:[%s1079_s6 + $0xe0] sm:$0xff]  ;;  %277 = vst [vmem:[%s190_s7 + $0x60] sm:$0xff] %v276_v12  ;;  %279 = vst [vmem:[%s190_s7 + $0x68] sm:$0xff] %v278_v13  ;;  %v282_v15 = vld [vmem:[%s1079_s6 + $0xf0] sm:$0xff] }
  0x1b   : > { %281 = vst [vmem:[%s190_s7 + $0x70] sm:$0xff] %v280_v14  ;;  %283 = vst [vmem:[%s190_s7 + $0x78] sm:$0xff] %v282_v15 }
  0x1c PF: > { %297 = sbr.rel (!%p1057_p3) target bundleno = 34 (0x22), region = 66  ;;  %s299_s8 = sand.u32 (%p1057_p3), 1, %s985_s16  }
  0x1d   : > { %s870_s9 = sshll.u32 (%p1057_p3), %s993_s18, 3  ;;  %s834_s10 = sshll.u32 (%p1057_p3), %s299_s8, 5 }
  0x1e   : > { %s307_s13 = scalar_lea.vmem (%p1057_p3), %s1167_s3, %s870_s9  ;;  %s301_s14 = scalar_lea.vmem (%p1057_p3), [#allocation3], %s834_s10 }
  0x1f   : > { %v342_v16 = vld [vmem:[%s307_s13] sm:$0xff] (%p1057_p3)  ;;  %v344_v17 = vld [vmem:[%s307_s13 + $0x10] sm:$0xff] (%p1057_p3) }
  0x20   : > { %v346_v18 = vld [vmem:[%s307_s13 + $0x20] sm:$0xff] (%p1057_p3)  ;;  %343 = vst [vmem:[%s301_s14] sm:$0xff] (%p1057_p3), %v342_v16  ;;  %345 = vst [vmem:[%s301_s14 + $0x8] sm:$0xff] (%p1057_p3), %v344_v17  ;;  %v348_v19 = vld [vmem:[%s307_s13 + $0x30] sm:$0xff] (%p1057_p3) }
  0x21   : > { %347 = vst [vmem:[%s301_s14 + $0x10] sm:$0xff] %v346_v18  ;;  %349 = vst [vmem:[%s301_s14 + $0x18] sm:$0xff] %v348_v19 }
  0x22 PF: > { %p837_p8 = scmp.ge.s32.totalorder %s997_s19, 1  ;;  %p354_p9 = scmp.lt.s32.totalorder %s997_s19, 3 }
  0x24   : > { %p355_p10 = pnand %p837_p8, %p354_p9 }
  0x25   : > { %s361_s21 = sand.u32 (!%p355_p10), 1, %s981_s15   ;;  %s841_s30 = sshll.u32 (!%p355_p10), %s989_s17, 1 }
  0x26   : > { %358 = sbr.rel (%p355_p10) target bundleno = 293 (0x125), region = 104  ;;  %s838_s22 = sshll.u32 (!%p355_p10), %s361_s21, 7 }
  0x27   : > { %s1109_s23 = scalar_lea.vmem (!%p355_p10), [#allocation2], %s838_s22  ;;  %p413_p11 = scmp.lt.s32.totalorder (!%p355_p10), %s841_s30, 3 }
  0x28   : > { %s1136_s5 = sshll.u32 (!%p355_p10), %s361_s21, 5 }
  0x29   : > { %s370_s9 = scalar_lea.vmem (!%p355_p10), [#allocation3], %s1136_s5  ;;  %s404_s15 = scalar_lea.vmem (!%p355_p10), [#allocation4], %s1136_s5 }
  0x2b   : > { %v999_v20 = vmov 0   ;;  %v933_v21 = vld [vmem:[%s1109_s23 + $0x74] ss:$8 sps:$4 sm:$0xff]   ;;  %v935_v22 = vld [vmem:[%s1109_s23 + $0x70] ss:$8 sps:$4 sm:$0xff]   ;;  %v957_v37 = vld [vmem:[%s1164_s0] sm:$0xff]   ;;  %v444_v39 = vlaneseq }
  0x2c   : > { %578 = vmatprep.mubr.bf16.mxu0 %v999_v20  ;;  %588 = vmatprep.mubr.bf16.mxu1 %v999_v20  ;;  %v936_v23 = vld [vmem:[%s1109_s23 + $0x64] ss:$8 sps:$4 sm:$0xff]   ;;  %v938_v24 = vld [vmem:[%s1109_s23 + $0x60] ss:$8 sps:$4 sm:$0xff]   ;;  %v939_v25 = vld [vmem:[%s1109_s23 + $0x54] ss:$8 sps:$4 sm:$0xff]  }
  0x2d   : > { %546 = vmatprep.subr.bf16.mxu0 %v933_v21  ;;  %876 = vmatprep.subr.bf16.mxu1 %v933_v21  ;;  %v941_v26 = vld [vmem:[%s1109_s23 + $0x50] ss:$8 sps:$4 sm:$0xff]   ;;  %v942_v27 = vld [vmem:[%s1109_s23 + $0x44] ss:$8 sps:$4 sm:$0xff]   ;;  %v944_v28 = vld [vmem:[%s1109_s23 + $0x40] ss:$8 sps:$4 sm:$0xff]  }
  0x2e   : > { %547 = vmatpush1.bf16.msra.mxu0 %v935_v22  ;;  %884 = vmatpush1.bf16.msra.mxu1 %v935_v22  ;;  %v945_v29 = vld [vmem:[%s1109_s23 + $0x34] ss:$8 sps:$4 sm:$0xff]   ;;  %v947_v30 = vld [vmem:[%s1109_s23 + $0x30] ss:$8 sps:$4 sm:$0xff]   ;;  %v948_v31 = vld [vmem:[%s1109_s23 + $0x24] ss:$8 sps:$4 sm:$0xff]  }
  0x2f   : > { %548 = vmatprep.subr.bf16.mxu0 %v936_v23  ;;  %877 = vmatprep.subr.bf16.mxu1 %v936_v23  ;;  %v950_v32 = vld [vmem:[%s1109_s23 + $0x20] ss:$8 sps:$4 sm:$0xff]   ;;  %v951_v33 = vld [vmem:[%s1109_s23 + $0x14] ss:$8 sps:$4 sm:$0xff]   ;;  %v953_v34 = vld [vmem:[%s1109_s23 + $0x10] ss:$8 sps:$4 sm:$0xff]  }
  0x30   : > { %v954_v35 = vld [vmem:[%s1109_s23 + $0x4] ss:$8 sps:$4 sm:$0xff]   ;;  %v956_v36 = vld [vmem:[%s1109_s23] ss:$8 sps:$4 sm:$0xff]   ;;  %s1178_s30 = smov (!%p413_p11, %s841_s30), 3  ;;  %v445_v40 = vshrl.u32 %v444_v39, 7 }
  0x31   : > { %v958_v38 = vld [vmem:[%s1164_s0 + $0x8] sm:$0xff]   ;;  %s415_s8 = scalar_lea.vmem %s1166_s2, %s1178_s30  ;;  %v599_v44 = vld [vmem:[%s370_s9] sm:$0xff]  ;;  %v601_v45 = vld [vmem:[%s370_s9 + $0x10] sm:$0xff]  ;;  %s875_s10 = sshll.u32 (%p1064_p6), %s989_s17, 3 }
  0x32   : > { %549 = vmatpush1.bf16.msra.mxu0 %v938_v24  ;;  %885 = vmatpush1.bf16.msra.mxu1 %v938_v24  ;;  %v446_v41 = vsub.s32 0, %v445_v40  ;;  %v442_v42 = vld [vmem:[%s415_s8] sm:$0x3]  ;;  %v450_v43 = vsub.s32 1, %v445_v40  ;;  %v603_v47 = vunpack.c.l.bf16 %v599_v44  ;;  %v607_v48 = vunpack.c.l.bf16 %v601_v45  ;;  %v600_v56 = vld [vmem:[%s370_s9 + $0x8] sm:$0xff]  ;;  %v602_v57 = vld [vmem:[%s370_s9 + $0x18] sm:$0xff]  ;;  %s667_s13 = scalar_lea.vmem (%p1064_p6), %s1168_s4, %s875_s10 }
  0x33   : > { %550 = vmatprep.subr.bf16.mxu0 %v939_v25  ;;  %878 = vmatprep.subr.bf16.mxu1 %v939_v25  ;;  %v604_v54 = vunpack.c.h.bf16 %v599_v44  ;;  %v608_v55 = vunpack.c.h.bf16 %v601_v45  ;;  %v605_v1 = vunpack.c.l.bf16 %v600_v56  ;;  %v609_v3 = vunpack.c.l.bf16 %v602_v57 }
  0x34   : > { %v447_v46 = vrot.slane %v442_v42, %v446_v41  ;;  %v451_v49 = vrot.slane %v442_v42, %v450_v43  ;;  %v606_v6 = vunpack.c.h.bf16 %v600_v56  ;;  %v610_v7 = vunpack.c.h.bf16 %v602_v57 }
  0x36   : > { %551 = vmatpush1.bf16.msra.mxu0 %v941_v26  ;;  %886 = vmatpush1.bf16.msra.mxu1 %v941_v26 }
  0x37   : > { %552 = vmatprep.subr.bf16.mxu0 %v942_v27  ;;  %879 = vmatprep.subr.bf16.mxu1 %v942_v27 }
  0x3a   : > { %553 = vmatpush1.bf16.msra.mxu0 %v944_v28  ;;  %887 = vmatpush1.bf16.msra.mxu1 %v944_v28 }
  0x3b   : > { %554 = vmatprep.subr.bf16.mxu0 %v945_v29  ;;  %880 = vmatprep.subr.bf16.mxu1 %v945_v29 }
  0x3e   : > { %555 = vmatpush1.bf16.msra.mxu0 %v947_v30  ;;  %888 = vmatpush1.bf16.msra.mxu1 %v947_v30 }
  0x3f   : > { %556 = vmatprep.subr.bf16.mxu0 %v948_v31  ;;  %881 = vmatprep.subr.bf16.mxu1 %v948_v31 }
  0x42   : > { %557 = vmatpush1.bf16.msra.mxu0 %v950_v32  ;;  %889 = vmatpush1.bf16.msra.mxu1 %v950_v32 }
  0x43   : > { %558 = vmatprep.subr.bf16.mxu0 %v951_v33  ;;  %882 = vmatprep.subr.bf16.mxu1 %v951_v33 }
  0x46   : > { %559 = vmatpush1.bf16.msra.mxu0 %v953_v34  ;;  %890 = vmatpush1.bf16.msra.mxu1 %v953_v34 }
  0x47   : > { %560 = vmatprep.subr.bf16.mxu0 %v954_v35  ;;  %883 = vmatprep.subr.bf16.mxu1 %v954_v35 }
  0x4a   : > { %561 = vmatpush1.bf16.msra.mxu0 %v956_v36  ;;  %891 = vmatpush1.bf16.msra.mxu1 %v956_v36 }
  0x4d   : > { %579 = vmatmul.mubr.bf16.vlgmr.msra.gmra.mxu0 %v957_v37  ;;  %589 = vmatmul.mubr.bf16.vlgmr.msra.gmra.mxu1 %v958_v38 }
 0x10d   : > { %v580_v50 = vpop.f32.mrf.mxu0  ;;  %v590_v51 = vpop.f32.mrf.mxu1 }
 0x10e   : > { %v581_v52 = vadd.f32 %v580_v50, %v447_v46  ;;  %v591_v53 = vadd.f32 %v590_v51, %v447_v46 }
 0x10f   : > { %v582_v58 = vpop.f32.mrf.mxu0  ;;  %v592_v59 = vpop.f32.mrf.mxu1 }
 0x110   : > { %v611_v60 = vadd.f32 %v603_v47, %v581_v52  ;;  %v615_v61 = vadd.f32 %v607_v48, %v591_v53  ;;  %v583_v62 = vadd.f32 %v582_v58, %v451_v49  ;;  %v593_v63 = vadd.f32 %v592_v59, %v451_v49 }
 0x111   : > { %v584_v0 = vpop.f32.mrf.mxu0  ;;  %v594_v2 = vpop.f32.mrf.mxu1 }
 0x112   : > { %v612_v4 = vadd.f32 %v604_v54, %v583_v62  ;;  %v616_v5 = vadd.f32 %v608_v55, %v593_v63  ;;  %v619_v8 = vmax.f32 %v611_v60, 0.0  ;;  %v623_v9 = vmax.f32 %v615_v61, 0.0 }
 0x113   : > { %v585_v10 = vadd.f32 %v584_v0, %v447_v46  ;;  %v595_v11 = vadd.f32 %v594_v2, %v447_v46  ;;  %v586_v12 = vpop.f32.mrf.mxu0  ;;  %v596_v13 = vpop.f32.mrf.mxu1 }
 0x114   : > { %v620_v14 = vmax.f32 %v612_v4, 0.0  ;;  %v624_v15 = vmax.f32 %v616_v5, 0.0  ;;  %v587_v16 = vadd.f32 %v586_v12, %v451_v49  ;;  %v597_v17 = vadd.f32 %v596_v13, %v451_v49 }
 0x115   : > { %v613_v18 = vadd.f32 %v605_v1, %v585_v10  ;;  %v617_v19 = vadd.f32 %v609_v3, %v595_v11 }
 0x116   : > { %v871_v20 = vpack.c.bf16 %v620_v14, %v619_v8  ;;  %v873_v21 = vpack.c.bf16 %v624_v15, %v623_v9  ;;  %v614_v22 = vadd.f32 %v606_v6, %v587_v16  ;;  %v618_v23 = vadd.f32 %v610_v7, %v597_v17 }
 0x117   : > { %v621_v24 = vmax.f32 %v613_v18, 0.0  ;;  %v625_v25 = vmax.f32 %v617_v19, 0.0 }
 0x118   : > { %651 = vst [vmem:[%s404_s15] sm:$0xff] %v871_v20  ;;  %653 = vst [vmem:[%s404_s15 + $0x10] sm:$0xff] %v873_v21  ;;  %v622_v26 = vmax.f32 %v614_v22, 0.0  ;;  %v626_v27 = vmax.f32 %v618_v23, 0.0  ;;  %661 = sbr.rel (!%p1064_p6) target bundleno = 293 (0x125), region = 116 }
 0x11a   : > { %v872_v28 = vpack.c.bf16 %v622_v26, %v621_v24  ;;  %v874_v29 = vpack.c.bf16 %v626_v27, %v625_v25 }
 0x11c   : > { %652 = vst [vmem:[%s404_s15 + $0x8] sm:$0xff] %v872_v28  ;;  %654 = vst [vmem:[%s404_s15 + $0x18] sm:$0xff] %v874_v29 }
 0x11f   : > { %v702_v30 = vld [vmem:[%s404_s15] sm:$0xff]  ;;  %v706_v32 = vld [vmem:[%s404_s15 + $0x10] sm:$0xff] }
 0x120   : > { %703 = vst [vmem:[%s667_s13] sm:$0xff] %v702_v30  ;;  %707 = vst [vmem:[%s667_s13 + $0x20] sm:$0xff] %v706_v32 }
 0x123   : > { %v704_v31 = vld [vmem:[%s404_s15 + $0x8] sm:$0xff]  ;;  %v708_v33 = vld [vmem:[%s404_s15 + $0x18] sm:$0xff] }
 0x124   : > { %705 = vst [vmem:[%s667_s13 + $0x10] sm:$0xff] %v704_v31  ;;  %709 = vst [vmem:[%s667_s13 + $0x30] sm:$0xff] %v708_v33 }
 0x125 PF: > { %s14_s19 = sadd.s32 1, %s997_s19   ;;  %s1171_s15 = smov %s985_s16 }
 0x126   : > { %p11_p12 = scmp.ge.s32.totalorder %s14_s19, 4   ;;  %s1172_s16 = smov %s1069_s26 }
 0x127   : > { %s1173_s17 = smov %s993_s18  ;;  %s1174_s18 = smov %s1176_s20 }
 0x128   :  { %13 = sbr.rel (!%p11_p12) target bundleno = 3 (0x3), region = 199 }

// kernel: opt_resnet_forward.37
= control target key start
LH: loop header
LB: loop body
LE: loop exit
PB: predicated region body
PF: predicated region fallthrough
CT: control target
= control target key end

     0   :  { %s1094_s12 = smov 0   ;;  %s1096_s13 = smov 0   ;;  %s1288_s0 = inlined_call_operand.vmem [shape: bf16[32,256], index: 0, kind: input, shape index: {}]   ;;  %s1289_s1 = inlined_call_operand.vmem [shape: bf16[256,512], index: 1, kind: input, shape index: {}]   ;;  %s1290_s2 = inlined_call_operand.vmem [shape: f32[1,512], index: 2, kind: input, shape index: {}]   ;;  %s1291_s3 = inlined_call_operand.vmem [shape: bf16[32,512], index: 3, kind: output, shape index: {}]  }
   0x1   :  { %s1098_s14 = smov 0   ;;  %s1100_s15 = smov 0  }
   0x2   :  { %s1102_s16 = smov 0  }
   0x3 LB: > { %s22_s17 = sadd.s32 1, %s1068_s15  ;;  %s845_s18 = sadd.s32 4294967295, %s1072_s16   ;;  %s1072_s16 = sphi %s1102_s16, %s13_s16   ;;  %s1068_s15 = sphi %s1100_s15, %s1296_s15   ;;  %s1064_s14 = sphi %s1098_s14, %s1295_s14   ;;  %s1060_s13 = sphi %s1096_s13, %s1294_s13   ;;  %s1056_s12 = sphi %s1094_s12, %s1293_s12  }
   0x4   : > { %p23_p0 = scmp.ge.s32.totalorder %s22_s17, 2  ;;  %p65_p1 = scmp.ne.s32.totalorder %s1060_s13, %s1056_s12 }
   0x5   : > { %p66_p2 = scmp.eq.s32.totalorder %s1072_s16, 0  ;;  %p123_p4 = scmp.eq.s32.totalorder %s845_s18, 1 }
   0x6   : > { %s1298_s17 = smov (%p23_p0, %s22_s17), 0  ;;  %s58_s20 = sadd.s32 1, %s1060_s13 }
   0x7   : > { %p67_p3 = por %p66_p2, %p65_p1  ;;  %s55_s19 = ssub.s32 %s1068_s15, %s1298_s17 }
   0x8   : > { %p56_p5 = scmp.eq.s32.totalorder %s55_s19, 0  ;;  %p1129_p6 = por %p123_p4, %p65_p1 }
   0x9   : > { %p849_p7 = scmp.ge.s32.totalorder %s1072_s16, 2 }
   0xa   : > { %s1134_s22 = scalar_select %p56_p5, %s1060_s13, %s58_s20  }
   0xb   : > { %155 = sbr.rel (%p849_p7) target bundleno = 36 (0x24), region = 20 }
  0x10   : > { %158 = sbr.rel (!%p67_p3) target bundleno = 36 (0x24), region = 24  ;;  %s160_s23 = sand.u32 (%p67_p3), 1, %s1060_s13  }
  0x11   : > { %s902_s24 = sshll.u32 (%p67_p3), %s1068_s15, 3  ;;  %s850_s25 = sshll.u32 (%p67_p3), %s160_s23, 8 }
  0x12   : > { %s1142_s28 = scalar_lea.vmem (%p67_p3), %s1289_s1, %s902_s24  ;;  %s1147_s29 = scalar_lea.vmem (%p67_p3), [#allocation2], %s850_s25 }
  0x13   : > { %v256_v0 = vld [vmem:[%s1142_s28] sm:$0xff] (%p67_p3)  ;;  %v258_v1 = vld [vmem:[%s1142_s28 + $0x10] sm:$0xff] (%p67_p3) }
  0x14   : > { %v260_v2 = vld [vmem:[%s1142_s28 + $0x20] sm:$0xff] (%p67_p3)  ;;  %257 = vst [vmem:[%s1147_s29] sm:$0xff] (%p67_p3), %v256_v0  ;;  %259 = vst [vmem:[%s1147_s29 + $0x8] sm:$0xff] (%p67_p3), %v258_v1  ;;  %v262_v3 = vld [vmem:[%s1142_s28 + $0x30] sm:$0xff] (%p67_p3) }
  0x15   : > { %261 = vst [vmem:[%s1147_s29 + $0x10] sm:$0xff] %v260_v2  ;;  %v264_v4 = vld [vmem:[%s1142_s28 + $0x40] sm:$0xff]  ;;  %v266_v5 = vld [vmem:[%s1142_s28 + $0x50] sm:$0xff]  ;;  %263 = vst [vmem:[%s1147_s29 + $0x18] sm:$0xff] %v262_v3 }
  0x16   : > { %265 = vst [vmem:[%s1147_s29 + $0x20] sm:$0xff] %v264_v4  ;;  %267 = vst [vmem:[%s1147_s29 + $0x28] sm:$0xff] %v266_v5  ;;  %v268_v6 = vld [vmem:[%s1142_s28 + $0x60] sm:$0xff]  ;;  %v270_v7 = vld [vmem:[%s1142_s28 + $0x70] sm:$0xff] }
  0x17   : > { %v272_v8 = vld [vmem:[%s1142_s28 + $0x80] sm:$0xff]  ;;  %269 = vst [vmem:[%s1147_s29 + $0x30] sm:$0xff] %v268_v6  ;;  %271 = vst [vmem:[%s1147_s29 + $0x38] sm:$0xff] %v270_v7  ;;  %v274_v9 = vld [vmem:[%s1142_s28 + $0x90] sm:$0xff] }
  0x18   : > { %273 = vst [vmem:[%s1147_s29 + $0x40] sm:$0xff] %v272_v8  ;;  %v276_v10 = vld [vmem:[%s1142_s28 + $0xa0] sm:$0xff]  ;;  %v278_v11 = vld [vmem:[%s1142_s28 + $0xb0] sm:$0xff]  ;;  %275 = vst [vmem:[%s1147_s29 + $0x48] sm:$0xff] %v274_v9 }
  0x19   : > { %277 = vst [vmem:[%s1147_s29 + $0x50] sm:$0xff] %v276_v10  ;;  %279 = vst [vmem:[%s1147_s29 + $0x58] sm:$0xff] %v278_v11  ;;  %v280_v12 = vld [vmem:[%s1142_s28 + $0xc0] sm:$0xff]  ;;  %v282_v13 = vld [vmem:[%s1142_s28 + $0xd0] sm:$0xff] }
  0x1a   : > { %v284_v14 = vld [vmem:[%s1142_s28 + $0xe0] sm:$0xff]  ;;  %281 = vst [vmem:[%s1147_s29 + $0x60] sm:$0xff] %v280_v12  ;;  %283 = vst [vmem:[%s1147_s29 + $0x68] sm:$0xff] %v282_v13  ;;  %v286_v15 = vld [vmem:[%s1142_s28 + $0xf0] sm:$0xff] }
  0x1b   : > { %285 = vst [vmem:[%s1147_s29 + $0x70] sm:$0xff] %v284_v14  ;;  %v288_v16 = vld [vmem:[%s1142_s28 + $0x100] sm:$0xff]  ;;  %v290_v17 = vld [vmem:[%s1142_s28 + $0x110] sm:$0xff]  ;;  %287 = vst [vmem:[%s1147_s29 + $0x78] sm:$0xff] %v286_v15 }
  0x1c   : > { %289 = vst [vmem:[%s1147_s29 + $0x80] sm:$0xff] %v288_v16  ;;  %291 = vst [vmem:[%s1147_s29 + $0x88] sm:$0xff] %v290_v17  ;;  %v292_v18 = vld [vmem:[%s1142_s28 + $0x120] sm:$0xff]  ;;  %v294_v19 = vld [vmem:[%s1142_s28 + $0x130] sm:$0xff] }
  0x1d   : > { %v296_v20 = vld [vmem:[%s1142_s28 + $0x140] sm:$0xff]  ;;  %293 = vst [vmem:[%s1147_s29 + $0x90] sm:$0xff] %v292_v18  ;;  %295 = vst [vmem:[%s1147_s29 + $0x98] sm:$0xff] %v294_v19  ;;  %v298_v21 = vld [vmem:[%s1142_s28 + $0x150] sm:$0xff] }
  0x1e   : > { %297 = vst [vmem:[%s1147_s29 + $0xa0] sm:$0xff] %v296_v20  ;;  %v300_v22 = vld [vmem:[%s1142_s28 + $0x160] sm:$0xff]  ;;  %v302_v23 = vld [vmem:[%s1142_s28 + $0x170] sm:$0xff]  ;;  %299 = vst [vmem:[%s1147_s29 + $0xa8] sm:$0xff] %v298_v21 }
  0x1f   : > { %301 = vst [vmem:[%s1147_s29 + $0xb0] sm:$0xff] %v300_v22  ;;  %303 = vst [vmem:[%s1147_s29 + $0xb8] sm:$0xff] %v302_v23  ;;  %v304_v24 = vld [vmem:[%s1142_s28 + $0x180] sm:$0xff]  ;;  %v306_v25 = vld [vmem:[%s1142_s28 + $0x190] sm:$0xff] }
  0x20   : > { %v308_v26 = vld [vmem:[%s1142_s28 + $0x1a0] sm:$0xff]  ;;  %305 = vst [vmem:[%s1147_s29 + $0xc0] sm:$0xff] %v304_v24  ;;  %307 = vst [vmem:[%s1147_s29 + $0xc8] sm:$0xff] %v306_v25  ;;  %v310_v27 = vld [vmem:[%s1142_s28 + $0x1b0] sm:$0xff] }
  0x21   : > { %309 = vst [vmem:[%s1147_s29 + $0xd0] sm:$0xff] %v308_v26  ;;  %v312_v28 = vld [vmem:[%s1142_s28 + $0x1c0] sm:$0xff]  ;;  %v314_v29 = vld [vmem:[%s1142_s28 + $0x1d0] sm:$0xff]  ;;  %311 = vst [vmem:[%s1147_s29 + $0xd8] sm:$0xff] %v310_v27 }
  0x22   : > { %313 = vst [vmem:[%s1147_s29 + $0xe0] sm:$0xff] %v312_v28  ;;  %315 = vst [vmem:[%s1147_s29 + $0xe8] sm:$0xff] %v314_v29  ;;  %v316_v30 = vld [vmem:[%s1142_s28 + $0x1e0] sm:$0xff]  ;;  %v318_v31 = vld [vmem:[%s1142_s28 + $0x1f0] sm:$0xff] }
  0x23   : > { %317 = vst [vmem:[%s1147_s29 + $0xf0] sm:$0xff] %v316_v30  ;;  %319 = vst [vmem:[%s1147_s29 + $0xf8] sm:$0xff] %v318_v31 }
  0x24 PF: > { %p853_p8 = scmp.ge.s32.totalorder %s1072_s16, 1  ;;  %p332_p9 = scmp.lt.s32.totalorder %s1072_s16, 3 }
  0x26   : > { %p333_p10 = pnand %p853_p8, %p332_p9 }
  0x27   : > { %s339_s30 = sand.u32 (!%p333_p10), 1, %s1056_s12   ;;  %s856_s20 = sshll.u32 (!%p333_p10), %s1064_s14, 1 }
  0x28   : > { %336 = sbr.rel (%p333_p10) target bundleno = 323 (0x143), region = 66  ;;  %s854_s4 = sshll.u32 (!%p333_p10), %s339_s30, 8 }
  0x29   : > { %s1221_s9 = scalar_lea.vmem (!%p333_p10), [#allocation2], %s854_s4  ;;  %p380_p11 = scmp.lt.s32.totalorder (!%p333_p10), %s856_s20, 3 }
  0x2a   : > { %s855_s26 = sshll.u32 (!%p333_p10), %s339_s30, 5 }
  0x2b   : > { %s370_s27 = scalar_lea.vmem (!%p333_p10), [#allocation3], %s855_s26 }
  0x2d   : > { %v1030_v32 = vld [vmem:[%s1288_s0 + $0x4] ss:$8 sps:$4 sm:$0xff]   ;;  %v1033_v33 = vld [vmem:[%s1288_s0 + $0x14] ss:$8 sps:$4 sm:$0xff]   ;;  %v982_v35 = vld [vmem:[%s1221_s9 + $0x70] ss:$8 sps:$4 sm:$0xff]   ;;  %v424_v4 = vlaneseq }
  0x2e   : > { %v980_v34 = vld [vmem:[%s1221_s9 + $0x74] ss:$8 sps:$4 sm:$0xff]   ;;  %646 = vmatprep.mubr.bf16.mxu0 %v1030_v32  ;;  %656 = vmatprep.mubr.bf16.mxu1 %v1033_v33  ;;  %v983_v36 = vld [vmem:[%s1221_s9 + $0x64] ss:$8 sps:$4 sm:$0xff]   ;;  %v985_v37 = vld [vmem:[%s1221_s9 + $0x60] ss:$8 sps:$4 sm:$0xff]  }
  0x2f   : > { %614 = vmatprep.subr.bf16.mxu0 %v980_v34  ;;  %908 = vmatprep.subr.bf16.mxu1 %v980_v34  ;;  %v986_v38 = vld [vmem:[%s1221_s9 + $0x54] ss:$8 sps:$4 sm:$0xff]   ;;  %v988_v39 = vld [vmem:[%s1221_s9 + $0x50] ss:$8 sps:$4 sm:$0xff]   ;;  %v989_v40 = vld [vmem:[%s1221_s9 + $0x44] ss:$8 sps:$4 sm:$0xff]  }
  0x30   : > { %615 = vmatpush1.bf16.msra.mxu0 %v982_v35  ;;  %924 = vmatpush1.bf16.msra.mxu1 %v982_v35  ;;  %v991_v41 = vld [vmem:[%s1221_s9 + $0x40] ss:$8 sps:$4 sm:$0xff]   ;;  %v992_v42 = vld [vmem:[%s1221_s9 + $0x34] ss:$8 sps:$4 sm:$0xff]   ;;  %v994_v43 = vld [vmem:[%s1221_s9 + $0x30] ss:$8 sps:$4 sm:$0xff]  }
  0x31   : > { %616 = vmatprep.subr.bf16.mxu0 %v983_v36  ;;  %909 = vmatprep.subr.bf16.mxu1 %v983_v36  ;;  %v995_v44 = vld [vmem:[%s1221_s9 + $0x24] ss:$8 sps:$4 sm:$0xff]   ;;  %v997_v45 = vld [vmem:[%s1221_s9 + $0x20] ss:$8 sps:$4 sm:$0xff]   ;;  %v998_v46 = vld [vmem:[%s1221_s9 + $0x14] ss:$8 sps:$4 sm:$0xff]  }
  0x32   : > { %v1000_v47 = vld [vmem:[%s1221_s9 + $0x10] ss:$8 sps:$4 sm:$0xff]   ;;  %v1001_v48 = vld [vmem:[%s1221_s9 + $0x4] ss:$8 sps:$4 sm:$0xff]   ;;  %v1003_v49 = vld [vmem:[%s1221_s9] ss:$8 sps:$4 sm:$0xff]  }
  0x33   : > { %v1004_v50 = vld [vmem:[%s1221_s9 + $0xf4] ss:$8 sps:$4 sm:$0xff]   ;;  %v1006_v51 = vld [vmem:[%s1221_s9 + $0xf0] ss:$8 sps:$4 sm:$0xff]   ;;  %v1007_v52 = vld [vmem:[%s1221_s9 + $0xe4] ss:$8 sps:$4 sm:$0xff]  }
  0x34   : > { %617 = vmatpush1.bf16.msra.mxu0 %v985_v37  ;;  %925 = vmatpush1.bf16.msra.mxu1 %v985_v37  ;;  %v1009_v53 = vld [vmem:[%s1221_s9 + $0xe0] ss:$8 sps:$4 sm:$0xff]   ;;  %v1010_v54 = vld [vmem:[%s1221_s9 + $0xd4] ss:$8 sps:$4 sm:$0xff]   ;;  %v1012_v55 = vld [vmem:[%s1221_s9 + $0xd0] ss:$8 sps:$4 sm:$0xff]  }
  0x35   : > { %618 = vmatprep.subr.bf16.mxu0 %v986_v38  ;;  %910 = vmatprep.subr.bf16.mxu1 %v986_v38  ;;  %v1013_v56 = vld [vmem:[%s1221_s9 + $0xc4] ss:$8 sps:$4 sm:$0xff]   ;;  %v1015_v57 = vld [vmem:[%s1221_s9 + $0xc0] ss:$8 sps:$4 sm:$0xff]   ;;  %v1016_v58 = vld [vmem:[%s1221_s9 + $0xb4] ss:$8 sps:$4 sm:$0xff]  }
  0x36   : > { %v1018_v59 = vld [vmem:[%s1221_s9 + $0xb0] ss:$8 sps:$4 sm:$0xff]   ;;  %v1019_v60 = vld [vmem:[%s1221_s9 + $0xa4] ss:$8 sps:$4 sm:$0xff]   ;;  %v1021_v61 = vld [vmem:[%s1221_s9 + $0xa0] ss:$8 sps:$4 sm:$0xff]  }
  0x37   : > { %v1022_v62 = vld [vmem:[%s1221_s9 + $0x94] ss:$8 sps:$4 sm:$0xff]   ;;  %v1024_v63 = vld [vmem:[%s1221_s9 + $0x90] ss:$8 sps:$4 sm:$0xff]   ;;  %v1025_v0 = vld [vmem:[%s1221_s9 + $0x84] ss:$8 sps:$4 sm:$0xff]  }
  0x38   : > { %619 = vmatpush1.bf16.msra.mxu0 %v988_v39  ;;  %926 = vmatpush1.bf16.msra.mxu1 %v988_v39  ;;  %v1027_v1 = vld [vmem:[%s1221_s9 + $0x80] ss:$8 sps:$4 sm:$0xff]   ;;  %v1031_v3 = vld [vmem:[%s1288_s0 + $0x10] ss:$8 sps:$4 sm:$0xff]   ;;  %s1300_s20 = smov (!%p380_p11, %s856_s20), 3  ;;  %v425_v5 = vshrl.u32 %v424_v4, 7 }
  0x39   : > { %620 = vmatprep.subr.bf16.mxu0 %v989_v40  ;;  %911 = vmatprep.subr.bf16.mxu1 %v989_v40  ;;  %v1028_v2 = vld [vmem:[%s1288_s0] ss:$8 sps:$4 sm:$0xff]   ;;  %s382_s25 = scalar_lea.vmem %s1290_s2, %s1300_s20  ;;  %s907_s12 = sshll.u32 (%p1129_p6), %s1064_s14, 3 }
  0x3a   : > { %v426_v6 = vsub.s32 0, %v425_v5  ;;  %v430_v7 = vsub.s32 1, %v425_v5  ;;  %v422_v8 = vld [vmem:[%s382_s25] sm:$0x3]  ;;  %s707_s30 = scalar_lea.vmem (%p1129_p6), %s1291_s3, %s907_s12 }
  0x3c   : > { %621 = vmatpush1.bf16.msra.mxu0 %v991_v41  ;;  %927 = vmatpush1.bf16.msra.mxu1 %v991_v41  ;;  %v427_v9 = vrot.slane %v422_v8, %v426_v6  ;;  %v431_v10 = vrot.slane %v422_v8, %v430_v7 }
  0x3d   : > { %622 = vmatprep.subr.bf16.mxu0 %v992_v42  ;;  %912 = vmatprep.subr.bf16.mxu1 %v992_v42 }
  0x40   : > { %623 = vmatpush1.bf16.msra.mxu0 %v994_v43  ;;  %928 = vmatpush1.bf16.msra.mxu1 %v994_v43 }
  0x41   : > { %624 = vmatprep.subr.bf16.mxu0 %v995_v44  ;;  %913 = vmatprep.subr.bf16.mxu1 %v995_v44 }
  0x44   : > { %625 = vmatpush1.bf16.msra.mxu0 %v997_v45  ;;  %929 = vmatpush1.bf16.msra.mxu1 %v997_v45 }
  0x45   : > { %626 = vmatprep.subr.bf16.mxu0 %v998_v46  ;;  %914 = vmatprep.subr.bf16.mxu1 %v998_v46 }
  0x48   : > { %627 = vmatpush1.bf16.msra.mxu0 %v1000_v47  ;;  %930 = vmatpush1.bf16.msra.mxu1 %v1000_v47 }
  0x49   : > { %628 = vmatprep.subr.bf16.mxu0 %v1001_v48  ;;  %915 = vmatprep.subr.bf16.mxu1 %v1001_v48 }
  0x4c   : > { %629 = vmatpush1.bf16.msra.mxu0 %v1003_v49  ;;  %931 = vmatpush1.bf16.msra.mxu1 %v1003_v49 }
  0x4d   : > { %630 = vmatprep.subr.bf16.mxu0 %v1004_v50  ;;  %916 = vmatprep.subr.bf16.mxu1 %v1004_v50 }
  0x50   : > { %631 = vmatpush2.bf16.msra.mxu0 %v1006_v51  ;;  %932 = vmatpush2.bf16.msra.mxu1 %v1006_v51 }
  0x51   : > { %632 = vmatprep.subr.bf16.mxu0 %v1007_v52  ;;  %917 = vmatprep.subr.bf16.mxu1 %v1007_v52 }
  0x54   : > { %633 = vmatpush2.bf16.msra.mxu0 %v1009_v53  ;;  %933 = vmatpush2.bf16.msra.mxu1 %v1009_v53 }
  0x55   : > { %634 = vmatprep.subr.bf16.mxu0 %v1010_v54  ;;  %918 = vmatprep.subr.bf16.mxu1 %v1010_v54 }
  0x58   : > { %635 = vmatpush2.bf16.msra.mxu0 %v1012_v55  ;;  %934 = vmatpush2.bf16.msra.mxu1 %v1012_v55 }
  0x59   : > { %636 = vmatprep.subr.bf16.mxu0 %v1013_v56  ;;  %919 = vmatprep.subr.bf16.mxu1 %v1013_v56 }
  0x5c   : > { %637 = vmatpush2.bf16.msra.mxu0 %v1015_v57  ;;  %935 = vmatpush2.bf16.msra.mxu1 %v1015_v57 }
  0x5d   : > { %638 = vmatprep.subr.bf16.mxu0 %v1016_v58  ;;  %920 = vmatprep.subr.bf16.mxu1 %v1016_v58 }
  0x60   : > { %639 = vmatpush2.bf16.msra.mxu0 %v1018_v59  ;;  %936 = vmatpush2.bf16.msra.mxu1 %v1018_v59 }
  0x61   : > { %640 = vmatprep.subr.bf16.mxu0 %v1019_v60  ;;  %921 = vmatprep.subr.bf16.mxu1 %v1019_v60 }
  0x64   : > { %641 = vmatpush2.bf16.msra.mxu0 %v1021_v61  ;;  %937 = vmatpush2.bf16.msra.mxu1 %v1021_v61 }
  0x65   : > { %642 = vmatprep.subr.bf16.mxu0 %v1022_v62  ;;  %922 = vmatprep.subr.bf16.mxu1 %v1022_v62 }
  0x68   : > { %643 = vmatpush2.bf16.msra.mxu0 %v1024_v63  ;;  %938 = vmatpush2.bf16.msra.mxu1 %v1024_v63 }
  0x69   : > { %644 = vmatprep.subr.bf16.mxu0 %v1025_v0  ;;  %923 = vmatprep.subr.bf16.mxu1 %v1025_v0 }
  0x6c   : > { %645 = vmatpush2.bf16.msra.mxu0 %v1027_v1  ;;  %939 = vmatpush2.bf16.msra.mxu1 %v1027_v1 }
  0x6f   : > { %647 = vmatmul.mubr.bf16.vlgmr.msra.gmra.mxu0 %v1028_v2  ;;  %657 = vmatmul.mubr.bf16.vlgmr.msra.gmra.mxu1 %v1031_v3 }
 0x12f   : > { %v648_v11 = vpop.f32.mrf.mxu0  ;;  %v658_v12 = vpop.f32.mrf.mxu1 }
 0x130   : > { %v649_v15 = vadd.f32 %v648_v11, %v427_v9  ;;  %v659_v16 = vadd.f32 %v658_v12, %v427_v9 }
 0x131   : > { %v650_v13 = vpop.f32.mrf.mxu0  ;;  %v660_v14 = vpop.f32.mrf.mxu1 }
 0x132   : > { %v651_v17 = vadd.f32 %v650_v13, %v431_v10  ;;  %v661_v18 = vadd.f32 %v660_v14, %v431_v10 }
 0x133   : > { %v652_v19 = vpop.f32.mrf.mxu0  ;;  %v662_v20 = vpop.f32.mrf.mxu1 }
 0x134   : > { %v903_v21 = vpack.c.bf16 %v651_v17, %v649_v15  ;;  %v905_v22 = vpack.c.bf16 %v661_v18, %v659_v16  ;;  %v653_v25 = vadd.f32 %v652_v19, %v427_v9  ;;  %v663_v26 = vadd.f32 %v662_v20, %v427_v9 }
 0x135   : > { %v654_v23 = vpop.f32.mrf.mxu0  ;;  %v664_v24 = vpop.f32.mrf.mxu1 }
 0x136   : > { %691 = vst [vmem:[%s370_s27] sm:$0xff] %v903_v21  ;;  %693 = vst [vmem:[%s370_s27 + $0x10] sm:$0xff] %v905_v22  ;;  %v655_v27 = vadd.f32 %v654_v23, %v431_v10  ;;  %v665_v28 = vadd.f32 %v664_v24, %v431_v10  ;;  %701 = sbr.rel (!%p1129_p6) target bundleno = 323 (0x143), region = 74 }
 0x138   : > { %v904_v29 = vpack.c.bf16 %v655_v27, %v653_v25  ;;  %v906_v30 = vpack.c.bf16 %v665_v28, %v663_v26 }
 0x13a   : > { %692 = vst [vmem:[%s370_s27 + $0x8] sm:$0xff] %v904_v29  ;;  %694 = vst [vmem:[%s370_s27 + $0x18] sm:$0xff] %v906_v30 }
 0x13d   : > { %v742_v31 = vld [vmem:[%s370_s27] sm:$0xff]  ;;  %v746_v33 = vld [vmem:[%s370_s27 + $0x10] sm:$0xff] }
 0x13e   : > { %743 = vst [vmem:[%s707_s30] sm:$0xff] %v742_v31  ;;  %747 = vst [vmem:[%s707_s30 + $0x20] sm:$0xff] %v746_v33 }
 0x141   : > { %v744_v32 = vld [vmem:[%s370_s27 + $0x8] sm:$0xff]  ;;  %v748_v34 = vld [vmem:[%s370_s27 + $0x18] sm:$0xff] }
 0x142   : > { %745 = vst [vmem:[%s707_s30 + $0x10] sm:$0xff] %v744_v32  ;;  %749 = vst [vmem:[%s707_s30 + $0x30] sm:$0xff] %v748_v34 }
 0x143 PF: > { %s13_s16 = sadd.s32 1, %s1072_s16   ;;  %s1293_s12 = smov %s1060_s13 }
 0x144   : > { %p10_p12 = scmp.ge.s32.totalorder %s13_s16, 4   ;;  %s1294_s13 = smov %s1134_s22 }
 0x145   : > { %s1295_s14 = smov %s1068_s15  ;;  %s1296_s15 = smov %s1298_s17 }
 0x146   :  { %12 = sbr.rel (!%p10_p12) target bundleno = 3 (0x3), region = 149 }

// kernel: opt_resnet_forward.39
= control target key start
LH: loop header
LB: loop body
LE: loop exit
PB: predicated region body
PF: predicated region fallthrough
CT: control target
= control target key end

     0   :  { %s1632_s1 = inlined_call_operand.vmem [shape: bf16[1152,128], index: 1, kind: input, shape index: {}]   ;;  %s1633_s0 = inlined_call_operand.vmem [shape: bf16[32,1152], index: 0, kind: input, shape index: {}]   ;;  %s1634_s2 = inlined_call_operand.vmem [shape: f32[1,128], index: 2, kind: input, shape index: {}]   ;;  %s1635_s3 = inlined_call_operand.vmem [shape: bf16[32,128], index: 3, kind: output, shape index: {}]  }
   0x1   :  { %v1235_v0 = vld [vmem:[%s1632_s1 + $0x78] sm:$0xff]   ;;  %v1239_v4 = vld [vmem:[%s1632_s1 + $0x70] sm:$0xff]   ;;  %v1243_v8 = vld [vmem:[%s1632_s1 + $0x68] sm:$0xff]  }
   0x2   :  { %v1236_v1 = vld [vmem:[%s1632_s1 + $0x38] sm:$0xff]   ;;  %1093 = vmatprep.subr.bf16.mxu0 %v1235_v0  ;;  %v1240_v5 = vld [vmem:[%s1632_s1 + $0x30] sm:$0xff]   ;;  %v1244_v9 = vld [vmem:[%s1632_s1 + $0x28] sm:$0xff]  }
   0x3   :  { %v1237_v2 = vld [vmem:[%s1632_s1 + $0xf8] sm:$0xff]   ;;  %1094 = vmatpush3.bf16.msra.mxu0 %v1236_v1  ;;  %v1241_v6 = vld [vmem:[%s1632_s1 + $0xf0] sm:$0xff]   ;;  %v1245_v10 = vld [vmem:[%s1632_s1 + $0xe8] sm:$0xff]  }
   0x4   :  { %v1238_v3 = vld [vmem:[%s1632_s1 + $0xb8] sm:$0xff]   ;;  %1121 = vmatprep.subr.bf16.mxu1 %v1237_v2  ;;  %1095 = vmatprep.subr.bf16.mxu0 %v1239_v4  ;;  %v1242_v7 = vld [vmem:[%s1632_s1 + $0xb0] sm:$0xff]   ;;  %v1246_v11 = vld [vmem:[%s1632_s1 + $0xa8] sm:$0xff]  }
   0x5   :  { %1122 = vmatpush3.bf16.msra.mxu1 %v1238_v3  ;;  %v1247_v12 = vld [vmem:[%s1632_s1 + $0x60] sm:$0xff]   ;;  %v1251_v16 = vld [vmem:[%s1632_s1 + $0x58] sm:$0xff]   ;;  %v1255_v20 = vld [vmem:[%s1632_s1 + $0x50] sm:$0xff]  }
   0x6   :  { %1123 = vmatprep.subr.bf16.mxu1 %v1241_v6  ;;  %v1248_v13 = vld [vmem:[%s1632_s1 + $0x20] sm:$0xff]   ;;  %v1252_v17 = vld [vmem:[%s1632_s1 + $0x18] sm:$0xff]   ;;  %v1256_v21 = vld [vmem:[%s1632_s1 + $0x10] sm:$0xff]  }
   0x7   :  { %1096 = vmatpush3.bf16.msra.mxu0 %v1240_v5  ;;  %v1249_v14 = vld [vmem:[%s1632_s1 + $0xe0] sm:$0xff]   ;;  %v1253_v18 = vld [vmem:[%s1632_s1 + $0xd8] sm:$0xff]   ;;  %v1257_v22 = vld [vmem:[%s1632_s1 + $0xd0] sm:$0xff]  }
   0x8   :  { %1097 = vmatprep.subr.bf16.mxu0 %v1243_v8  ;;  %v1250_v15 = vld [vmem:[%s1632_s1 + $0xa0] sm:$0xff]   ;;  %v1254_v19 = vld [vmem:[%s1632_s1 + $0x98] sm:$0xff]   ;;  %v1258_v23 = vld [vmem:[%s1632_s1 + $0x90] sm:$0xff]  }
   0x9   :  { %1124 = vmatpush3.bf16.msra.mxu1 %v1242_v7  ;;  %v1259_v24 = vld [vmem:[%s1632_s1 + $0x48] sm:$0xff]   ;;  %v1263_v28 = vld [vmem:[%s1632_s1 + $0x40] sm:$0xff]   ;;  %v1270_v34 = vld [vmem:[%s1632_s1 + $0x178] sm:$0xff]  }
   0xa   :  { %1125 = vmatprep.subr.bf16.mxu1 %v1245_v10  ;;  %v1260_v25 = vld [vmem:[%s1632_s1 + $0x8] sm:$0xff]   ;;  %v1264_v29 = vld [vmem:[%s1632_s1] sm:$0xff]   ;;  %v1274_v37 = vld [vmem:[%s1632_s1 + $0x138] sm:$0xff]  }
   0xb   :  { %1098 = vmatpush3.bf16.msra.mxu0 %v1244_v9  ;;  %v1261_v26 = vld [vmem:[%s1632_s1 + $0xc8] sm:$0xff]   ;;  %v1265_v30 = vld [vmem:[%s1632_s1 + $0xc0] sm:$0xff]   ;;  %v1275_v38 = vld [vmem:[%s1632_s1 + $0x1f8] sm:$0xff]  }
   0xc   :  { %1099 = vmatprep.subr.bf16.mxu0 %v1247_v12  ;;  %v1262_v27 = vld [vmem:[%s1632_s1 + $0x88] sm:$0xff]   ;;  %v1266_v31 = vld [vmem:[%s1633_s0] ss:$36 sps:$4 sm:$0xff]   ;;  %v1276_v39 = vld [vmem:[%s1632_s1 + $0x1b8] sm:$0xff]  }
   0xd   :  { %1126 = vmatpush3.bf16.msra.mxu1 %v1246_v11  ;;  %v1268_v32 = vld [vmem:[%s1633_s0 + $0x4] ss:$36 sps:$4 sm:$0xff]   ;;  %v1273_v36 = vld [vmem:[%s1633_s0 + $0xc] ss:$36 sps:$4 sm:$0xff]   ;;  %v1289_v52 = vld [vmem:[%s1632_s1 + $0x158] sm:$0xff]  }
   0xe   :  { %1127 = vmatprep.subr.bf16.mxu1 %v1249_v14  ;;  %v1269_v33 = vld [vmem:[%s1632_s1 + $0x80] sm:$0xff]   ;;  %742 = vmatprep.mubr.bf16.mxu0 %v1268_v32  ;;  %v1271_v35 = vld [vmem:[%s1633_s0 + $0x8] ss:$36 sps:$4 sm:$0xff]   ;;  %v1277_v40 = vld [vmem:[%s1632_s1 + $0x170] sm:$0xff]  }
   0xf   :  { %1100 = vmatpush3.bf16.msra.mxu0 %v1248_v13  ;;  %791 = vmatprep.mubr.bf16.mxu1 %v1273_v36  ;;  %v1278_v41 = vld [vmem:[%s1632_s1 + $0x130] sm:$0xff]   ;;  %v1281_v44 = vld [vmem:[%s1632_s1 + $0x168] sm:$0xff]   ;;  %v1285_v48 = vld [vmem:[%s1632_s1 + $0x160] sm:$0xff]  }
  0x10   :  { %1101 = vmatprep.subr.bf16.mxu0 %v1251_v16  ;;  %v1279_v42 = vld [vmem:[%s1632_s1 + $0x1f0] sm:$0xff]   ;;  %v1282_v45 = vld [vmem:[%s1632_s1 + $0x128] sm:$0xff]   ;;  %v1286_v49 = vld [vmem:[%s1632_s1 + $0x120] sm:$0xff]  }
  0x11   :  { %1128 = vmatpush3.bf16.msra.mxu1 %v1250_v15  ;;  %v1280_v43 = vld [vmem:[%s1632_s1 + $0x1b0] sm:$0xff]   ;;  %v1283_v46 = vld [vmem:[%s1632_s1 + $0x1e8] sm:$0xff]   ;;  %v1287_v50 = vld [vmem:[%s1632_s1 + $0x1e0] sm:$0xff]  }
  0x12   :  { %1129 = vmatprep.subr.bf16.mxu1 %v1253_v18  ;;  %v1284_v47 = vld [vmem:[%s1632_s1 + $0x1a8] sm:$0xff]   ;;  %v1288_v51 = vld [vmem:[%s1632_s1 + $0x1a0] sm:$0xff]   ;;  %v1290_v53 = vld [vmem:[%s1632_s1 + $0x118] sm:$0xff]  }
  0x13   :  { %1102 = vmatpush3.bf16.msra.mxu0 %v1252_v17  ;;  %v1291_v54 = vld [vmem:[%s1633_s0 + $0x4c] ss:$36 sps:$4 sm:$0xff]   ;;  %v1293_v55 = vld [vmem:[%s1632_s1 + $0x1d8] sm:$0xff]   ;;  %v1307_v4 = vld [vmem:[%s1632_s1 + $0x140] sm:$0xff]  }
  0x14   :  { %1103 = vmatprep.subr.bf16.mxu0 %v1255_v20  ;;  %v1294_v56 = vld [vmem:[%s1633_s0 + $0x48] ss:$36 sps:$4 sm:$0xff]   ;;  %v1295_v57 = vld [vmem:[%s1632_s1 + $0x198] sm:$0xff]   ;;  %v1298_v59 = vld [vmem:[%s1632_s1 + $0x150] sm:$0xff]  }
  0x15   :  { %1130 = vmatpush3.bf16.msra.mxu1 %v1254_v19  ;;  %v1296_v58 = vld [vmem:[%s1633_s0 + $0x54] ss:$36 sps:$4 sm:$0xff]   ;;  %v1303_v0 = vld [vmem:[%s1632_s1 + $0x148] sm:$0xff]   ;;  %v1308_v5 = vld [vmem:[%s1632_s1 + $0x100] sm:$0xff]  }
  0x16   :  { %1131 = vmatprep.subr.bf16.mxu1 %v1257_v22  ;;  %v1299_v60 = vld [vmem:[%s1633_s0 + $0x50] ss:$36 sps:$4 sm:$0xff]   ;;  %v1304_v1 = vld [vmem:[%s1632_s1 + $0x108] sm:$0xff]   ;;  %v1309_v6 = vld [vmem:[%s1632_s1 + $0x1c0] sm:$0xff]  }
  0x17   :  { %1104 = vmatpush3.bf16.msra.mxu0 %v1256_v21  ;;  %v1300_v61 = vld [vmem:[%s1632_s1 + $0x110] sm:$0xff]   ;;  %v1305_v2 = vld [vmem:[%s1632_s1 + $0x1c8] sm:$0xff]   ;;  %v1313_v9 = vld [vmem:[%s1632_s1 + $0x180] sm:$0xff]  }
  0x18   :  { %1105 = vmatprep.subr.bf16.mxu0 %v1259_v24  ;;  %v1301_v62 = vld [vmem:[%s1632_s1 + $0x1d0] sm:$0xff]   ;;  %v1306_v3 = vld [vmem:[%s1632_s1 + $0x188] sm:$0xff]   ;;  %v1314_v10 = vld [vmem:[%s1632_s1 + $0x238] sm:$0xff]  }
  0x19   :  { %1132 = vmatpush3.bf16.msra.mxu1 %v1258_v23  ;;  %v1302_v63 = vld [vmem:[%s1632_s1 + $0x190] sm:$0xff]   ;;  %v1315_v11 = vld [vmem:[%s1633_s0 + $0x18] ss:$36 sps:$4 sm:$0xff]   ;;  %v1322_v16 = vld [vmem:[%s1632_s1 + $0x228] sm:$0xff]  }
  0x1a   :  { %1133 = vmatprep.subr.bf16.mxu1 %v1261_v26  ;;  %v1310_v7 = vld [vmem:[%s1633_s0 + $0x10] ss:$36 sps:$4 sm:$0xff]   ;;  %v1317_v12 = vld [vmem:[%s1633_s0 + $0x1c] ss:$36 sps:$4 sm:$0xff]   ;;  %v1323_v17 = vld [vmem:[%s1633_s0 + $0x64] ss:$36 sps:$4 sm:$0xff]  }
  0x1b   :  { %1106 = vmatpush3.bf16.msra.mxu0 %v1260_v25  ;;  %v1312_v8 = vld [vmem:[%s1633_s0 + $0x14] ss:$36 sps:$4 sm:$0xff]   ;;  %v1319_v14 = vld [vmem:[%s1633_s0 + $0x5c] ss:$36 sps:$4 sm:$0xff]   ;;  %v1329_v23 = vld [vmem:[%s1632_s1 + $0x208] sm:$0xff]  }
  0x1c   :  { %1107 = vmatprep.subr.bf16.mxu0 %v1263_v28  ;;  %v1318_v13 = vld [vmem:[%s1632_s1 + $0x230] sm:$0xff]   ;;  %v1321_v15 = vld [vmem:[%s1633_s0 + $0x58] ss:$36 sps:$4 sm:$0xff]   ;;  %v1325_v18 = vld [vmem:[%s1633_s0 + $0x60] ss:$36 sps:$4 sm:$0xff]  }
  0x1d   :  { %1134 = vmatpush3.bf16.msra.mxu1 %v1262_v27  ;;  %v1326_v19 = vld [vmem:[%s1632_s1 + $0x220] sm:$0xff]   ;;  %v1327_v20 = vld [vmem:[%s1632_s1 + $0x218] sm:$0xff]   ;;  %v1328_v22 = vld [vmem:[%s1632_s1 + $0x210] sm:$0xff]  }
  0x1e   :  { %1135 = vmatprep.subr.bf16.mxu1 %v1265_v30  ;;  %v1331_v21 = vld [vmem:[%s1633_s0 + $0x20] ss:$36 sps:$4 sm:$0xff]   ;;  %v1332_v25 = vld [vmem:[%s1633_s0 + $0x68] ss:$36 sps:$4 sm:$0xff]  }
  0x1f   :  { %1108 = vmatpush3.bf16.msra.mxu0 %v1264_v29  ;;  %v1330_v24 = vld [vmem:[%s1632_s1 + $0x200] sm:$0xff]  }
  0x20   :  { %1149 = vmatprep.subr.bf16.mxu0 %v1270_v34 }
  0x21   :  { %1136 = vmatpush3.bf16.msra.mxu1 %v1269_v33 }
  0x22   :  { %743 = vmatmul.mubr.bf16.vlgmr.msra.gmra.mxu0 %v1266_v31  ;;  %1177 = vmatprep.subr.bf16.mxu1 %v1275_v38 }
  0x23   :  { %1150 = vmatpush3.bf16.msra.mxu0 %v1274_v37  ;;  %750 = vmatprep.mubr.bf16.mxu0 %v1291_v54 }
  0x24   :  { %792 = vmatmul.mubr.bf16.vlgmr.msra.gmra.mxu1 %v1271_v35  ;;  %1151 = vmatprep.subr.bf16.mxu0 %v1277_v40 }
  0x25   :  { %1178 = vmatpush3.bf16.msra.mxu1 %v1276_v39  ;;  %799 = vmatprep.mubr.bf16.mxu1 %v1296_v58 }
  0x26   :  { %1179 = vmatprep.subr.bf16.mxu1 %v1279_v42 }
  0x27   :  { %1152 = vmatpush3.bf16.msra.mxu0 %v1278_v41 }
  0x28   :  { %1153 = vmatprep.subr.bf16.mxu0 %v1281_v44 }
  0x29   :  { %1180 = vmatpush3.bf16.msra.mxu1 %v1280_v43 }
  0x2a   :  { %1181 = vmatprep.subr.bf16.mxu1 %v1283_v46  ;;  %751 = vmatmul.mubr.bf16.gmra.mxu0 %v1294_v56 }
  0x2b   :  { %1154 = vmatpush3.bf16.msra.mxu0 %v1282_v45  ;;  %840 = vmatprep.mubr.bf16.mxu0 %v1312_v8 }
  0x2c   :  { %1155 = vmatprep.subr.bf16.mxu0 %v1285_v48  ;;  %800 = vmatmul.mubr.bf16.gmra.mxu1 %v1299_v60 }
  0x2d   :  { %1182 = vmatpush3.bf16.msra.mxu1 %v1284_v47  ;;  %889 = vmatprep.mubr.bf16.mxu1 %v1317_v12 }
  0x2e   :  { %1183 = vmatprep.subr.bf16.mxu1 %v1287_v50 }
  0x2f   :  { %1156 = vmatpush3.bf16.msra.mxu0 %v1286_v49 }
  0x30   :  { %1157 = vmatprep.subr.bf16.mxu0 %v1289_v52 }
  0x31   :  { %1184 = vmatpush3.bf16.msra.mxu1 %v1288_v51 }
  0x32   :  { %1185 = vmatprep.subr.bf16.mxu1 %v1293_v55 }
  0x33   :  { %1158 = vmatpush3.bf16.msra.mxu0 %v1290_v53 }
  0x34   :  { %1159 = vmatprep.subr.bf16.mxu0 %v1298_v59 }
  0x35   :  { %1186 = vmatpush3.bf16.msra.mxu1 %v1295_v57  ;;  %v983_v57 = vld [vmem:[%s1634_s2] ss:$0 sm:$0xff] }
  0x36   :  { %1187 = vmatprep.subr.bf16.mxu1 %v1301_v62 }
  0x37   :  { %1160 = vmatpush3.bf16.msra.mxu0 %v1300_v61 }
  0x38   :  { %1161 = vmatprep.subr.bf16.mxu0 %v1303_v0 }
  0x39   :  { %1188 = vmatpush3.bf16.msra.mxu1 %v1302_v63 }
  0x3a   :  { %1189 = vmatprep.subr.bf16.mxu1 %v1305_v2 }
  0x3b   :  { %1162 = vmatpush3.bf16.msra.mxu0 %v1304_v1 }
  0x3c   :  { %1163 = vmatprep.subr.bf16.mxu0 %v1307_v4 }
  0x3d   :  { %1190 = vmatpush3.bf16.msra.mxu1 %v1306_v3 }
  0x3e   :  { %1191 = vmatprep.subr.bf16.mxu1 %v1309_v6 }
  0x3f   :  { %1164 = vmatpush3.bf16.msra.mxu0 %v1308_v5 }
  0x40   :  { %1215 = vmatprep.subr.bf16.mxu0 %v1314_v10 }
  0x41   :  { %1192 = vmatpush3.bf16.msra.mxu1 %v1313_v9 }
  0x42   :  { %841 = vmatmul.mubr.bf16.vlgmr.msra.gmra.mxu0 %v1310_v7 }
  0x43   :  { %1216 = vmatpush3.bf16.msra.mxu0 %v1314_v10  ;;  %848 = vmatprep.mubr.bf16.mxu0 %v1319_v14 }
  0x44   :  { %890 = vmatmul.mubr.bf16.vlgmr.msra.gmra.mxu1 %v1315_v11  ;;  %1217 = vmatprep.subr.bf16.mxu0 %v1318_v13 }
  0x45   :  { %897 = vmatprep.mubr.bf16.mxu1 %v1323_v17 }
  0x47   :  { %1218 = vmatpush3.bf16.msra.mxu0 %v1318_v13 }
  0x48   :  { %1219 = vmatprep.subr.bf16.mxu0 %v1322_v16 }
  0x4a   :  { %849 = vmatmul.mubr.bf16.gmra.mxu0 %v1321_v15 }
  0x4b   :  { %1220 = vmatpush3.bf16.msra.mxu0 %v1322_v16  ;;  %1231 = vmatprep.mubr.bf16.mxu0 %v1331_v21 }
  0x4c   :  { %898 = vmatmul.mubr.bf16.gmra.mxu1 %v1325_v18  ;;  %1221 = vmatprep.subr.bf16.mxu0 %v1326_v19 }
  0x4f   :  { %1222 = vmatpush3.bf16.msra.mxu0 %v1326_v19 }
  0x50   :  { %1223 = vmatprep.subr.bf16.mxu0 %v1327_v20 }
  0x53   :  { %1224 = vmatpush3.bf16.msra.mxu0 %v1327_v20 }
  0x54   :  { %1225 = vmatprep.subr.bf16.mxu0 %v1328_v22 }
  0x57   :  { %1226 = vmatpush3.bf16.msra.mxu0 %v1328_v22 }
  0x58   :  { %1227 = vmatprep.subr.bf16.mxu0 %v1329_v23 }
  0x5b   :  { %1228 = vmatpush3.bf16.msra.mxu0 %v1329_v23 }
  0x5c   :  { %1229 = vmatprep.subr.bf16.mxu0 %v1330_v24 }
  0x5f   :  { %1230 = vmatpush3.bf16.msra.mxu0 %v1330_v24 }
  0x62   :  { %1232 = vmatmul.mubr.bf16.vlgmr.msra.gmra.mxu0 %v1332_v25 }
  0xe2   :  { %v1109_v26 = vpop.f32.mrf.mxu0 }
  0xe4   :  { %v1137_v27 = vpop.f32.mrf.mxu1  ;;  %v1110_v28 = vpop.f32.mrf.mxu0 }
  0xe5   :  { %v1111_v54 = vadd.f32 %v1110_v28, %v1109_v26 }
  0xe6   :  { %v1138_v29 = vpop.f32.mrf.mxu1  ;;  %v1112_v30 = vpop.f32.mrf.mxu0 }
  0xe7   :  { %v745_v62 = vadd.f32 %v1111_v54, %v983_v57  ;;  %v1139_v63 = vadd.f32 %v1138_v29, %v1137_v27 }
  0xe8   :  { %v1140_v31 = vpop.f32.mrf.mxu1  ;;  %v1113_v32 = vpop.f32.mrf.mxu0 }
  0xe9   :  { %v1114_v59 = vadd.f32 %v1113_v32, %v1112_v30  ;;  %v794_v10 = vadd.f32 %v1139_v63, %v745_v62 }
  0xea   :  { %v1115_v33 = vpop.f32.mrf.mxu0  ;;  %v1141_v34 = vpop.f32.mrf.mxu1 }
  0xeb   :  { %v748_v5 = vadd.f32 %v1114_v59, %v983_v57  ;;  %v1142_v6 = vadd.f32 %v1141_v34, %v1140_v31 }
  0xec   :  { %v1143_v35 = vpop.f32.mrf.mxu1  ;;  %v1116_v36 = vpop.f32.mrf.mxu0 }
  0xed   :  { %v1117_v53 = vadd.f32 %v1116_v36, %v1115_v33  ;;  %v797_v16 = vadd.f32 %v1142_v6, %v748_v5 }
  0xee   :  { %v1144_v37 = vpop.f32.mrf.mxu1  ;;  %v1118_v38 = vpop.f32.mrf.mxu0 }
  0xef   :  { %v753_v60 = vadd.f32 %v1117_v53, %v983_v57  ;;  %v1145_v61 = vadd.f32 %v1144_v37, %v1143_v35 }
  0xf0   :  { %v1146_v39 = vpop.f32.mrf.mxu1  ;;  %v1119_v40 = vpop.f32.mrf.mxu0 }
  0xf1   :  { %v1120_v58 = vadd.f32 %v1119_v40, %v1118_v38  ;;  %v802_v7 = vadd.f32 %v1145_v61, %v753_v60 }
  0xf2   :  { %v1147_v42 = vpop.f32.mrf.mxu1 }
  0xf3   :  { %v756_v2 = vadd.f32 %v1120_v58, %v983_v57  ;;  %v1148_v3 = vadd.f32 %v1147_v42, %v1146_v39 }
  0xf5   :  { %v805_v12 = vadd.f32 %v1148_v3, %v756_v2 }
 0x102   :  { %v1165_v41 = vpop.f32.mrf.mxu0 }
 0x104   :  { %v1166_v43 = vpop.f32.mrf.mxu0  ;;  %v1193_v44 = vpop.f32.mrf.mxu1 }
 0x105   :  { %v1167_v8 = vadd.f32 %v1166_v43, %v1165_v41 }
 0x106   :  { %v1168_v45 = vpop.f32.mrf.mxu0  ;;  %v1194_v46 = vpop.f32.mrf.mxu1 }
 0x107   :  { %v843_v17 = vadd.f32 %v1167_v8, %v794_v10  ;;  %v1195_v18 = vadd.f32 %v1194_v46, %v1193_v44 }
 0x108   :  { %v1169_v47 = vpop.f32.mrf.mxu0  ;;  %v1196_v48 = vpop.f32.mrf.mxu1 }
 0x109   :  { %v1170_v13 = vadd.f32 %v1169_v47, %v1168_v45  ;;  %v892_v27 = vadd.f32 %v1195_v18, %v843_v17 }
 0x10a   :  { %v1171_v49 = vpop.f32.mrf.mxu0  ;;  %v1197_v50 = vpop.f32.mrf.mxu1 }
 0x10b   :  { %v846_v22 = vadd.f32 %v1170_v13, %v797_v16  ;;  %v1198_v23 = vadd.f32 %v1197_v50, %v1196_v48 }
 0x10c   :  { %v1172_v51 = vpop.f32.mrf.mxu0  ;;  %v1199_v52 = vpop.f32.mrf.mxu1 }
 0x10d   :  { %v1173_v4 = vadd.f32 %v1172_v51, %v1171_v49  ;;  %v895_v32 = vadd.f32 %v1198_v23, %v846_v22 }
 0x10e   :  { %v1174_v55 = vpop.f32.mrf.mxu0  ;;  %v1200_v56 = vpop.f32.mrf.mxu1 }
 0x10f   :  { %v851_v14 = vadd.f32 %v1173_v4, %v802_v7  ;;  %v1201_v15 = vadd.f32 %v1200_v56, %v1199_v52 }
 0x110   :  { %v1175_v0 = vpop.f32.mrf.mxu0  ;;  %v1202_v1 = vpop.f32.mrf.mxu1 }
 0x111   :  { %v1176_v9 = vadd.f32 %v1175_v0, %v1174_v55  ;;  %v900_v24 = vadd.f32 %v1201_v15, %v851_v14 }
 0x112   :  { %v1203_v11 = vpop.f32.mrf.mxu1 }
 0x113   :  { %v854_v19 = vadd.f32 %v1176_v9, %v805_v12  ;;  %v1204_v20 = vadd.f32 %v1203_v11, %v1202_v1 }
 0x115   :  { %v903_v28 = vadd.f32 %v1204_v20, %v854_v19 }
 0x122   :  { %v1233_v21 = vpop.f32.mrf.mxu0 }
 0x123   :  { %v949_v26 = vadd.f32 %v1233_v21, %v900_v24 }
 0x124   :  { %v940_v25 = vpop.f32.mrf.mxu0 }
 0x125   :  { %v941_v30 = vadd.f32 %v940_v25, %v892_v27  ;;  %v957_v34 = vmax.f32 %v949_v26, 0.0 }
 0x126   :  { %v1234_v29 = vpop.f32.mrf.mxu0 }
 0x127   :  { %v952_v31 = vadd.f32 %v1234_v29, %v903_v28  ;;  %v955_v37 = vmax.f32 %v941_v30, 0.0 }
 0x128   :  { %v943_v33 = vpop.f32.mrf.mxu0 }
 0x129   :  { %v958_v35 = vmax.f32 %v952_v31, 0.0  ;;  %v944_v36 = vadd.f32 %v943_v33, %v895_v32 }
 0x12b   :  { %v1090_v38 = vpack.c.bf16 %v958_v35, %v957_v34  ;;  %v956_v39 = vmax.f32 %v944_v36, 0.0 }
 0x12d   :  { %1092 = vst [vmem:[%s1635_s3 + $0x8] sm:$0xff] %v1090_v38   ;;  %v1085_v40 = vpack.c.bf16 %v956_v39, %v955_v37 }
 0x12f   :  { %1086 = vst [vmem:[%s1635_s3] sm:$0xff] %v1085_v40  }

// kernel: opt_resnet_forward.41
= control target key start
LH: loop header
LB: loop body
LE: loop exit
PB: predicated region body
PF: predicated region fallthrough
CT: control target
= control target key end

     0   :  { %s761_s1 = inlined_call_operand.vmem [shape: bf16[512,128], index: 1, kind: input, shape index: {}]   ;;  %s762_s0 = inlined_call_operand.vmem [shape: bf16[32,512], index: 0, kind: input, shape index: {}]   ;;  %s763_s2 = inlined_call_operand.vmem [shape: f32[1,128], index: 2, kind: input, shape index: {}]   ;;  %s764_s3 = inlined_call_operand.vmem [shape: bf16[32,128], index: 3, kind: output, shape index: {}]  }
   0x1   :  { %v568_v0 = vld [vmem:[%s761_s1 + $0x78] sm:$0xff]   ;;  %v572_v4 = vld [vmem:[%s761_s1 + $0x70] sm:$0xff]   ;;  %v576_v8 = vld [vmem:[%s761_s1 + $0x68] sm:$0xff]  }
   0x2   :  { %v569_v1 = vld [vmem:[%s761_s1 + $0xf8] sm:$0xff]   ;;  %512 = vmatprep.subr.bf16.mxu0 %v568_v0  ;;  %v573_v5 = vld [vmem:[%s761_s1 + $0xf0] sm:$0xff]   ;;  %v577_v9 = vld [vmem:[%s761_s1 + $0xe8] sm:$0xff]  }
   0x3   :  { %v570_v2 = vld [vmem:[%s761_s1 + $0x38] sm:$0xff]   ;;  %540 = vmatprep.subr.bf16.mxu1 %v569_v1  ;;  %v574_v6 = vld [vmem:[%s761_s1 + $0x30] sm:$0xff]   ;;  %v578_v10 = vld [vmem:[%s761_s1 + $0x28] sm:$0xff]  }
   0x4   :  { %v571_v3 = vld [vmem:[%s761_s1 + $0xb8] sm:$0xff]   ;;  %513 = vmatpush3.bf16.msra.mxu0 %v570_v2  ;;  %v575_v7 = vld [vmem:[%s761_s1 + $0xb0] sm:$0xff]   ;;  %v579_v11 = vld [vmem:[%s761_s1 + $0xa8] sm:$0xff]  }
   0x5   :  { %541 = vmatpush3.bf16.msra.mxu1 %v571_v3  ;;  %514 = vmatprep.subr.bf16.mxu0 %v572_v4  ;;  %v580_v12 = vld [vmem:[%s761_s1 + $0x60] sm:$0xff]   ;;  %v584_v16 = vld [vmem:[%s761_s1 + $0x58] sm:$0xff]   ;;  %v588_v20 = vld [vmem:[%s761_s1 + $0x50] sm:$0xff]  }
   0x6   :  { %542 = vmatprep.subr.bf16.mxu1 %v573_v5  ;;  %v581_v13 = vld [vmem:[%s761_s1 + $0xe0] sm:$0xff]   ;;  %v585_v17 = vld [vmem:[%s761_s1 + $0xd8] sm:$0xff]   ;;  %v589_v21 = vld [vmem:[%s761_s1 + $0xd0] sm:$0xff]  }
   0x7   :  { %v582_v14 = vld [vmem:[%s761_s1 + $0x20] sm:$0xff]   ;;  %v586_v18 = vld [vmem:[%s761_s1 + $0x18] sm:$0xff]   ;;  %v590_v22 = vld [vmem:[%s761_s1 + $0x10] sm:$0xff]  }
   0x8   :  { %515 = vmatpush3.bf16.msra.mxu0 %v574_v6  ;;  %v583_v15 = vld [vmem:[%s761_s1 + $0xa0] sm:$0xff]   ;;  %v587_v19 = vld [vmem:[%s761_s1 + $0x98] sm:$0xff]   ;;  %v591_v23 = vld [vmem:[%s761_s1 + $0x90] sm:$0xff]  }
   0x9   :  { %543 = vmatpush3.bf16.msra.mxu1 %v575_v7  ;;  %516 = vmatprep.subr.bf16.mxu0 %v576_v8  ;;  %v592_v24 = vld [vmem:[%s761_s1 + $0x48] sm:$0xff]   ;;  %v596_v28 = vld [vmem:[%s761_s1 + $0x40] sm:$0xff]  }
   0xa   :  { %544 = vmatprep.subr.bf16.mxu1 %v577_v9  ;;  %v593_v25 = vld [vmem:[%s761_s1 + $0xc8] sm:$0xff]   ;;  %v597_v29 = vld [vmem:[%s761_s1 + $0xc0] sm:$0xff]  }
   0xb   :  { %v594_v26 = vld [vmem:[%s761_s1 + $0x8] sm:$0xff]   ;;  %v598_v30 = vld [vmem:[%s761_s1] sm:$0xff]  }
   0xc   :  { %517 = vmatpush3.bf16.msra.mxu0 %v578_v10  ;;  %v595_v27 = vld [vmem:[%s761_s1 + $0x88] sm:$0xff]   ;;  %v599_v31 = vld [vmem:[%s761_s1 + $0x80] sm:$0xff]  }
   0xd   :  { %545 = vmatpush3.bf16.msra.mxu1 %v579_v11  ;;  %518 = vmatprep.subr.bf16.mxu0 %v580_v12  ;;  %v600_v32 = vld [vmem:[%s762_s0] ss:$16 sps:$4 sm:$0xff]   ;;  %v602_v33 = vld [vmem:[%s762_s0 + $0x4] ss:$16 sps:$4 sm:$0xff]   ;;  %v603_v34 = vld [vmem:[%s762_s0 + $0x8] ss:$16 sps:$4 sm:$0xff]  }
   0xe   :  { %546 = vmatprep.subr.bf16.mxu1 %v581_v13  ;;  %v605_v35 = vld [vmem:[%s762_s0 + $0xc] ss:$16 sps:$4 sm:$0xff]   ;;  %358 = vmatprep.mubr.bf16.mxu0 %v602_v33  ;;  %v606_v36 = vld [vmem:[%s762_s0 + $0x24] ss:$16 sps:$4 sm:$0xff]   ;;  %v610_v38 = vld [vmem:[%s762_s0 + $0x20] ss:$16 sps:$4 sm:$0xff]  }
   0xf   :  { %407 = vmatprep.mubr.bf16.mxu1 %v605_v35  ;;  %v608_v37 = vld [vmem:[%s762_s0 + $0x2c] ss:$16 sps:$4 sm:$0xff]   ;;  %v611_v39 = vld [vmem:[%s762_s0 + $0x28] ss:$16 sps:$4 sm:$0xff]   ;;  %v452_v42 = vld [vmem:[%s763_s2] ss:$0 sm:$0xff] }
  0x10   :  { %519 = vmatpush3.bf16.msra.mxu0 %v582_v14 }
  0x11   :  { %547 = vmatpush3.bf16.msra.mxu1 %v583_v15  ;;  %520 = vmatprep.subr.bf16.mxu0 %v584_v16 }
  0x12   :  { %548 = vmatprep.subr.bf16.mxu1 %v585_v17 }
  0x14   :  { %521 = vmatpush3.bf16.msra.mxu0 %v586_v18 }
  0x15   :  { %549 = vmatpush3.bf16.msra.mxu1 %v587_v19  ;;  %522 = vmatprep.subr.bf16.mxu0 %v588_v20 }
  0x16   :  { %550 = vmatprep.subr.bf16.mxu1 %v589_v21 }
  0x18   :  { %523 = vmatpush3.bf16.msra.mxu0 %v590_v22 }
  0x19   :  { %551 = vmatpush3.bf16.msra.mxu1 %v591_v23  ;;  %524 = vmatprep.subr.bf16.mxu0 %v592_v24 }
  0x1a   :  { %552 = vmatprep.subr.bf16.mxu1 %v593_v25 }
  0x1c   :  { %525 = vmatpush3.bf16.msra.mxu0 %v594_v26 }
  0x1d   :  { %553 = vmatpush3.bf16.msra.mxu1 %v595_v27  ;;  %526 = vmatprep.subr.bf16.mxu0 %v596_v28 }
  0x1e   :  { %554 = vmatprep.subr.bf16.mxu1 %v597_v29 }
  0x20   :  { %527 = vmatpush3.bf16.msra.mxu0 %v598_v30 }
  0x21   :  { %555 = vmatpush3.bf16.msra.mxu1 %v599_v31 }
  0x23   :  { %359 = vmatmul.mubr.bf16.vlgmr.msra.gmra.mxu0 %v600_v32 }
  0x24   :  { %408 = vmatmul.mubr.bf16.vlgmr.msra.gmra.mxu1 %v603_v34  ;;  %366 = vmatprep.mubr.bf16.mxu0 %v606_v36 }
  0x25   :  { %415 = vmatprep.mubr.bf16.mxu1 %v608_v37 }
  0x2b   :  { %367 = vmatmul.mubr.bf16.gmra.mxu0 %v610_v38 }
  0x2c   :  { %416 = vmatmul.mubr.bf16.gmra.mxu1 %v611_v39 }
  0xe3   :  { %v528_v40 = vpop.f32.mrf.mxu0 }
  0xe4   :  { %v556_v41 = vpop.f32.mrf.mxu1 }
  0xe5   :  { %v529_v43 = vpop.f32.mrf.mxu0 }
  0xe6   :  { %v530_v44 = vadd.f32 %v529_v43, %v528_v40  ;;  %v557_v45 = vpop.f32.mrf.mxu1 }
  0xe7   :  { %v531_v46 = vpop.f32.mrf.mxu0  ;;  %v558_v50 = vadd.f32 %v557_v45, %v556_v41 }
  0xe8   :  { %v361_v47 = vadd.f32 %v530_v44, %v452_v42  ;;  %v559_v48 = vpop.f32.mrf.mxu1 }
  0xe9   :  { %v532_v49 = vpop.f32.mrf.mxu0 }
  0xea   :  { %v533_v51 = vadd.f32 %v532_v49, %v531_v46  ;;  %v560_v52 = vpop.f32.mrf.mxu1  ;;  %v410_v54 = vadd.f32 %v558_v50, %v361_v47 }
  0xeb   :  { %v534_v53 = vpop.f32.mrf.mxu0  ;;  %v561_v56 = vadd.f32 %v560_v52, %v559_v48 }
  0xec   :  { %v364_v55 = vadd.f32 %v533_v51, %v452_v42  ;;  %v562_v57 = vpop.f32.mrf.mxu1  ;;  %v424_v63 = vmax.f32 %v410_v54, 0.0 }
  0xed   :  { %v535_v58 = vpop.f32.mrf.mxu0 }
  0xee   :  { %v413_v59 = vadd.f32 %v561_v56, %v364_v55  ;;  %v536_v60 = vadd.f32 %v535_v58, %v534_v53  ;;  %v563_v61 = vpop.f32.mrf.mxu1 }
  0xef   :  { %v537_v62 = vpop.f32.mrf.mxu0  ;;  %v564_v5 = vadd.f32 %v563_v61, %v562_v57 }
  0xf0   :  { %v425_v0 = vmax.f32 %v413_v59, 0.0  ;;  %v369_v1 = vadd.f32 %v536_v60, %v452_v42  ;;  %v565_v2 = vpop.f32.mrf.mxu1 }
  0xf1   :  { %v538_v3 = vpop.f32.mrf.mxu0 }
  0xf2   :  { %v504_v4 = vpack.c.bf16 %v425_v0, %v424_v63  ;;  %v539_v6 = vadd.f32 %v538_v3, %v537_v62  ;;  %v566_v7 = vpop.f32.mrf.mxu1  ;;  %v418_v8 = vadd.f32 %v564_v5, %v369_v1 }
  0xf3   :  { %v567_v10 = vadd.f32 %v566_v7, %v565_v2 }
  0xf4   :  { %505 = vst [vmem:[%s764_s3] sm:$0xff] %v504_v4   ;;  %v372_v9 = vadd.f32 %v539_v6, %v452_v42  ;;  %v426_v12 = vmax.f32 %v418_v8, 0.0 }
  0xf6   :  { %v421_v11 = vadd.f32 %v567_v10, %v372_v9 }
  0xf8   :  { %v427_v13 = vmax.f32 %v421_v11, 0.0 }
  0xfa   :  { %v509_v14 = vpack.c.bf16 %v427_v13, %v426_v12 }
  0xfc   :  { %511 = vst [vmem:[%s764_s3 + $0x8] sm:$0xff] %v509_v14  }

</bundles_post_ra>
